<compile_context>
chip_gen: v5e
topology: v5e:2x2
jax: 0.10.0
libtpu: 0.0.40
codegen_flags: <defaults>
</compile_context>

<pallas_src>
import functools

import numpy as np
import jax
import jax.numpy as jnp
from jax.experimental import pallas as pl
from jax.experimental.pallas import tpu as pltpu


_VMEM_LIMIT = 32 * 1024 * 1024   # explicit scoped-VMEM budget, safe on v5e/v6e/v7x
_TM = 256                        # MXU-friendly tile caps
_TN = 256
_TK = 256
_LANES = 128


def _round_up(x, m):
    return ((x + m - 1) // m) * m


def _pad2(a, rows, cols):
    pr, pc = rows - a.shape[0], cols - a.shape[1]
    if pr == 0 and pc == 0:
        return a
    return jnp.pad(a, ((0, pr), (0, pc)))


def _choose_tile(size, cap, unit):
    """Pad `size` to a multiple of `unit` and pick a tile that divides the
    padded size (largest multiple of `unit` <= cap).  Avoids the old
    round-up-to-tile-cap over-padding (up to ~2x wasted MXU work)."""
    padded = _round_up(size, unit)
    if padded <= cap:
        return padded, padded
    best = 0
    start = (cap // unit) * unit
    for cand in range(start, unit - 1, -unit):
        if padded % cand == 0:
            best = cand
            break
    if best >= max(unit, cap // 4):
        return best, padded
    # degenerate divisor: pad mildly to a multiple of a modest round tile
    tile = max(unit, cap // 2)
    return tile, _round_up(padded, tile)


# ----------------------------------------------------------------------------
# In-kernel math helpers (only Mosaic-supported elementwise ops).
# ----------------------------------------------------------------------------
def _erf(x):
    # Abramowitz & Stegun 7.1.26 polynomial, |err| < 1.5e-7 (f32-accurate),
    # so exact (erf-based) GELU matches torch.nn.GELU() semantics.
    # TODO(synk): on v5e (no bf16 VPU) a tanh-approx GELU would move this work
    # to the EUP if the fc1 epilogue ever becomes VALU-bound.
    a1, a2, a3, a4, a5 = 0.254829592, -0.284496736, 1.421413741, -1.453152027, 1.061405429
    p = 0.3275911
    ax = jnp.abs(x)
    t = 1.0 / (1.0 + p * ax)
    poly = ((((a5 * t + a4) * t + a3) * t + a2) * t + a1) * t
    y = 1.0 - poly * jnp.exp(-ax * ax)
    return jnp.where(x >= 0, y, -y)


def _gelu_exact(x):
    return x * 0.5 * (1.0 + _erf(x * np.float32(1.0 / np.sqrt(2.0))))


def _sigmoid(x):
    # exact identity sigmoid(x) = 0.5*(tanh(x/2)+1); tanh lowers to the EUP.
    return 0.5 * (jnp.tanh(0.5 * x) + 1.0)


# ----------------------------------------------------------------------------
# Fused (LayerNorm) + matmul + bias (+activation) (+grouped LN) (+residual)
# (+LSTM gates) kernel.
# ----------------------------------------------------------------------------
def _linear_kernel(x_ref, w_ref, b_ref, *rest, activation, has_ln, has_res,
                   group_ln_groups, true_n, lstm):
    idx = 0
    if has_ln:
        g_ref, bt_ref = rest[idx], rest[idx + 1]; idx += 2
    if has_res:
        r_ref = rest[idx]; idx += 1
    if lstm:
        cx_ref = rest[idx]; idx += 1
    if group_ln_groups:
        gg_ref, gb_ref = rest[idx], rest[idx + 1]; idx += 2
    if lstm:
        o_ref, ct_ref = rest[idx], rest[idx + 1]; idx += 2
    else:
        o_ref = rest[idx]; idx += 1
    acc_ref = rest[idx]; idx += 1
    if has_ln:
        xln_ref = rest[idx]; idx += 1

    j = pl.program_id(1)
    k = pl.program_id(2)

    @pl.when(k == 0)
    def _init():
        acc_ref[...] = jnp.zeros_like(acc_ref)

    if has_ln:
        # LN prologue computed once per row tile and cached for all N tiles
        # (j grid axis is marked "arbitrary", so within a core j starts at 0).
        @pl.when(j == 0)
        def _ln():
            xf = x_ref[...].astype(jnp.float32)
            mean = jnp.mean(xf, axis=-1, keepdims=True)
            var = jnp.mean(jnp.square(xf - mean), axis=-1, keepdims=True)
            xf = (xf - mean) * jax.lax.rsqrt(var + 1e-5) * g_ref[...] + bt_ref[...]
            xln_ref[...] = xf.astype(xln_ref.dtype)
        x = xln_ref[...]
    else:
        x = x_ref[...]

    acc_ref[...] += jnp.dot(x, w_ref[...], preferred_element_type=jnp.float32)

    @pl.when(k == pl.num_programs(2) - 1)
    def _finalize():
        acc = acc_ref[...] + b_ref[...]
        if activation == "gelu":
            acc = _gelu_exact(acc)
        elif activation == "sigmoid":
            acc = _sigmoid(acc)
        if group_ln_groups:
            # grouped LayerNorm over contiguous lane groups (PatchExpanding norm)
            gsz = true_n // group_ln_groups
            pieces = []
            for g in range(group_ln_groups):
                seg = acc[:, g * gsz:(g + 1) * gsz]
                mu = jnp.mean(seg, axis=-1, keepdims=True)
                var = jnp.mean(jnp.square(seg - mu), axis=-1, keepdims=True)
                pieces.append((seg - mu) * jax.lax.rsqrt(var + 1e-5)
                              * gg_ref[...] + gb_ref[...])
            if acc.shape[1] > true_n:
                pieces.append(jnp.zeros((acc.shape[0], acc.shape[1] - true_n),
                                        jnp.float32))
            acc = jnp.concatenate(pieces, axis=-1)
        if has_res:
            acc = acc + r_ref[...].astype(jnp.float32)
        if lstm:
            ft = _sigmoid(acc)
            cell = jnp.tanh(acc)
            ct = ft * (cx_ref[...].astype(jnp.float32) + cell)
            ht = ft * jnp.tanh(ct)
            o_ref[...] = ht.astype(o_ref.dtype)
            ct_ref[...] = ct.astype(ct_ref.dtype)
        else:
            o_ref[...] = acc.astype(o_ref.dtype)


def linear(x, w, b=None, activation=None, ln=None, residual=None,
           group_ln=None, lstm_cx=None, out_dtype=None):
    """y = (optional LN(x)) @ w + b (+activation) (+grouped LN) (+residual)
    (+SwinLSTM gates), as a single tiled Pallas matmul kernel.

    Operands are cast to bf16 for the MXU (f32 accumulation).  Output lanes
    padded to a multiple of 128 (lane-dense stores) and sliced back here.
    If `lstm_cx` is given, returns (Ht, Ct)."""
    orig = x.shape
    if out_dtype is None:
        out_dtype = x.dtype
    K = orig[-1]
    M = int(np.prod(orig[:-1]))
    N = w.shape[1]

    tm, M_pad = _choose_tile(M, _TM, 16)         # 16: bf16 sublane packing
    if group_ln is not None:
        N_pad = _round_up(N, _LANES)             # grouped-LN needs one N tile
        tn = N_pad
    else:
        tn, N_pad = _choose_tile(N, _TN, _LANES)
    if ln is not None or K <= 1024:
        tk, K_pad, kt = K, K, 1                  # single K block (LN prologue)
    else:
        tk, K_pad = _choose_tile(K, _TK, _LANES)
        kt = K_pad // tk

    x2 = x.reshape(M, K)
    if ln is None:
        x2 = x2.astype(jnp.bfloat16)             # LN prologue wants f32 statistics
    x2 = _pad2(x2, M_pad, K_pad)
    w2 = _pad2(w.astype(jnp.bfloat16), K_pad, N_pad)
    if b is None:
        b = jnp.zeros((N,), jnp.float32)
    b2 = _pad2(b.reshape(1, N).astype(jnp.float32), 1, N_pad)

    inputs = [x2, w2, b2]
    if kt > 1:
        # extra weight-stream buffering hides the K DMA on low-HBM-BW parts (v5e)
        w_spec = pl.BlockSpec((tk, tn), lambda i, j, k: (k, j),
                              pipeline_mode=pl.Buffered(3))
    else:
        w_spec = pl.BlockSpec((tk, tn), lambda i, j, k: (k, j))
    in_specs = [
        pl.BlockSpec((tm, tk), lambda i, j, k: (i, k)),
        w_spec,
        pl.BlockSpec((1, tn), lambda i, j, k: (0, j)),
    ]
    if ln is not None:
        g, beta = ln
        inputs += [g.reshape(1, K).astype(jnp.float32),
                   beta.reshape(1, K).astype(jnp.float32)]
        in_specs += [pl.BlockSpec((1, K), lambda i, j, k: (0, 0)),
                     pl.BlockSpec((1, K), lambda i, j, k: (0, 0))]
    if residual is not None:
        r2 = _pad2(residual.reshape(M, N).astype(jnp.float32), M_pad, N_pad)
        inputs.append(r2)
        in_specs.append(pl.BlockSpec((tm, tn), lambda i, j, k: (i, j)))
    if lstm_cx is not None:
        c2 = _pad2(lstm_cx.reshape(M, N).astype(jnp.float32), M_pad, N_pad)
        inputs.append(c2)
        in_specs.append(pl.BlockSpec((tm, tn), lambda i, j, k: (i, j)))
    if group_ln is not None:
        gg, gb, ngroups = group_ln
        gsz = N // ngroups
        inputs += [gg.reshape(1, gsz).astype(jnp.float32),
                   gb.reshape(1, gsz).astype(jnp.float32)]
        in_specs += [pl.BlockSpec((1, gsz), lambda i, j, k: (0, 0)),
                     pl.BlockSpec((1, gsz), lambda i, j, k: (0, 0))]
    else:
        ngroups = 0

    scratch = [pltpu.VMEM((tm, tn), jnp.float32)]
    if ln is not None:
        scratch.append(pltpu.VMEM((tm, K), jnp.bfloat16))

    if lstm_cx is not None:
        out_shape = (jax.ShapeDtypeStruct((M_pad, N_pad), out_dtype),
                     jax.ShapeDtypeStruct((M_pad, N_pad), out_dtype))
        out_specs = (pl.BlockSpec((tm, tn), lambda i, j, k: (i, j)),
                     pl.BlockSpec((tm, tn), lambda i, j, k: (i, j)))
    else:
        out_shape = jax.ShapeDtypeStruct((M_pad, N_pad), out_dtype)
        out_specs = pl.BlockSpec((tm, tn), lambda i, j, k: (i, j))

    kernel = functools.partial(_linear_kernel, activation=activation,
                               has_ln=ln is not None, has_res=residual is not None,
                               group_ln_groups=ngroups, true_n=N,
                               lstm=lstm_cx is not None)
    sem_j = "arbitrary" if ln is not None else "parallel"
    res = pl.pallas_call(
        kernel,
        out_shape=out_shape,
        grid=(M_pad // tm, N_pad // tn, kt),
        in_specs=in_specs,
        out_specs=out_specs,
        scratch_shapes=scratch,
        compiler_params=pltpu.CompilerParams(
            dimension_semantics=("parallel", sem_j, "arbitrary"),
            vmem_limit_bytes=_VMEM_LIMIT),
    )(*inputs)
    if lstm_cx is not None:
        ht, ct = res
        ht = ht[:M, :N].reshape(orig[:-1] + (N,))
        ct = ct[:M, :N].reshape(orig[:-1] + (N,))
        return ht, ct
    return res[:M, :N].reshape(orig[:-1] + (N,))


# ----------------------------------------------------------------------------
# Fused "red" path: LN(x), LN(hx) -> concat (K=2C) -> single matmul + bias.
# ----------------------------------------------------------------------------
def _red_kernel(x_ref, hx_ref, w_ref, b_ref, g_ref, bt_ref, o_ref):
    def ln(v_ref):
        vf = v_ref[...].astype(jnp.float32)
        mu = jnp.mean(vf, axis=-1, keepdims=True)
        var = jnp.mean(jnp.square(vf - mu), axis=-1, keepdims=True)
        vf = (vf - mu) * jax.lax.rsqrt(var + 1e-5) * g_ref[...] + bt_ref[...]
        return vf.astype(jnp.bfloat16)
    cat = jnp.concatenate([ln(x_ref), ln(hx_ref)], axis=-1)     # (tm, 2C) bf16
    y = jnp.dot(cat, w_ref[...], preferred_element_type=jnp.float32) + b_ref[...]
    o_ref[...] = y.astype(o_ref.dtype)


def red_linear(x, hx, red_w, red_b, gamma, beta):
    B, L, C = x.shape
    M = B * L
    N = red_w.shape[1]
    tm, M_pad = _choose_tile(M, _TM, 16)
    tn, N_pad = _choose_tile(N, _TN, _LANES)
    x2 = _pad2(x.reshape(M, C), M_pad, C)
    h2 = _pad2(hx.reshape(M, C), M_pad, C)
    w2 = _pad2(red_w.astype(jnp.bfloat16), 2 * C, N_pad)
    b2 = _pad2(red_b.reshape(1, N).astype(jnp.float32), 1, N_pad)
    out = pl.pallas_call(
        _red_kernel,
        out_shape=jax.ShapeDtypeStruct((M_pad, N_pad), jnp.bfloat16),
        grid=(M_pad // tm, N_pad // tn),
        in_specs=[
            pl.BlockSpec((tm, C), lambda i, j: (i, 0)),
            pl.BlockSpec((tm, C), lambda i, j: (i, 0)),
            pl.BlockSpec((2 * C, tn), lambda i, j: (0, j)),
            pl.BlockSpec((1, tn), lambda i, j: (0, j)),
            pl.BlockSpec((1, C), lambda i, j: (0, 0)),
            pl.BlockSpec((1, C), lambda i, j: (0, 0)),
        ],
        out_specs=pl.BlockSpec((tm, tn), lambda i, j: (i, j)),
        compiler_params=pltpu.CompilerParams(
            dimension_semantics=("parallel", "parallel"),
            vmem_limit_bytes=_VMEM_LIMIT),
    )(x2, h2, w2, b2, gamma.reshape(1, C).astype(jnp.float32),
      beta.reshape(1, C).astype(jnp.float32))
    return out[:M, :N].reshape(B, L, N)


# ----------------------------------------------------------------------------
# Window attention core: one grid step = G windows, all heads, lane-dense I/O.
# Consumes the qkv-linear output directly; relative-position bias / shift mask
# are combined in-kernel (no HBM broadcast, no head transposes in the wrapper).
# ----------------------------------------------------------------------------
def _attn_kernel(qkv_ref, rb_ref, m_ref, o_ref, *, scale, num_heads, nw, has_mask):
    qkv = qkv_ref[...]                     # (G, N, 3C) bf16
    G, Nt, C3 = qkv.shape
    C = C3 // 3
    hd = C // num_heads
    outs = []
    for h in range(num_heads):
        q = qkv[:, :, h * hd:(h + 1) * hd]
        k = qkv[:, :, C + h * hd:C + (h + 1) * hd]
        v = qkv[:, :, 2 * C + h * hd:2 * C + (h + 1) * hd]
        s = jax.lax.dot_general(q, k, (((2,), (2,)), ((0,), (0,))),
                                preferred_element_type=jnp.float32) * scale
        s = s + rb_ref[h]                  # (N, N) broadcast over G
        if has_mask:
            s = (s.reshape(G // nw, nw, Nt, Nt) + m_ref[...]).reshape(G, Nt, Nt)
        mx = jnp.max(s, axis=-1, keepdims=True)
        e = jnp.exp(s - mx)
        p = e * pl.reciprocal(jnp.sum(e, axis=-1, keepdims=True), approx=True)
        outs.append(jax.lax.dot_general(p.astype(v.dtype), v,
                                        (((2,), (1,)), ((0,), (0,))),
                                        preferred_element_type=jnp.float32))
    o_ref[...] = jnp.concatenate(outs, axis=-1).astype(o_ref.dtype)


def attention_core(qkv, rel_bias, attn_mask, scale, num_heads):
    """qkv: (B_, N, 3C) bf16.  Returns (B_, N, C) bf16 (lane-dense in C)."""
    B_, Nt, C3 = qkv.shape
    C = C3 // 3
    if attn_mask is None:
        mask = jnp.zeros((1, Nt, Nt), jnp.float32)
        nw, has_mask = 1, False
    else:
        mask = attn_mask.astype(jnp.float32)
        nw, has_mask = int(attn_mask.shape[0]), True

    # Windows per grid step: multiple of nW when masked; cap so per-head f32
    # score intermediates stay ~<=2 MiB (v7x's 64 MiB VMEM headroom) and so the
    # grid keeps >=2 steps for v7x's two TensorCores whenever B_ allows it.
    G = nw if has_mask else 1
    score_cap = max(1, (2 * 1024 * 1024) // (Nt * Nt * 4))
    cap = max(G, min(256, score_cap))
    while G * 2 <= cap and B_ % (G * 2) == 0 and B_ // (G * 2) >= 2:
        G *= 2

    kernel = functools.partial(_attn_kernel, scale=scale, num_heads=num_heads,
                               nw=nw, has_mask=has_mask)
    return pl.pallas_call(
        kernel,
        out_shape=jax.ShapeDtypeStruct((B_, Nt, C), jnp.bfloat16),
        grid=(B_ // G,),
        in_specs=[
            pl.BlockSpec((G, Nt, 3 * C), lambda g: (g, 0, 0)),
            pl.BlockSpec((num_heads, Nt, Nt), lambda g: (0, 0, 0)),
            pl.BlockSpec((nw, Nt, Nt), lambda g: (0, 0, 0)),
        ],
        out_specs=pl.BlockSpec((G, Nt, C), lambda g: (g, 0, 0)),
        compiler_params=pltpu.CompilerParams(
            dimension_semantics=("parallel",),
            vmem_limit_bytes=_VMEM_LIMIT),
    )(qkv.astype(jnp.bfloat16), rel_bias.astype(jnp.float32), mask)


# ----------------------------------------------------------------------------
# Fused ConvTranspose2d(3x3, stride 2, pad 1, out_pad 1) + sigmoid kernel.
# The stride-2 transposed conv is decomposed into its 4 output-parity
# sub-convolutions on the COMPACT input (no zero-dilated image in HBM); the
# 4 shifted taps are concatenated to a (HW, 4C) operand and multiplied once
# by a packed (4C, 128) weight (K=4C matmul, bias + sigmoid epilogue).
# ----------------------------------------------------------------------------
def _convt_kernel(xp_ref, w_ref, b_ref, o_ref, *, H, W):
    C = xp_ref.shape[-1]
    x00 = xp_ref[0, 0:H, 0:W, :].reshape(H * W, C)
    x01 = xp_ref[0, 0:H, 1:W + 1, :].reshape(H * W, C)
    x10 = xp_ref[0, 1:H + 1, 0:W, :].reshape(H * W, C)
    x11 = xp_ref[0, 1:H + 1, 1:W + 1, :].reshape(H * W, C)
    xc = jnp.concatenate([x00, x01, x10, x11], axis=-1)      # (HW, 4C) bf16
    y = jnp.dot(xc, w_ref[...], preferred_element_type=jnp.float32) + b_ref[...]
    o_ref[0] = _sigmoid(y).astype(o_ref.dtype)


def patch_inflated_sigmoid_forward(p, x, input_resolution):
    # TODO(synk): one batch image per grid step; very large resolutions would
    # need an extra row-block grid axis to stay inside v7x's 64 MiB VMEM.
    H, W = input_resolution
    B, L, C = x.shape
    O = p["conv_b"].shape[0]
    xh = x.reshape(B, H, W, C)
    # pad right/bottom by one pixel: x[m,n+1] / x[m+1,n] reads at the edge are 0
    xp = jnp.pad(xh, ((0, 0), (0, 1), (0, 1), (0, 0))).astype(jnp.bfloat16)
    Hp, Wp = H + 1, W + 1

    # Pack taps: rows = [x00; x01; x10; x11] blocks of C,
    # cols = parity groups (pr,pc) of O outputs each (derived from
    # oh = 2*ih - 1 + kh, ow = 2*iw - 1 + kw).
    w = p["conv_w"].astype(jnp.float32)                      # (C, O, 3, 3)
    z = jnp.zeros((C, O), jnp.float32)
    wk = lambda kh, kw: w[:, :, kh, kw]
    col00 = jnp.concatenate([wk(1, 1), z,        z,        z       ], axis=0)
    col01 = jnp.concatenate([wk(1, 2), wk(1, 0), z,        z       ], axis=0)
    col10 = jnp.concatenate([wk(2, 1), z,        wk(0, 1), z       ], axis=0)
    col11 = jnp.concatenate([wk(2, 2), wk(2, 0), wk(0, 2), wk(0, 0)], axis=0)
    wall = jnp.concatenate([col00, col01, col10, col11], axis=1)     # (4C, 4O)
    NP = _LANES      # TODO(synk): assumes 4*O <= 128 (in_chans <= 32)
    wall = jnp.pad(wall, ((0, 0), (0, NP - 4 * O))).astype(jnp.bfloat16)
    bias = jnp.pad(jnp.tile(p["conv_b"].astype(jnp.float32), 4),
                   (0, NP - 4 * O)).reshape(1, NP)

    out = pl.pallas_call(
        functools.partial(_convt_kernel, H=H, W=W),
        out_shape=jax.ShapeDtypeStruct((B, H * W, NP), jnp.float32),
        grid=(B,),
        in_specs=[
            pl.BlockSpec((1, Hp, Wp, C), lambda b: (b, 0, 0, 0)),
            pl.BlockSpec((4 * C, NP), lambda b: (0, 0)),
            pl.BlockSpec((1, NP), lambda b: (0, 0)),
        ],
        out_specs=pl.BlockSpec((1, H * W, NP), lambda b: (b, 0, 0)),
        compiler_params=pltpu.CompilerParams(
            dimension_semantics=("parallel",),
            vmem_limit_bytes=_VMEM_LIMIT),
    )(xp, wall, bias)
    # lanes are (pr, pc, o); interleave parities -> NCHW
    out = out[:, :, :4 * O].reshape(B, H, W, 2, 2, O)
    out = out.transpose(0, 5, 1, 3, 2, 4).reshape(B, O, 2 * H, 2 * W)
    return out


# ----------------------------------------------------------------------------
# Swin helpers (host-side / trace-time glue)
# ----------------------------------------------------------------------------
def relative_position_index(ws):
    coords = np.stack(np.meshgrid(np.arange(ws), np.arange(ws), indexing="ij"))
    coords_flat = coords.reshape(2, -1)
    rel = coords_flat[:, :, None] - coords_flat[:, None, :]
    rel = rel.transpose(1, 2, 0).astype(np.int64)
    rel[:, :, 0] += ws - 1
    rel[:, :, 1] += ws - 1
    rel[:, :, 0] *= 2 * ws - 1
    return rel.sum(-1)  # (N, N)


def _window_partition_np(x, ws):
    B, H, W, C = x.shape
    x = x.reshape(B, H // ws, ws, W // ws, ws, C).transpose(0, 1, 3, 2, 4, 5)
    return x.reshape(-1, ws, ws, C)


def compute_attn_mask(H, W, ws, shift):
    if shift == 0:
        return None
    img_mask = np.zeros((1, H, W, 1), np.float32)
    cnt = 0
    for h in (slice(0, -ws), slice(-ws, -shift), slice(-shift, None)):
        for w in (slice(0, -ws), slice(-ws, -shift), slice(-shift, None)):
            img_mask[:, h, w, :] = cnt
            cnt += 1
    mw = _window_partition_np(img_mask, ws).reshape(-1, ws * ws)
    am = mw[:, None, :] - mw[:, :, None]
    am = np.where(am != 0, -100.0, 0.0).astype(np.float32)
    return jnp.asarray(am)  # (nW, N, N)


# ----------------------------------------------------------------------------
# Module forwards (glue around Pallas kernels)
# ----------------------------------------------------------------------------
def window_attention(p, xw, num_heads, attn_mask, rel_index, qkv_ln):
    B_, Nt, C = xw.shape
    hd = C // num_heads
    scale = hd ** -0.5
    qkv = linear(xw, p["qkv_w"], p["qkv_b"], ln=qkv_ln, out_dtype=jnp.bfloat16)
    rel_bias = p["rel_table"][rel_index.reshape(-1)]
    rel_bias = rel_bias.reshape(Nt, Nt, num_heads).transpose(2, 0, 1)  # (heads,N,N)
    out = attention_core(qkv, rel_bias, attn_mask, scale, num_heads)   # (B_,N,C) bf16
    return linear(out, p["proj_w"], p["proj_b"], out_dtype=jnp.bfloat16)


def stb_forward(p, x, hx, input_resolution, num_heads, window_size, shift_size,
                attn_mask, rel_index, lstm_cx=None):
    H, W = input_resolution
    B, L, C = x.shape
    shortcut = x
    if hx is not None:
        # red(cat(norm1(x), norm1(hx))): one fused kernel, K = 2C matmul.
        xa = red_linear(x, hx, p["red_w"], p["red_b"], p["norm1_g"], p["norm1_b"])
        qkv_ln = None
    else:
        # norm1 is per-token -> commutes with roll / window partition; fuse it
        # as the qkv matmul prologue.
        xa = x
        qkv_ln = (p["norm1_g"], p["norm1_b"])

    xr = xa.reshape(B, H, W, C)
    if shift_size > 0:
        xr = jnp.roll(xr, shift=(-shift_size, -shift_size), axis=(1, 2))
    ws = window_size
    xw = (xr.reshape(B, H // ws, ws, W // ws, ws, C)
            .transpose(0, 1, 3, 2, 4, 5)
            .reshape(-1, ws * ws, C))
    aw = window_attention(p, xw, num_heads, attn_mask, rel_index, qkv_ln)
    xr = (aw.reshape(B, H // ws, W // ws, ws, ws, C)
            .transpose(0, 1, 3, 2, 4, 5)
            .reshape(B, H, W, C))
    if shift_size > 0:
        xr = jnp.roll(xr, shift=(shift_size, shift_size), axis=(1, 2))
    x1 = shortcut + xr.reshape(B, H * W, C)        # drop_path1 = identity (eval)

    # MLP: norm2 as fc1 prologue, exact GELU as fc1 epilogue; residual (and,
    # for the last block of the cell, the SwinLSTM gates) as the fc2 epilogue.
    h = linear(x1, p["fc1_w"], p["fc1_b"], activation="gelu",
               ln=(p["norm2_g"], p["norm2_b"]), out_dtype=jnp.bfloat16)
    if lstm_cx is None:
        return linear(h, p["fc2_w"], p["fc2_b"], residual=x1,
                      out_dtype=jnp.float32)
    return linear(h, p["fc2_w"], p["fc2_b"], residual=x1, lstm_cx=lstm_cx,
                  out_dtype=jnp.float32)            # -> (Ht, Ct)


def swinlstm_cell_forward(blocks, xt, hidden_states, input_resolution, num_heads,
                          window_size, attn_mask, rel_index):
    if hidden_states is None:
        hx = jnp.zeros_like(xt)
        cx = jnp.zeros_like(xt)
    else:
        hx, cx = hidden_states
    depth = len(blocks)
    prev = None
    last = None
    for index, blk in enumerate(blocks):
        shift = 0 if index % 2 == 0 else window_size // 2
        mask = attn_mask if shift > 0 else None
        cx_arg = cx if index == depth - 1 else None        # fuse gates into last block
        if index == 0:
            res = stb_forward(blk, xt, hx, input_resolution, num_heads, window_size,
                              shift, mask, rel_index, lstm_cx=cx_arg)
        elif index % 2 == 0:
            res = stb_forward(blk, prev, xt, input_resolution, num_heads, window_size,
                              shift, mask, rel_index, lstm_cx=cx_arg)
        else:
            res = stb_forward(blk, prev, None, input_resolution, num_heads, window_size,
                              shift, mask, rel_index, lstm_cx=cx_arg)
        if cx_arg is None:
            prev = res
        last = res
    Ht, Ct = last
    return Ht, (Ht, Ct)


def patch_expanding_forward(p, x, input_resolution):
    H, W = input_resolution
    # expand linear with the post-rearrange LayerNorm fused as a grouped-LN
    # epilogue (each output token's channels are one contiguous lane group of
    # the expand output, so norm-before-rearrange == norm-after-rearrange).
    x = linear(x, p["expand_w"], None, group_ln=(p["norm_g"], p["norm_b"], 4),
               out_dtype=jnp.bfloat16)
    B, L, C = x.shape
    x = x.reshape(B, H, W, 2, 2, C // 4)
    x = x.transpose(0, 1, 3, 2, 4, 5).reshape(B, H * 2 * W * 2, C // 4)
    return x


def upsample_forward(params, cfg, x, y):
    window_size = cfg["window_size"]
    rel_index = relative_position_index(window_size)
    hidden_states_up = []
    for i_layer, lcfg in enumerate(cfg["layer_cfgs"]):
        res = lcfg["input_resolution"]
        heads = lcfg["num_heads"]
        attn_mask = compute_attn_mask(res[0], res[1], window_size, window_size // 2)
        Ht, hidden_state = swinlstm_cell_forward(
            params["layers"][i_layer], x, y[i_layer], res, heads, window_size,
            attn_mask, rel_index)
        x = patch_expanding_forward(params["upsample"][i_layer], Ht, res)
        hidden_states_up.append(hidden_state)
    x = patch_inflated_sigmoid_forward(params["unembed"], x, cfg["patches_resolution"])
    return hidden_states_up, x


# ----------------------------------------------------------------------------
# Deterministic parameter construction (synthetic weights, shapes per __init__)
# ----------------------------------------------------------------------------
def _randn(key, shape, scale=0.02):
    return scale * jax.random.normal(key, shape, dtype=jnp.float32)


def init_stb_params(key, dim, num_heads, window_size, mlp_ratio):
    hidden = int(dim * mlp_ratio)
    ks = jax.random.split(key, 11)
    return dict(
        norm1_g=jnp.ones((dim,), jnp.float32),
        norm1_b=jnp.zeros((dim,), jnp.float32),
        red_w=_randn(ks[0], (2 * dim, dim)),
        red_b=_randn(ks[1], (dim,)),
        qkv_w=_randn(ks[2], (dim, 3 * dim)),
        qkv_b=_randn(ks[3], (3 * dim,)),
        rel_table=_randn(ks[4], ((2 * window_size - 1) ** 2, num_heads)),
        proj_w=_randn(ks[5], (dim, dim)),
        proj_b=_randn(ks[6], (dim,)),
        norm2_g=jnp.ones((dim,), jnp.float32),
        norm2_b=jnp.zeros((dim,), jnp.float32),
        fc1_w=_randn(ks[7], (dim, hidden)),
        fc1_b=_randn(ks[8], (hidden,)),
        fc2_w=_randn(ks[9], (hidden, dim)),
        fc2_b=_randn(ks[10], (dim,)),
    )


def build_upsample(key, img_size=16, patch_size=2, in_chans=4, embed_dim=16,
                   depths_upsample=(2,), num_heads=(2,), window_size=2, mlp_ratio=4.0):
    num_layers = len(depths_upsample)
    pr = (img_size // patch_size, img_size // patch_size)
    keys = jax.random.split(key, 2 * num_layers + 1)
    params = {"layers": [], "upsample": []}
    layer_cfgs = []
    ki = 0
    for i_layer in range(num_layers):
        r1 = pr[0] // 2 ** (num_layers - i_layer)
        r2 = pr[1] // 2 ** (num_layers - i_layer)
        dim = int(embed_dim * 2 ** (num_layers - i_layer))
        depth = depths_upsample[num_layers - 1 - i_layer]
        heads = num_heads[num_layers - 1 - i_layer]
        bkeys = jax.random.split(keys[ki], depth); ki += 1
        blocks = [init_stb_params(bkeys[d], dim, heads, window_size, mlp_ratio)
                  for d in range(depth)]
        ukey = keys[ki]; ki += 1
        up = dict(
            expand_w=_randn(jax.random.fold_in(ukey, 0), (dim, 2 * dim)),
            norm_g=jnp.ones((dim // 2,), jnp.float32),
            norm_b=jnp.zeros((dim // 2,), jnp.float32),
        )
        params["layers"].append(blocks)
        params["upsample"].append(up)
        layer_cfgs.append(dict(input_resolution=(r1, r2), dim=dim, depth=depth,
                               num_heads=heads))
    ckey = keys[ki]
    params["unembed"] = dict(
        conv_w=_randn(jax.random.fold_in(ckey, 0), (embed_dim, in_chans, 3, 3)),
        conv_b=_randn(jax.random.fold_in(ckey, 1), (in_chans,)),
    )
    cfg = dict(img_size=img_size, in_chans=in_chans, embed_dim=embed_dim,
               patches_resolution=pr, window_size=window_size, layer_cfgs=layer_cfgs)
    return params, cfg


# ----------------------------------------------------------------------------
if __name__ == "__main__":
    key = jax.random.PRNGKey(0)
    pkey, xkey, hkey, ckey = jax.random.split(key, 4)

    params, cfg = build_upsample(pkey, img_size=16, patch_size=2, in_chans=4,
                                 embed_dim=16, depths_upsample=(2,), num_heads=(2,),
                                 window_size=2, mlp_ratio=4.0)

    B = 2
    l0 = cfg["layer_cfgs"][0]
    r1, r2 = l0["input_resolution"]
    dim0 = l0["dim"]
    x = jax.random.normal(xkey, (B, r1 * r2, dim0), dtype=jnp.float32)
    y = []
    for i, lcfg in enumerate(cfg["layer_cfgs"]):
        rr1, rr2 = lcfg["input_resolution"]
        d = lcfg["dim"]
        hx = jax.random.normal(jax.random.fold_in(hkey, i), (B, rr1 * rr2, d), jnp.float32)
        cx = jax.random.normal(jax.random.fold_in(ckey, i), (B, rr1 * rr2, d), jnp.float32)
        y.append((hx, cx))

    fwd = jax.jit(lambda p, xx, yy: upsample_forward(p, cfg, xx, yy))
    hidden_states_up, out = fwd(params, x, y)
    out = jax.block_until_ready(out)
    for ht, ct in hidden_states_up:
        jax.block_until_ready(ht)
        jax.block_until_ready(ct)

    assert out.shape == (B, cfg["in_chans"], cfg["img_size"], cfg["img_size"])
    assert hidden_states_up[0][0].shape == (B, r1 * r2, dim0)
    # TODO(synk): DropPath / dropout are eval-mode identities here (rates unused).
    print("KERNEL_OK")
</pallas_src>

<mosaic_0001>
module attributes {stable_mosaic.version = 11 : i64} {
  func.func @_red_kernel(%arg0: i32, %arg1: i32, %arg2: memref<32x32xf32, #tpu.memory_space<vmem>>, %arg3: memref<32x32xf32, #tpu.memory_space<vmem>>, %arg4: memref<64x128xbf16, #tpu.memory_space<vmem>>, %arg5: memref<1x128xf32, #tpu.memory_space<vmem>>, %arg6: memref<1x32xf32, #tpu.memory_space<vmem>>, %arg7: memref<1x32xf32, #tpu.memory_space<vmem>>, %arg8: memref<32x128xbf16, #tpu.memory_space<vmem>>) attributes {dimension_semantics = [#tpu.dimension_semantics<parallel>, #tpu.dimension_semantics<parallel>], iteration_bounds = array<i64: 1, 1>, scalar_prefetch = 0 : i64, scratch_operands = 0 : i64, tpu.core_type = #tpu.core_type<tc>, window_params = [{transform_indices = @transform_0, window_bounds = array<i64: 32, 32>}, {transform_indices = @transform_1, window_bounds = array<i64: 32, 32>}, {transform_indices = @transform_2, window_bounds = array<i64: 64, 128>}, {transform_indices = @transform_3, window_bounds = array<i64: 1, 128>}, {pipeline_mode = #tpu.pipeline_mode<synchronous>, transform_indices = @transform_4, window_bounds = array<i64: 1, 32>}, {pipeline_mode = #tpu.pipeline_mode<synchronous>, transform_indices = @transform_5, window_bounds = array<i64: 1, 32>}, {transform_indices = @transform_6, window_bounds = array<i64: 32, 128>}]} {
    %c0 = arith.constant 0 : index
    %c0_0 = arith.constant 0 : index
    %0 = vector.load %arg2[%c0, %c0_0] : memref<32x32xf32, #tpu.memory_space<vmem>>, vector<32x32xf32>
    %cst = arith.constant dense<0.000000e+00> : vector<32xf32>
    %1 = vector.multi_reduction <add>, %0, %cst [1] : vector<32x32xf32> to vector<32xf32>
    %2 = vector.shape_cast %1 : vector<32xf32> to vector<32x1xf32>
    %cst_1 = arith.constant 3.200000e+01 : f32
    %3 = vector.broadcast %cst_1 : f32 to vector<32x1xf32>
    %4 = arith.divf %2, %3 : vector<32x1xf32>
    %5 = vector.broadcast %4 : vector<32x1xf32> to vector<32x32xf32>
    %6 = arith.subf %0, %5 : vector<32x32xf32>
    %7 = arith.mulf %6, %6 : vector<32x32xf32>
    %cst_2 = arith.constant dense<0.000000e+00> : vector<32xf32>
    %8 = vector.multi_reduction <add>, %7, %cst_2 [1] : vector<32x32xf32> to vector<32xf32>
    %9 = vector.shape_cast %8 : vector<32xf32> to vector<32x1xf32>
    %cst_3 = arith.constant 3.200000e+01 : f32
    %10 = vector.broadcast %cst_3 : f32 to vector<32x1xf32>
    %11 = arith.divf %9, %10 : vector<32x1xf32>
    %12 = vector.broadcast %4 : vector<32x1xf32> to vector<32x32xf32>
    %13 = arith.subf %0, %12 : vector<32x32xf32>
    %cst_4 = arith.constant 9.99999974E-6 : f32
    %14 = vector.broadcast %cst_4 : f32 to vector<32x1xf32>
    %15 = arith.addf %11, %14 : vector<32x1xf32>
    %16 = math.rsqrt %15 : vector<32x1xf32>
    %17 = vector.broadcast %16 : vector<32x1xf32> to vector<32x32xf32>
    %18 = arith.mulf %13, %17 : vector<32x32xf32>
    %c0_5 = arith.constant 0 : index
    %c0_6 = arith.constant 0 : index
    %19 = vector.load %arg6[%c0_5, %c0_6] : memref<1x32xf32, #tpu.memory_space<vmem>>, vector<1x32xf32>
    %20 = vector.broadcast %19 : vector<1x32xf32> to vector<32x32xf32>
    %21 = arith.mulf %18, %20 : vector<32x32xf32>
    %c0_7 = arith.constant 0 : index
    %c0_8 = arith.constant 0 : index
    %22 = vector.load %arg7[%c0_7, %c0_8] : memref<1x32xf32, #tpu.memory_space<vmem>>, vector<1x32xf32>
    %23 = vector.broadcast %22 : vector<1x32xf32> to vector<32x32xf32>
    %24 = arith.addf %21, %23 : vector<32x32xf32>
    %25 = arith.truncf %24 : vector<32x32xf32> to vector<32x32xbf16>
    %c0_9 = arith.constant 0 : index
    %c0_10 = arith.constant 0 : index
    %26 = vector.load %arg3[%c0_9, %c0_10] : memref<32x32xf32, #tpu.memory_space<vmem>>, vector<32x32xf32>
    %cst_11 = arith.constant dense<0.000000e+00> : vector<32xf32>
    %27 = vector.multi_reduction <add>, %26, %cst_11 [1] : vector<32x32xf32> to vector<32xf32>
    %28 = vector.shape_cast %27 : vector<32xf32> to vector<32x1xf32>
    %cst_12 = arith.constant 3.200000e+01 : f32
    %29 = vector.broadcast %cst_12 : f32 to vector<32x1xf32>
    %30 = arith.divf %28, %29 : vector<32x1xf32>
    %31 = vector.broadcast %30 : vector<32x1xf32> to vector<32x32xf32>
    %32 = arith.subf %26, %31 : vector<32x32xf32>
    %33 = arith.mulf %32, %32 : vector<32x32xf32>
    %cst_13 = arith.constant dense<0.000000e+00> : vector<32xf32>
    %34 = vector.multi_reduction <add>, %33, %cst_13 [1] : vector<32x32xf32> to vector<32xf32>
    %35 = vector.shape_cast %34 : vector<32xf32> to vector<32x1xf32>
    %cst_14 = arith.constant 3.200000e+01 : f32
    %36 = vector.broadcast %cst_14 : f32 to vector<32x1xf32>
    %37 = arith.divf %35, %36 : vector<32x1xf32>
    %38 = vector.broadcast %30 : vector<32x1xf32> to vector<32x32xf32>
    %39 = arith.subf %26, %38 : vector<32x32xf32>
    %cst_15 = arith.constant 9.99999974E-6 : f32
    %40 = vector.broadcast %cst_15 : f32 to vector<32x1xf32>
    %41 = arith.addf %37, %40 : vector<32x1xf32>
    %42 = math.rsqrt %41 : vector<32x1xf32>
    %43 = vector.broadcast %42 : vector<32x1xf32> to vector<32x32xf32>
    %44 = arith.mulf %39, %43 : vector<32x32xf32>
    %c0_16 = arith.constant 0 : index
    %c0_17 = arith.constant 0 : index
    %45 = vector.load %arg6[%c0_16, %c0_17] : memref<1x32xf32, #tpu.memory_space<vmem>>, vector<1x32xf32>
    %46 = vector.broadcast %45 : vector<1x32xf32> to vector<32x32xf32>
    %47 = arith.mulf %44, %46 : vector<32x32xf32>
    %c0_18 = arith.constant 0 : index
    %c0_19 = arith.constant 0 : index
    %48 = vector.load %arg7[%c0_18, %c0_19] : memref<1x32xf32, #tpu.memory_space<vmem>>, vector<1x32xf32>
    %49 = vector.broadcast %48 : vector<1x32xf32> to vector<32x32xf32>
    %50 = arith.addf %47, %49 : vector<32x32xf32>
    %51 = arith.truncf %50 : vector<32x32xf32> to vector<32x32xbf16>
    %52 = tpu.concatenate %25, %51 in 1 : vector<32x32xbf16>, vector<32x32xbf16> -> vector<32x64xbf16>
    %c0_20 = arith.constant 0 : index
    %c0_21 = arith.constant 0 : index
    %53 = vector.load %arg4[%c0_20, %c0_21] : memref<64x128xbf16, #tpu.memory_space<vmem>>, vector<64x128xbf16>
    %cst_22 = arith.constant dense<0.000000e+00> : vector<32x128xf32>
    %54 = tpu.matmul %52, %53, %cst_22 {dimension_numbers = #tpu.dot_dimension_numbers<[1], [0], [0], [1], [0, 0, 1, 1], [], []>} : vector<32x64xbf16>, vector<64x128xbf16>, vector<32x128xf32> -> vector<32x128xf32>
    %c0_23 = arith.constant 0 : index
    %c0_24 = arith.constant 0 : index
    %55 = vector.load %arg5[%c0_23, %c0_24] : memref<1x128xf32, #tpu.memory_space<vmem>>, vector<1x128xf32>
    %56 = vector.broadcast %55 : vector<1x128xf32> to vector<32x128xf32>
    %57 = arith.addf %54, %56 : vector<32x128xf32>
    %58 = arith.truncf %57 : vector<32x128xf32> to vector<32x128xbf16>
    %c0_25 = arith.constant 0 : index
    %c0_26 = arith.constant 0 : index
    %59 = vector.load %arg8[%c0_25, %c0_26] : memref<32x128xbf16, #tpu.memory_space<vmem>>, vector<32x128xbf16>
    tpu.vector_store %arg8[%c0_25, %c0_26], %58 {strides = array<i32>} : memref<32x128xbf16, #tpu.memory_space<vmem>>, vector<32x128xbf16>,
    return
  }
  func.func @transform_0(%arg0: i32, %arg1: i32) -> (i32, i32) {
    %c0_i32 = arith.constant 0 : i32
    %c0_i32_0 = arith.constant 0 : i32
    return %arg0, %c0_i32 : i32, i32
  }
  func.func @transform_1(%arg0: i32, %arg1: i32) -> (i32, i32) {
    %c0_i32 = arith.constant 0 : i32
    %c0_i32_0 = arith.constant 0 : i32
    return %arg0, %c0_i32 : i32, i32
  }
  func.func @transform_2(%arg0: i32, %arg1: i32) -> (i32, i32) {
    %c0_i32 = arith.constant 0 : i32
    %c0_i32_0 = arith.constant 0 : i32
    return %c0_i32, %arg1 : i32, i32
  }
  func.func @transform_3(%arg0: i32, %arg1: i32) -> (i32, i32) {
    %c0_i32 = arith.constant 0 : i32
    %c0_i32_0 = arith.constant 0 : i32
    return %c0_i32, %arg1 : i32, i32
  }
  func.func @transform_4(%arg0: i32, %arg1: i32) -> (i32, i32) {
    %c0_i32 = arith.constant 0 : i32
    %c0_i32_0 = arith.constant 0 : i32
    %c0_i32_1 = arith.constant 0 : i32
    return %c0_i32, %c0_i32_0 : i32, i32
  }
  func.func @transform_5(%arg0: i32, %arg1: i32) -> (i32, i32) {
    %c0_i32 = arith.constant 0 : i32
    %c0_i32_0 = arith.constant 0 : i32
    %c0_i32_1 = arith.constant 0 : i32
    return %c0_i32, %c0_i32_0 : i32, i32
  }
  func.func @transform_6(%arg0: i32, %arg1: i32) -> (i32, i32) {
    %c0_i32 = arith.constant 0 : i32
    return %arg0, %arg1 : i32, i32
  }
}

module attributes {stable_mosaic.version = 11 : i64} {
  func.func @_linear_kernel(%arg0: i32, %arg1: i32, %arg2: i32, %arg3: memref<32x32xbf16, #tpu.memory_space<vmem>>, %arg4: memref<32x128xbf16, #tpu.memory_space<vmem>>, %arg5: memref<1x128xf32, #tpu.memory_space<vmem>>, %arg6: memref<32x128xbf16, #tpu.memory_space<vmem>>, %arg7: memref<32x128xf32, #tpu.memory_space<vmem>>) attributes {dimension_semantics = [#tpu.dimension_semantics<parallel>, #tpu.dimension_semantics<parallel>, #tpu.dimension_semantics<arbitrary>], iteration_bounds = array<i64: 1, 1, 1>, scalar_prefetch = 0 : i64, scratch_operands = 1 : i64, tpu.core_type = #tpu.core_type<tc>, window_params = [{transform_indices = @transform_0, window_bounds = array<i64: 32, 32>}, {transform_indices = @transform_1, window_bounds = array<i64: 32, 128>}, {transform_indices = @transform_2, window_bounds = array<i64: 1, 128>}, {transform_indices = @transform_3, window_bounds = array<i64: 32, 128>}]} {
    %c0_i32 = arith.constant 0 : i32
    %0 = arith.cmpi eq, %arg2, %c0_i32 : i32
    %1 = arith.extui %0 : i1 to i32
    %c0_i32_0 = arith.constant 0 : i32
    %2 = arith.cmpi ne, %1, %c0_i32_0 : i32
    scf.if %2 {
      %cst_10 = arith.constant 0.000000e+00 : f32
      %12 = vector.broadcast %cst_10 : f32 to vector<32x128xf32>
      %c0_11 = arith.constant 0 : index
      %c0_12 = arith.constant 0 : index
      %13 = vector.load %arg7[%c0_11, %c0_12] : memref<32x128xf32, #tpu.memory_space<vmem>>, vector<32x128xf32>
      tpu.vector_store %arg7[%c0_11, %c0_12], %12 {strides = array<i32>} : memref<32x128xf32, #tpu.memory_space<vmem>>, vector<32x128xf32>,
    } else {
    }
    %c0 = arith.constant 0 : index
    %c0_1 = arith.constant 0 : index
    %3 = vector.load %arg3[%c0, %c0_1] : memref<32x32xbf16, #tpu.memory_space<vmem>>, vector<32x32xbf16>
    %c0_2 = arith.constant 0 : index
    %c0_3 = arith.constant 0 : index
    %4 = vector.load %arg7[%c0_2, %c0_3] : memref<32x128xf32, #tpu.memory_space<vmem>>, vector<32x128xf32>
    %c0_4 = arith.constant 0 : index
    %c0_5 = arith.constant 0 : index
    %5 = vector.load %arg4[%c0_4, %c0_5] : memref<32x128xbf16, #tpu.memory_space<vmem>>, vector<32x128xbf16>
    %cst = arith.constant dense<0.000000e+00> : vector<32x128xf32>
    %6 = tpu.matmul %3, %5, %cst {dimension_numbers = #tpu.dot_dimension_numbers<[1], [0], [0], [1], [0, 0, 1, 1], [], []>} : vector<32x32xbf16>, vector<32x128xbf16>, vector<32x128xf32> -> vector<32x128xf32>
    %7 = arith.addf %4, %6 : vector<32x128xf32>
    %c0_6 = arith.constant 0 : index
    %c0_7 = arith.constant 0 : index
    %8 = vector.load %arg7[%c0_6, %c0_7] : memref<32x128xf32, #tpu.memory_space<vmem>>, vector<32x128xf32>
    tpu.vector_store %arg7[%c0_6, %c0_7], %7 {strides = array<i32>} : memref<32x128xf32, #tpu.memory_space<vmem>>, vector<32x128xf32>,
    %c0_i32_8 = arith.constant 0 : i32
    %9 = arith.cmpi eq, %arg2, %c0_i32_8 : i32
    %10 = arith.extui %9 : i1 to i32
    %c0_i32_9 = arith.constant 0 : i32
    %11 = arith.cmpi ne, %10, %c0_i32_9 : i32
    scf.if %11 {
      %c0_10 = arith.constant 0 : index
      %c0_11 = arith.constant 0 : index
      %12 = vector.load %arg7[%c0_10, %c0_11] : memref<32x128xf32, #tpu.memory_space<vmem>>, vector<32x128xf32>
      %c0_12 = arith.constant 0 : index
      %c0_13 = arith.constant 0 : index
      %13 = vector.load %arg5[%c0_12, %c0_13] : memref<1x128xf32, #tpu.memory_space<vmem>>, vector<1x128xf32>
      %14 = vector.broadcast %13 : vector<1x128xf32> to vector<32x128xf32>
      %15 = arith.addf %12, %14 : vector<32x128xf32>
      %16 = arith.truncf %15 : vector<32x128xf32> to vector<32x128xbf16>
      %c0_14 = arith.constant 0 : index
      %c0_15 = arith.constant 0 : index
      %17 = vector.load %arg6[%c0_14, %c0_15] : memref<32x128xbf16, #tpu.memory_space<vmem>>, vector<32x128xbf16>
      tpu.vector_store %arg6[%c0_14, %c0_15], %16 {strides = array<i32>} : memref<32x128xbf16, #tpu.memory_space<vmem>>, vector<32x128xbf16>,
    } else {
    }
    return
  }
  func.func @transform_0(%arg0: i32, %arg1: i32, %arg2: i32) -> (i32, i32) {
    %c0_i32 = arith.constant 0 : i32
    return %arg0, %arg2 : i32, i32
  }
  func.func @transform_1(%arg0: i32, %arg1: i32, %arg2: i32) -> (i32, i32) {
    %c0_i32 = arith.constant 0 : i32
    return %arg2, %arg1 : i32, i32
  }
  func.func @transform_2(%arg0: i32, %arg1: i32, %arg2: i32) -> (i32, i32) {
    %c0_i32 = arith.constant 0 : i32
    %c0_i32_0 = arith.constant 0 : i32
    return %c0_i32, %arg1 : i32, i32
  }
  func.func @transform_3(%arg0: i32, %arg1: i32, %arg2: i32) -> (i32, i32) {
    %c0_i32 = arith.constant 0 : i32
    return %arg0, %arg1 : i32, i32
  }
}

module attributes {stable_mosaic.version = 11 : i64} {
  func.func @_attn_kernel(%arg0: i32, %arg1: memref<4x4x96xbf16, #tpu.memory_space<vmem>>, %arg2: memref<2x4x4xf32, #tpu.memory_space<vmem>>, %arg3: memref<1x4x4xf32, #tpu.memory_space<vmem>>, %arg4: memref<4x4x32xbf16, #tpu.memory_space<vmem>>) attributes {dimension_semantics = [#tpu.dimension_semantics<parallel>], iteration_bounds = array<i64: 2>, scalar_prefetch = 0 : i64, scratch_operands = 0 : i64, tpu.core_type = #tpu.core_type<tc>, window_params = [{transform_indices = @transform_0, window_bounds = array<i64: 4, 4, 96>}, {pipeline_mode = #tpu.pipeline_mode<synchronous>, transform_indices = @transform_1, window_bounds = array<i64: 2, 4, 4>}, {pipeline_mode = #tpu.pipeline_mode<synchronous>, transform_indices = @transform_2, window_bounds = array<i64: 1, 4, 4>}, {transform_indices = @transform_3, window_bounds = array<i64: 4, 4, 32>}]} {
    %c0 = arith.constant 0 : index
    %c0_0 = arith.constant 0 : index
    %c0_1 = arith.constant 0 : index
    %0 = vector.load %arg1[%c0, %c0_0, %c0_1] : memref<4x4x96xbf16, #tpu.memory_space<vmem>>, vector<4x4x96xbf16>
    %1 = vector.extract_strided_slice %0 {offsets = [0, 0, 0], sizes = [4, 4, 16], strides = [1, 1, 1]} : vector<4x4x96xbf16> to vector<4x4x16xbf16>
    %2 = vector.extract_strided_slice %0 {offsets = [0, 0, 32], sizes = [4, 4, 16], strides = [1, 1, 1]} : vector<4x4x96xbf16> to vector<4x4x16xbf16>
    %3 = vector.extract_strided_slice %0 {offsets = [0, 0, 64], sizes = [4, 4, 16], strides = [1, 1, 1]} : vector<4x4x96xbf16> to vector<4x4x16xbf16>
    %cst = arith.constant dense<0.000000e+00> : vector<4x4x4xf32>
    %4 = tpu.matmul %1, %2, %cst {dimension_numbers = #tpu.dot_dimension_numbers<[2], [2], [1], [1], [0, 0, 0, 1, 1, 1], [0], [0]>} : vector<4x4x16xbf16>, vector<4x4x16xbf16>, vector<4x4x4xf32> -> vector<4x4x4xf32>
    %cst_2 = arith.constant 2.500000e-01 : f32
    %5 = vector.broadcast %cst_2 : f32 to vector<4x4x4xf32>
    %6 = arith.mulf %4, %5 : vector<4x4x4xf32>
    %c0_3 = arith.constant 0 : index
    %c0_4 = arith.constant 0 : index
    %c0_5 = arith.constant 0 : index
    %7 = vector.load %arg2[%c0_3, %c0_4, %c0_5] : memref<2x4x4xf32, #tpu.memory_space<vmem>>, vector<1x4x4xf32>
    %8 = vector.shape_cast %7 : vector<1x4x4xf32> to vector<4x4xf32>
    %9 = vector.shape_cast %8 : vector<4x4xf32> to vector<1x4x4xf32>
    %10 = vector.broadcast %9 : vector<1x4x4xf32> to vector<4x4x4xf32>
    %11 = arith.addf %6, %10 : vector<4x4x4xf32>
    %cst_6 = arith.constant dense<0xFF800000> : vector<4x4xf32>
    %12 = vector.multi_reduction <maximumf>, %11, %cst_6 [2] : vector<4x4x4xf32> to vector<4x4xf32>
    %13 = vector.shape_cast %12 : vector<4x4xf32> to vector<4x4x1xf32>
    %14 = vector.broadcast %13 : vector<4x4x1xf32> to vector<4x4x4xf32>
    %15 = arith.subf %11, %14 : vector<4x4x4xf32>
    %16 = math.exp %15 : vector<4x4x4xf32>
    %cst_7 = arith.constant dense<0.000000e+00> : vector<4x4xf32>
    %17 = vector.multi_reduction <add>, %16, %cst_7 [2] : vector<4x4x4xf32> to vector<4x4xf32>
    %18 = vector.shape_cast %17 : vector<4x4xf32> to vector<4x4x1xf32>
    %19 = tpu.reciprocal %18 {approx = true} : vector<4x4x1xf32> -> vector<4x4x1xf32>
    %20 = vector.broadcast %19 : vector<4x4x1xf32> to vector<4x4x4xf32>
    %21 = arith.mulf %16, %20 : vector<4x4x4xf32>
    %22 = arith.truncf %21 : vector<4x4x4xf32> to vector<4x4x4xbf16>
    %cst_8 = arith.constant dense<0.000000e+00> : vector<4x4x16xf32>
    %23 = tpu.matmul %22, %3, %cst_8 {dimension_numbers = #tpu.dot_dimension_numbers<[2], [1], [1], [2], [0, 0, 0, 1, 1, 2], [0], [0]>} : vector<4x4x4xbf16>, vector<4x4x16xbf16>, vector<4x4x16xf32> -> vector<4x4x16xf32>
    %24 = vector.extract_strided_slice %0 {offsets = [0, 0, 16], sizes = [4, 4, 16], strides = [1, 1, 1]} : vector<4x4x96xbf16> to vector<4x4x16xbf16>
    %25 = vector.extract_strided_slice %0 {offsets = [0, 0, 48], sizes = [4, 4, 16], strides = [1, 1, 1]} : vector<4x4x96xbf16> to vector<4x4x16xbf16>
    %26 = vector.extract_strided_slice %0 {offsets = [0, 0, 80], sizes = [4, 4, 16], strides = [1, 1, 1]} : vector<4x4x96xbf16> to vector<4x4x16xbf16>
    %cst_9 = arith.constant dense<0.000000e+00> : vector<4x4x4xf32>
    %27 = tpu.matmul %24, %25, %cst_9 {dimension_numbers = #tpu.dot_dimension_numbers<[2], [2], [1], [1], [0, 0, 0, 1, 1, 1], [0], [0]>} : vector<4x4x16xbf16>, vector<4x4x16xbf16>, vector<4x4x4xf32> -> vector<4x4x4xf32>
    %cst_10 = arith.constant 2.500000e-01 : f32
    %28 = vector.broadcast %cst_10 : f32 to vector<4x4x4xf32>
    %29 = arith.mulf %27, %28 : vector<4x4x4xf32>
    %c1 = arith.constant 1 : index
    %c0_11 = arith.constant 0 : index
    %c0_12 = arith.constant 0 : index
    %30 = vector.load %arg2[%c1, %c0_11, %c0_12] : memref<2x4x4xf32, #tpu.memory_space<vmem>>, vector<1x4x4xf32>
    %31 = vector.shape_cast %30 : vector<1x4x4xf32> to vector<4x4xf32>
    %32 = vector.shape_cast %31 : vector<4x4xf32> to vector<1x4x4xf32>
    %33 = vector.broadcast %32 : vector<1x4x4xf32> to vector<4x4x4xf32>
    %34 = arith.addf %29, %33 : vector<4x4x4xf32>
    %cst_13 = arith.constant dense<0xFF800000> : vector<4x4xf32>
    %35 = vector.multi_reduction <maximumf>, %34, %cst_13 [2] : vector<4x4x4xf32> to vector<4x4xf32>
    %36 = vector.shape_cast %35 : vector<4x4xf32> to vector<4x4x1xf32>
    %37 = vector.broadcast %36 : vector<4x4x1xf32> to vector<4x4x4xf32>
    %38 = arith.subf %34, %37 : vector<4x4x4xf32>
    %39 = math.exp %38 : vector<4x4x4xf32>
    %cst_14 = arith.constant dense<0.000000e+00> : vector<4x4xf32>
    %40 = vector.multi_reduction <add>, %39, %cst_14 [2] : vector<4x4x4xf32> to vector<4x4xf32>
    %41 = vector.shape_cast %40 : vector<4x4xf32> to vector<4x4x1xf32>
    %42 = tpu.reciprocal %41 {approx = true} : vector<4x4x1xf32> -> vector<4x4x1xf32>
    %43 = vector.broadcast %42 : vector<4x4x1xf32> to vector<4x4x4xf32>
    %44 = arith.mulf %39, %43 : vector<4x4x4xf32>
    %45 = arith.truncf %44 : vector<4x4x4xf32> to vector<4x4x4xbf16>
    %cst_15 = arith.constant dense<0.000000e+00> : vector<4x4x16xf32>
    %46 = tpu.matmul %45, %26, %cst_15 {dimension_numbers = #tpu.dot_dimension_numbers<[2], [1], [1], [2], [0, 0, 0, 1, 1, 2], [0], [0]>} : vector<4x4x4xbf16>, vector<4x4x16xbf16>, vector<4x4x16xf32> -> vector<4x4x16xf32>
    %47 = tpu.concatenate %23, %46 in 2 : vector<4x4x16xf32>, vector<4x4x16xf32> -> vector<4x4x32xf32>
    %48 = arith.truncf %47 : vector<4x4x32xf32> to vector<4x4x32xbf16>
    %c0_16 = arith.constant 0 : index
    %c0_17 = arith.constant 0 : index
    %c0_18 = arith.constant 0 : index
    %49 = vector.load %arg4[%c0_16, %c0_17, %c0_18] : memref<4x4x32xbf16, #tpu.memory_space<vmem>>, vector<4x4x32xbf16>
    tpu.vector_store %arg4[%c0_16, %c0_17, %c0_18], %48 {strides = array<i32>} : memref<4x4x32xbf16, #tpu.memory_space<vmem>>, vector<4x4x32xbf16>,
    return
  }
  func.func @transform_0(%arg0: i32) -> (i32, i32, i32) {
    %c0_i32 = arith.constant 0 : i32
    %c0_i32_0 = arith.constant 0 : i32
    %c0_i32_1 = arith.constant 0 : i32
    return %arg0, %c0_i32, %c0_i32_0 : i32, i32, i32
  }
  func.func @transform_1(%arg0: i32) -> (i32, i32, i32) {
    %c0_i32 = arith.constant 0 : i32
    %c0_i32_0 = arith.constant 0 : i32
    %c0_i32_1 = arith.constant 0 : i32
    %c0_i32_2 = arith.constant 0 : i32
    return %c0_i32, %c0_i32_0, %c0_i32_1 : i32, i32, i32
  }
  func.func @transform_2(%arg0: i32) -> (i32, i32, i32) {
    %c0_i32 = arith.constant 0 : i32
    %c0_i32_0 = arith.constant 0 : i32
    %c0_i32_1 = arith.constant 0 : i32
    %c0_i32_2 = arith.constant 0 : i32
    return %c0_i32, %c0_i32_0, %c0_i32_1 : i32, i32, i32
  }
  func.func @transform_3(%arg0: i32) -> (i32, i32, i32) {
    %c0_i32 = arith.constant 0 : i32
    %c0_i32_0 = arith.constant 0 : i32
    %c0_i32_1 = arith.constant 0 : i32
    return %arg0, %c0_i32, %c0_i32_0 : i32, i32, i32
  }
}

module attributes {stable_mosaic.version = 11 : i64} {
  func.func @_linear_kernel(%arg0: i32, %arg1: i32, %arg2: i32, %arg3: memref<32x32xf32, #tpu.memory_space<vmem>>, %arg4: memref<32x128xbf16, #tpu.memory_space<vmem>>, %arg5: memref<1x128xf32, #tpu.memory_space<vmem>>, %arg6: memref<1x32xf32, #tpu.memory_space<vmem>>, %arg7: memref<1x32xf32, #tpu.memory_space<vmem>>, %arg8: memref<32x128xbf16, #tpu.memory_space<vmem>>, %arg9: memref<32x128xf32, #tpu.memory_space<vmem>>, %arg10: memref<32x32xbf16, #tpu.memory_space<vmem>>) attributes {dimension_semantics = [#tpu.dimension_semantics<parallel>, #tpu.dimension_semantics<arbitrary>, #tpu.dimension_semantics<arbitrary>], iteration_bounds = array<i64: 1, 1, 1>, scalar_prefetch = 0 : i64, scratch_operands = 2 : i64, tpu.core_type = #tpu.core_type<tc>, window_params = [{transform_indices = @transform_0, window_bounds = array<i64: 32, 32>}, {transform_indices = @transform_1, window_bounds = array<i64: 32, 128>}, {transform_indices = @transform_2, window_bounds = array<i64: 1, 128>}, {pipeline_mode = #tpu.pipeline_mode<synchronous>, transform_indices = @transform_3, window_bounds = array<i64: 1, 32>}, {pipeline_mode = #tpu.pipeline_mode<synchronous>, transform_indices = @transform_4, window_bounds = array<i64: 1, 32>}, {transform_indices = @transform_5, window_bounds = array<i64: 32, 128>}]} {
    %c0_i32 = arith.constant 0 : i32
    %0 = arith.cmpi eq, %arg2, %c0_i32 : i32
    %1 = arith.extui %0 : i1 to i32
    %c0_i32_0 = arith.constant 0 : i32
    %2 = arith.cmpi ne, %1, %c0_i32_0 : i32
    scf.if %2 {
      %cst_12 = arith.constant 0.000000e+00 : f32
      %15 = vector.broadcast %cst_12 : f32 to vector<32x128xf32>
      %c0_13 = arith.constant 0 : index
      %c0_14 = arith.constant 0 : index
      %16 = vector.load %arg9[%c0_13, %c0_14] : memref<32x128xf32, #tpu.memory_space<vmem>>, vector<32x128xf32>
      tpu.vector_store %arg9[%c0_13, %c0_14], %15 {strides = array<i32>} : memref<32x128xf32, #tpu.memory_space<vmem>>, vector<32x128xf32>,
    } else {
    }
    %c0_i32_1 = arith.constant 0 : i32
    %3 = arith.cmpi eq, %arg1, %c0_i32_1 : i32
    %4 = arith.extui %3 : i1 to i32
    %c0_i32_2 = arith.constant 0 : i32
    %5 = arith.cmpi ne, %4, %c0_i32_2 : i32
    scf.if %5 {
      %c0_12 = arith.constant 0 : index
      %c0_13 = arith.constant 0 : index
      %15 = vector.load %arg3[%c0_12, %c0_13] : memref<32x32xf32, #tpu.memory_space<vmem>>, vector<32x32xf32>
      %cst_14 = arith.constant dense<0.000000e+00> : vector<32xf32>
      %16 = vector.multi_reduction <add>, %15, %cst_14 [1] : vector<32x32xf32> to vector<32xf32>
      %17 = vector.shape_cast %16 : vector<32xf32> to vector<32x1xf32>
      %cst_15 = arith.constant 3.200000e+01 : f32
      %18 = vector.broadcast %cst_15 : f32 to vector<32x1xf32>
      %19 = arith.divf %17, %18 : vector<32x1xf32>
      %20 = vector.broadcast %19 : vector<32x1xf32> to vector<32x32xf32>
      %21 = arith.subf %15, %20 : vector<32x32xf32>
      %22 = arith.mulf %21, %21 : vector<32x32xf32>
      %cst_16 = arith.constant dense<0.000000e+00> : vector<32xf32>
      %23 = vector.multi_reduction <add>, %22, %cst_16 [1] : vector<32x32xf32> to vector<32xf32>
      %24 = vector.shape_cast %23 : vector<32xf32> to vector<32x1xf32>
      %cst_17 = arith.constant 3.200000e+01 : f32
      %25 = vector.broadcast %cst_17 : f32 to vector<32x1xf32>
      %26 = arith.divf %24, %25 : vector<32x1xf32>
      %27 = vector.broadcast %19 : vector<32x1xf32> to vector<32x32xf32>
      %28 = arith.subf %15, %27 : vector<32x32xf32>
      %cst_18 = arith.constant 9.99999974E-6 : f32
      %29 = vector.broadcast %cst_18 : f32 to vector<32x1xf32>
      %30 = arith.addf %26, %29 : vector<32x1xf32>
      %31 = math.rsqrt %30 : vector<32x1xf32>
      %32 = vector.broadcast %31 : vector<32x1xf32> to vector<32x32xf32>
      %33 = arith.mulf %28, %32 : vector<32x32xf32>
      %c0_19 = arith.constant 0 : index
      %c0_20 = arith.constant 0 : index
      %34 = vector.load %arg6[%c0_19, %c0_20] : memref<1x32xf32, #tpu.memory_space<vmem>>, vector<1x32xf32>
      %35 = vector.broadcast %34 : vector<1x32xf32> to vector<32x32xf32>
      %36 = arith.mulf %33, %35 : vector<32x32xf32>
      %c0_21 = arith.constant 0 : index
      %c0_22 = arith.constant 0 : index
      %37 = vector.load %arg7[%c0_21, %c0_22] : memref<1x32xf32, #tpu.memory_space<vmem>>, vector<1x32xf32>
      %38 = vector.broadcast %37 : vector<1x32xf32> to vector<32x32xf32>
      %39 = arith.addf %36, %38 : vector<32x32xf32>
      %40 = arith.truncf %39 : vector<32x32xf32> to vector<32x32xbf16>
      %c0_23 = arith.constant 0 : index
      %c0_24 = arith.constant 0 : index
      %41 = vector.load %arg10[%c0_23, %c0_24] : memref<32x32xbf16, #tpu.memory_space<vmem>>, vector<32x32xbf16>
      tpu.vector_store %arg10[%c0_23, %c0_24], %40 {strides = array<i32>} : memref<32x32xbf16, #tpu.memory_space<vmem>>, vector<32x32xbf16>,
    } else {
    }
    %c0 = arith.constant 0 : index
    %c0_3 = arith.constant 0 : index
    %6 = vector.load %arg10[%c0, %c0_3] : memref<32x32xbf16, #tpu.memory_space<vmem>>, vector<32x32xbf16>
    %c0_4 = arith.constant 0 : index
    %c0_5 = arith.constant 0 : index
    %7 = vector.load %arg9[%c0_4, %c0_5] : memref<32x128xf32, #tpu.memory_space<vmem>>, vector<32x128xf32>
    %c0_6 = arith.constant 0 : index
    %c0_7 = arith.constant 0 : index
    %8 = vector.load %arg4[%c0_6, %c0_7] : memref<32x128xbf16, #tpu.memory_space<vmem>>, vector<32x128xbf16>
    %cst = arith.constant dense<0.000000e+00> : vector<32x128xf32>
    %9 = tpu.matmul %6, %8, %cst {dimension_numbers = #tpu.dot_dimension_numbers<[1], [0], [0], [1], [0, 0, 1, 1], [], []>} : vector<32x32xbf16>, vector<32x128xbf16>, vector<32x128xf32> -> vector<32x128xf32>
    %10 = arith.addf %7, %9 : vector<32x128xf32>
    %c0_8 = arith.constant 0 : index
    %c0_9 = arith.constant 0 : index
    %11 = vector.load %arg9[%c0_8, %c0_9] : memref<32x128xf32, #tpu.memory_space<vmem>>, vector<32x128xf32>
    tpu.vector_store %arg9[%c0_8, %c0_9], %10 {strides = array<i32>} : memref<32x128xf32, #tpu.memory_space<vmem>>, vector<32x128xf32>,
    %c0_i32_10 = arith.constant 0 : i32
    %12 = arith.cmpi eq, %arg2, %c0_i32_10 : i32
    %13 = arith.extui %12 : i1 to i32
    %c0_i32_11 = arith.constant 0 : i32
    %14 = arith.cmpi ne, %13, %c0_i32_11 : i32
    scf.if %14 {
      %c0_12 = arith.constant 0 : index
      %c0_13 = arith.constant 0 : index
      %15 = vector.load %arg9[%c0_12, %c0_13] : memref<32x128xf32, #tpu.memory_space<vmem>>, vector<32x128xf32>
      %c0_14 = arith.constant 0 : index
      %c0_15 = arith.constant 0 : index
      %16 = vector.load %arg5[%c0_14, %c0_15] : memref<1x128xf32, #tpu.memory_space<vmem>>, vector<1x128xf32>
      %17 = vector.broadcast %16 : vector<1x128xf32> to vector<32x128xf32>
      %18 = arith.addf %15, %17 : vector<32x128xf32>
      %cst_16 = arith.constant 5.000000e-01 : f32
      %19 = vector.broadcast %cst_16 : f32 to vector<32x128xf32>
      %20 = arith.mulf %18, %19 : vector<32x128xf32>
      %cst_17 = arith.constant 0.707106769 : f32
      %21 = vector.broadcast %cst_17 : f32 to vector<32x128xf32>
      %22 = arith.mulf %18, %21 : vector<32x128xf32>
      %23 = math.absf %22 : vector<32x128xf32>
      %cst_18 = arith.constant 0.327591091 : f32
      %24 = vector.broadcast %cst_18 : f32 to vector<32x128xf32>
      %25 = arith.mulf %24, %23 : vector<32x128xf32>
      %cst_19 = arith.constant 1.000000e+00 : f32
      %26 = vector.broadcast %cst_19 : f32 to vector<32x128xf32>
      %27 = arith.addf %26, %25 : vector<32x128xf32>
      %cst_20 = arith.constant 1.000000e+00 : f32
      %28 = vector.broadcast %cst_20 : f32 to vector<32x128xf32>
      %29 = arith.divf %28, %27 : vector<32x128xf32>
      %cst_21 = arith.constant 1.06140542 : f32
      %30 = vector.broadcast %cst_21 : f32 to vector<32x128xf32>
      %31 = arith.mulf %30, %29 : vector<32x128xf32>
      %cst_22 = arith.constant -1.45315206 : f32
      %32 = vector.broadcast %cst_22 : f32 to vector<32x128xf32>
      %33 = arith.addf %31, %32 : vector<32x128xf32>
      %34 = arith.mulf %33, %29 : vector<32x128xf32>
      %cst_23 = arith.constant 1.42141378 : f32
      %35 = vector.broadcast %cst_23 : f32 to vector<32x128xf32>
      %36 = arith.addf %34, %35 : vector<32x128xf32>
      %37 = arith.mulf %36, %29 : vector<32x128xf32>
      %cst_24 = arith.constant -0.284496725 : f32
      %38 = vector.broadcast %cst_24 : f32 to vector<32x128xf32>
      %39 = arith.addf %37, %38 : vector<32x128xf32>
      %40 = arith.mulf %39, %29 : vector<32x128xf32>
      %cst_25 = arith.constant 0.254829586 : f32
      %41 = vector.broadcast %cst_25 : f32 to vector<32x128xf32>
      %42 = arith.addf %40, %41 : vector<32x128xf32>
      %43 = arith.mulf %42, %29 : vector<32x128xf32>
      %cst_26 = arith.constant 0.000000e+00 : f32
      %44 = vector.broadcast %cst_26 : f32 to vector<32x128xf32>
      %45 = arith.subf %44, %23 : vector<32x128xf32>
      %46 = arith.mulf %45, %23 : vector<32x128xf32>
      %47 = math.exp %46 : vector<32x128xf32>
      %48 = arith.mulf %43, %47 : vector<32x128xf32>
      %cst_27 = arith.constant 1.000000e+00 : f32
      %49 = vector.broadcast %cst_27 : f32 to vector<32x128xf32>
      %50 = arith.subf %49, %48 : vector<32x128xf32>
      %cst_28 = arith.constant 0.000000e+00 : f32
      %51 = vector.broadcast %cst_28 : f32 to vector<32x128xf32>
      %52 = arith.cmpf oge, %22, %51 : vector<32x128xf32>
      %cst_29 = arith.constant 0.000000e+00 : f32
      %53 = vector.broadcast %cst_29 : f32 to vector<32x128xf32>
      %54 = arith.subf %53, %50 : vector<32x128xf32>
      %55 = arith.select %52, %50, %54 : vector<32x128xi1>, vector<32x128xf32>
      %cst_30 = arith.constant 1.000000e+00 : f32
      %56 = vector.broadcast %cst_30 : f32 to vector<32x128xf32>
      %57 = arith.addf %56, %55 : vector<32x128xf32>
      %58 = arith.mulf %20, %57 : vector<32x128xf32>
      %59 = arith.truncf %58 : vector<32x128xf32> to vector<32x128xbf16>
      %c0_31 = arith.constant 0 : index
      %c0_32 = arith.constant 0 : index
      %60 = vector.load %arg8[%c0_31, %c0_32] : memref<32x128xbf16, #tpu.memory_space<vmem>>, vector<32x128xbf16>
      tpu.vector_store %arg8[%c0_31, %c0_32], %59 {strides = array<i32>} : memref<32x128xbf16, #tpu.memory_space<vmem>>, vector<32x128xbf16>,
    } else {
    }
    return
  }
  func.func @transform_0(%arg0: i32, %arg1: i32, %arg2: i32) -> (i32, i32) {
    %c0_i32 = arith.constant 0 : i32
    return %arg0, %arg2 : i32, i32
  }
  func.func @transform_1(%arg0: i32, %arg1: i32, %arg2: i32) -> (i32, i32) {
    %c0_i32 = arith.constant 0 : i32
    return %arg2, %arg1 : i32, i32
  }
  func.func @transform_2(%arg0: i32, %arg1: i32, %arg2: i32) -> (i32, i32) {
    %c0_i32 = arith.constant 0 : i32
    %c0_i32_0 = arith.constant 0 : i32
    return %c0_i32, %arg1 : i32, i32
  }
  func.func @transform_3(%arg0: i32, %arg1: i32, %arg2: i32) -> (i32, i32) {
    %c0_i32 = arith.constant 0 : i32
    %c0_i32_0 = arith.constant 0 : i32
    %c0_i32_1 = arith.constant 0 : i32
    return %c0_i32, %c0_i32_0 : i32, i32
  }
  func.func @transform_4(%arg0: i32, %arg1: i32, %arg2: i32) -> (i32, i32) {
    %c0_i32 = arith.constant 0 : i32
    %c0_i32_0 = arith.constant 0 : i32
    %c0_i32_1 = arith.constant 0 : i32
    return %c0_i32, %c0_i32_0 : i32, i32
  }
  func.func @transform_5(%arg0: i32, %arg1: i32, %arg2: i32) -> (i32, i32) {
    %c0_i32 = arith.constant 0 : i32
    return %arg0, %arg1 : i32, i32
  }
}

module attributes {stable_mosaic.version = 11 : i64} {
  func.func @_linear_kernel(%arg0: i32, %arg1: i32, %arg2: i32, %arg3: memref<32x128xbf16, #tpu.memory_space<vmem>>, %arg4: memref<128x128xbf16, #tpu.memory_space<vmem>>, %arg5: memref<1x128xf32, #tpu.memory_space<vmem>>, %arg6: memref<32x128xf32, #tpu.memory_space<vmem>>, %arg7: memref<32x128xf32, #tpu.memory_space<vmem>>, %arg8: memref<32x128xf32, #tpu.memory_space<vmem>>) attributes {dimension_semantics = [#tpu.dimension_semantics<parallel>, #tpu.dimension_semantics<parallel>, #tpu.dimension_semantics<arbitrary>], iteration_bounds = array<i64: 1, 1, 1>, scalar_prefetch = 0 : i64, scratch_operands = 1 : i64, tpu.core_type = #tpu.core_type<tc>, window_params = [{transform_indices = @transform_0, window_bounds = array<i64: 32, 128>}, {transform_indices = @transform_1, window_bounds = array<i64: 128, 128>}, {transform_indices = @transform_2, window_bounds = array<i64: 1, 128>}, {transform_indices = @transform_3, window_bounds = array<i64: 32, 128>}, {transform_indices = @transform_4, window_bounds = array<i64: 32, 128>}]} {
    %c0_i32 = arith.constant 0 : i32
    %0 = arith.cmpi eq, %arg2, %c0_i32 : i32
    %1 = arith.extui %0 : i1 to i32
    %c0_i32_0 = arith.constant 0 : i32
    %2 = arith.cmpi ne, %1, %c0_i32_0 : i32
    scf.if %2 {
      %cst_10 = arith.constant 0.000000e+00 : f32
      %12 = vector.broadcast %cst_10 : f32 to vector<32x128xf32>
      %c0_11 = arith.constant 0 : index
      %c0_12 = arith.constant 0 : index
      %13 = vector.load %arg8[%c0_11, %c0_12] : memref<32x128xf32, #tpu.memory_space<vmem>>, vector<32x128xf32>
      tpu.vector_store %arg8[%c0_11, %c0_12], %12 {strides = array<i32>} : memref<32x128xf32, #tpu.memory_space<vmem>>, vector<32x128xf32>,
    } else {
    }
    %c0 = arith.constant 0 : index
    %c0_1 = arith.constant 0 : index
    %3 = vector.load %arg3[%c0, %c0_1] : memref<32x128xbf16, #tpu.memory_space<vmem>>, vector<32x128xbf16>
    %c0_2 = arith.constant 0 : index
    %c0_3 = arith.constant 0 : index
    %4 = vector.load %arg8[%c0_2, %c0_3] : memref<32x128xf32, #tpu.memory_space<vmem>>, vector<32x128xf32>
    %c0_4 = arith.constant 0 : index
    %c0_5 = arith.constant 0 : index
    %5 = vector.load %arg4[%c0_4, %c0_5] : memref<128x128xbf16, #tpu.memory_space<vmem>>, vector<128x128xbf16>
    %cst = arith.constant dense<0.000000e+00> : vector<32x128xf32>
    %6 = tpu.matmul %3, %5, %cst {dimension_numbers = #tpu.dot_dimension_numbers<[1], [0], [0], [1], [0, 0, 1, 1], [], []>} : vector<32x128xbf16>, vector<128x128xbf16>, vector<32x128xf32> -> vector<32x128xf32>
    %7 = arith.addf %4, %6 : vector<32x128xf32>
    %c0_6 = arith.constant 0 : index
    %c0_7 = arith.constant 0 : index
    %8 = vector.load %arg8[%c0_6, %c0_7] : memref<32x128xf32, #tpu.memory_space<vmem>>, vector<32x128xf32>
    tpu.vector_store %arg8[%c0_6, %c0_7], %7 {strides = array<i32>} : memref<32x128xf32, #tpu.memory_space<vmem>>, vector<32x128xf32>,
    %c0_i32_8 = arith.constant 0 : i32
    %9 = arith.cmpi eq, %arg2, %c0_i32_8 : i32
    %10 = arith.extui %9 : i1 to i32
    %c0_i32_9 = arith.constant 0 : i32
    %11 = arith.cmpi ne, %10, %c0_i32_9 : i32
    scf.if %11 {
      %c0_10 = arith.constant 0 : index
      %c0_11 = arith.constant 0 : index
      %12 = vector.load %arg8[%c0_10, %c0_11] : memref<32x128xf32, #tpu.memory_space<vmem>>, vector<32x128xf32>
      %c0_12 = arith.constant 0 : index
      %c0_13 = arith.constant 0 : index
      %13 = vector.load %arg5[%c0_12, %c0_13] : memref<1x128xf32, #tpu.memory_space<vmem>>, vector<1x128xf32>
      %14 = vector.broadcast %13 : vector<1x128xf32> to vector<32x128xf32>
      %15 = arith.addf %12, %14 : vector<32x128xf32>
      %c0_14 = arith.constant 0 : index
      %c0_15 = arith.constant 0 : index
      %16 = vector.load %arg6[%c0_14, %c0_15] : memref<32x128xf32, #tpu.memory_space<vmem>>, vector<32x128xf32>
      %17 = arith.addf %15, %16 : vector<32x128xf32>
      %c0_16 = arith.constant 0 : index
      %c0_17 = arith.constant 0 : index
      %18 = vector.load %arg7[%c0_16, %c0_17] : memref<32x128xf32, #tpu.memory_space<vmem>>, vector<32x128xf32>
      tpu.vector_store %arg7[%c0_16, %c0_17], %17 {strides = array<i32>} : memref<32x128xf32, #tpu.memory_space<vmem>>, vector<32x128xf32>,
    } else {
    }
    return
  }
  func.func @transform_0(%arg0: i32, %arg1: i32, %arg2: i32) -> (i32, i32) {
    %c0_i32 = arith.constant 0 : i32
    return %arg0, %arg2 : i32, i32
  }
  func.func @transform_1(%arg0: i32, %arg1: i32, %arg2: i32) -> (i32, i32) {
    %c0_i32 = arith.constant 0 : i32
    return %arg2, %arg1 : i32, i32
  }
  func.func @transform_2(%arg0: i32, %arg1: i32, %arg2: i32) -> (i32, i32) {
    %c0_i32 = arith.constant 0 : i32
    %c0_i32_0 = arith.constant 0 : i32
    return %c0_i32, %arg1 : i32, i32
  }
  func.func @transform_3(%arg0: i32, %arg1: i32, %arg2: i32) -> (i32, i32) {
    %c0_i32 = arith.constant 0 : i32
    return %arg0, %arg1 : i32, i32
  }
  func.func @transform_4(%arg0: i32, %arg1: i32, %arg2: i32) -> (i32, i32) {
    %c0_i32 = arith.constant 0 : i32
    return %arg0, %arg1 : i32, i32
  }
}

module attributes {stable_mosaic.version = 11 : i64} {
  func.func @_linear_kernel(%arg0: i32, %arg1: i32, %arg2: i32, %arg3: memref<32x32xf32, #tpu.memory_space<vmem>>, %arg4: memref<32x128xbf16, #tpu.memory_space<vmem>>, %arg5: memref<1x128xf32, #tpu.memory_space<vmem>>, %arg6: memref<1x32xf32, #tpu.memory_space<vmem>>, %arg7: memref<1x32xf32, #tpu.memory_space<vmem>>, %arg8: memref<32x128xbf16, #tpu.memory_space<vmem>>, %arg9: memref<32x128xf32, #tpu.memory_space<vmem>>, %arg10: memref<32x32xbf16, #tpu.memory_space<vmem>>) attributes {dimension_semantics = [#tpu.dimension_semantics<parallel>, #tpu.dimension_semantics<arbitrary>, #tpu.dimension_semantics<arbitrary>], iteration_bounds = array<i64: 1, 1, 1>, scalar_prefetch = 0 : i64, scratch_operands = 2 : i64, tpu.core_type = #tpu.core_type<tc>, window_params = [{transform_indices = @transform_0, window_bounds = array<i64: 32, 32>}, {transform_indices = @transform_1, window_bounds = array<i64: 32, 128>}, {transform_indices = @transform_2, window_bounds = array<i64: 1, 128>}, {pipeline_mode = #tpu.pipeline_mode<synchronous>, transform_indices = @transform_3, window_bounds = array<i64: 1, 32>}, {pipeline_mode = #tpu.pipeline_mode<synchronous>, transform_indices = @transform_4, window_bounds = array<i64: 1, 32>}, {transform_indices = @transform_5, window_bounds = array<i64: 32, 128>}]} {
    %c0_i32 = arith.constant 0 : i32
    %0 = arith.cmpi eq, %arg2, %c0_i32 : i32
    %1 = arith.extui %0 : i1 to i32
    %c0_i32_0 = arith.constant 0 : i32
    %2 = arith.cmpi ne, %1, %c0_i32_0 : i32
    scf.if %2 {
      %cst_12 = arith.constant 0.000000e+00 : f32
      %15 = vector.broadcast %cst_12 : f32 to vector<32x128xf32>
      %c0_13 = arith.constant 0 : index
      %c0_14 = arith.constant 0 : index
      %16 = vector.load %arg9[%c0_13, %c0_14] : memref<32x128xf32, #tpu.memory_space<vmem>>, vector<32x128xf32>
      tpu.vector_store %arg9[%c0_13, %c0_14], %15 {strides = array<i32>} : memref<32x128xf32, #tpu.memory_space<vmem>>, vector<32x128xf32>,
    } else {
    }
    %c0_i32_1 = arith.constant 0 : i32
    %3 = arith.cmpi eq, %arg1, %c0_i32_1 : i32
    %4 = arith.extui %3 : i1 to i32
    %c0_i32_2 = arith.constant 0 : i32
    %5 = arith.cmpi ne, %4, %c0_i32_2 : i32
    scf.if %5 {
      %c0_12 = arith.constant 0 : index
      %c0_13 = arith.constant 0 : index
      %15 = vector.load %arg3[%c0_12, %c0_13] : memref<32x32xf32, #tpu.memory_space<vmem>>, vector<32x32xf32>
      %cst_14 = arith.constant dense<0.000000e+00> : vector<32xf32>
      %16 = vector.multi_reduction <add>, %15, %cst_14 [1] : vector<32x32xf32> to vector<32xf32>
      %17 = vector.shape_cast %16 : vector<32xf32> to vector<32x1xf32>
      %cst_15 = arith.constant 3.200000e+01 : f32
      %18 = vector.broadcast %cst_15 : f32 to vector<32x1xf32>
      %19 = arith.divf %17, %18 : vector<32x1xf32>
      %20 = vector.broadcast %19 : vector<32x1xf32> to vector<32x32xf32>
      %21 = arith.subf %15, %20 : vector<32x32xf32>
      %22 = arith.mulf %21, %21 : vector<32x32xf32>
      %cst_16 = arith.constant dense<0.000000e+00> : vector<32xf32>
      %23 = vector.multi_reduction <add>, %22, %cst_16 [1] : vector<32x32xf32> to vector<32xf32>
      %24 = vector.shape_cast %23 : vector<32xf32> to vector<32x1xf32>
      %cst_17 = arith.constant 3.200000e+01 : f32
      %25 = vector.broadcast %cst_17 : f32 to vector<32x1xf32>
      %26 = arith.divf %24, %25 : vector<32x1xf32>
      %27 = vector.broadcast %19 : vector<32x1xf32> to vector<32x32xf32>
      %28 = arith.subf %15, %27 : vector<32x32xf32>
      %cst_18 = arith.constant 9.99999974E-6 : f32
      %29 = vector.broadcast %cst_18 : f32 to vector<32x1xf32>
      %30 = arith.addf %26, %29 : vector<32x1xf32>
      %31 = math.rsqrt %30 : vector<32x1xf32>
      %32 = vector.broadcast %31 : vector<32x1xf32> to vector<32x32xf32>
      %33 = arith.mulf %28, %32 : vector<32x32xf32>
      %c0_19 = arith.constant 0 : index
      %c0_20 = arith.constant 0 : index
      %34 = vector.load %arg6[%c0_19, %c0_20] : memref<1x32xf32, #tpu.memory_space<vmem>>, vector<1x32xf32>
      %35 = vector.broadcast %34 : vector<1x32xf32> to vector<32x32xf32>
      %36 = arith.mulf %33, %35 : vector<32x32xf32>
      %c0_21 = arith.constant 0 : index
      %c0_22 = arith.constant 0 : index
      %37 = vector.load %arg7[%c0_21, %c0_22] : memref<1x32xf32, #tpu.memory_space<vmem>>, vector<1x32xf32>
      %38 = vector.broadcast %37 : vector<1x32xf32> to vector<32x32xf32>
      %39 = arith.addf %36, %38 : vector<32x32xf32>
      %40 = arith.truncf %39 : vector<32x32xf32> to vector<32x32xbf16>
      %c0_23 = arith.constant 0 : index
      %c0_24 = arith.constant 0 : index
      %41 = vector.load %arg10[%c0_23, %c0_24] : memref<32x32xbf16, #tpu.memory_space<vmem>>, vector<32x32xbf16>
      tpu.vector_store %arg10[%c0_23, %c0_24], %40 {strides = array<i32>} : memref<32x32xbf16, #tpu.memory_space<vmem>>, vector<32x32xbf16>,
    } else {
    }
    %c0 = arith.constant 0 : index
    %c0_3 = arith.constant 0 : index
    %6 = vector.load %arg10[%c0, %c0_3] : memref<32x32xbf16, #tpu.memory_space<vmem>>, vector<32x32xbf16>
    %c0_4 = arith.constant 0 : index
    %c0_5 = arith.constant 0 : index
    %7 = vector.load %arg9[%c0_4, %c0_5] : memref<32x128xf32, #tpu.memory_space<vmem>>, vector<32x128xf32>
    %c0_6 = arith.constant 0 : index
    %c0_7 = arith.constant 0 : index
    %8 = vector.load %arg4[%c0_6, %c0_7] : memref<32x128xbf16, #tpu.memory_space<vmem>>, vector<32x128xbf16>
    %cst = arith.constant dense<0.000000e+00> : vector<32x128xf32>
    %9 = tpu.matmul %6, %8, %cst {dimension_numbers = #tpu.dot_dimension_numbers<[1], [0], [0], [1], [0, 0, 1, 1], [], []>} : vector<32x32xbf16>, vector<32x128xbf16>, vector<32x128xf32> -> vector<32x128xf32>
    %10 = arith.addf %7, %9 : vector<32x128xf32>
    %c0_8 = arith.constant 0 : index
    %c0_9 = arith.constant 0 : index
    %11 = vector.load %arg9[%c0_8, %c0_9] : memref<32x128xf32, #tpu.memory_space<vmem>>, vector<32x128xf32>
    tpu.vector_store %arg9[%c0_8, %c0_9], %10 {strides = array<i32>} : memref<32x128xf32, #tpu.memory_space<vmem>>, vector<32x128xf32>,
    %c0_i32_10 = arith.constant 0 : i32
    %12 = arith.cmpi eq, %arg2, %c0_i32_10 : i32
    %13 = arith.extui %12 : i1 to i32
    %c0_i32_11 = arith.constant 0 : i32
    %14 = arith.cmpi ne, %13, %c0_i32_11 : i32
    scf.if %14 {
      %c0_12 = arith.constant 0 : index
      %c0_13 = arith.constant 0 : index
      %15 = vector.load %arg9[%c0_12, %c0_13] : memref<32x128xf32, #tpu.memory_space<vmem>>, vector<32x128xf32>
      %c0_14 = arith.constant 0 : index
      %c0_15 = arith.constant 0 : index
      %16 = vector.load %arg5[%c0_14, %c0_15] : memref<1x128xf32, #tpu.memory_space<vmem>>, vector<1x128xf32>
      %17 = vector.broadcast %16 : vector<1x128xf32> to vector<32x128xf32>
      %18 = arith.addf %15, %17 : vector<32x128xf32>
      %19 = arith.truncf %18 : vector<32x128xf32> to vector<32x128xbf16>
      %c0_16 = arith.constant 0 : index
      %c0_17 = arith.constant 0 : index
      %20 = vector.load %arg8[%c0_16, %c0_17] : memref<32x128xbf16, #tpu.memory_space<vmem>>, vector<32x128xbf16>
      tpu.vector_store %arg8[%c0_16, %c0_17], %19 {strides = array<i32>} : memref<32x128xbf16, #tpu.memory_space<vmem>>, vector<32x128xbf16>,
    } else {
    }
    return
  }
  func.func @transform_0(%arg0: i32, %arg1: i32, %arg2: i32) -> (i32, i32) {
    %c0_i32 = arith.constant 0 : i32
    return %arg0, %arg2 : i32, i32
  }
  func.func @transform_1(%arg0: i32, %arg1: i32, %arg2: i32) -> (i32, i32) {
    %c0_i32 = arith.constant 0 : i32
    return %arg2, %arg1 : i32, i32
  }
  func.func @transform_2(%arg0: i32, %arg1: i32, %arg2: i32) -> (i32, i32) {
    %c0_i32 = arith.constant 0 : i32
    %c0_i32_0 = arith.constant 0 : i32
    return %c0_i32, %arg1 : i32, i32
  }
  func.func @transform_3(%arg0: i32, %arg1: i32, %arg2: i32) -> (i32, i32) {
    %c0_i32 = arith.constant 0 : i32
    %c0_i32_0 = arith.constant 0 : i32
    %c0_i32_1 = arith.constant 0 : i32
    return %c0_i32, %c0_i32_0 : i32, i32
  }
  func.func @transform_4(%arg0: i32, %arg1: i32, %arg2: i32) -> (i32, i32) {
    %c0_i32 = arith.constant 0 : i32
    %c0_i32_0 = arith.constant 0 : i32
    %c0_i32_1 = arith.constant 0 : i32
    return %c0_i32, %c0_i32_0 : i32, i32
  }
  func.func @transform_5(%arg0: i32, %arg1: i32, %arg2: i32) -> (i32, i32) {
    %c0_i32 = arith.constant 0 : i32
    return %arg0, %arg1 : i32, i32
  }
}

module attributes {stable_mosaic.version = 11 : i64} {
  func.func @_attn_kernel(%arg0: i32, %arg1: memref<4x4x96xbf16, #tpu.memory_space<vmem>>, %arg2: memref<2x4x4xf32, #tpu.memory_space<vmem>>, %arg3: memref<4x4x4xf32, #tpu.memory_space<vmem>>, %arg4: memref<4x4x32xbf16, #tpu.memory_space<vmem>>) attributes {dimension_semantics = [#tpu.dimension_semantics<parallel>], iteration_bounds = array<i64: 2>, scalar_prefetch = 0 : i64, scratch_operands = 0 : i64, tpu.core_type = #tpu.core_type<tc>, window_params = [{transform_indices = @transform_0, window_bounds = array<i64: 4, 4, 96>}, {pipeline_mode = #tpu.pipeline_mode<synchronous>, transform_indices = @transform_1, window_bounds = array<i64: 2, 4, 4>}, {pipeline_mode = #tpu.pipeline_mode<synchronous>, transform_indices = @transform_2, window_bounds = array<i64: 4, 4, 4>}, {transform_indices = @transform_3, window_bounds = array<i64: 4, 4, 32>}]} {
    %c0 = arith.constant 0 : index
    %c0_0 = arith.constant 0 : index
    %c0_1 = arith.constant 0 : index
    %0 = vector.load %arg1[%c0, %c0_0, %c0_1] : memref<4x4x96xbf16, #tpu.memory_space<vmem>>, vector<4x4x96xbf16>
    %1 = vector.extract_strided_slice %0 {offsets = [0, 0, 0], sizes = [4, 4, 16], strides = [1, 1, 1]} : vector<4x4x96xbf16> to vector<4x4x16xbf16>
    %2 = vector.extract_strided_slice %0 {offsets = [0, 0, 32], sizes = [4, 4, 16], strides = [1, 1, 1]} : vector<4x4x96xbf16> to vector<4x4x16xbf16>
    %3 = vector.extract_strided_slice %0 {offsets = [0, 0, 64], sizes = [4, 4, 16], strides = [1, 1, 1]} : vector<4x4x96xbf16> to vector<4x4x16xbf16>
    %cst = arith.constant dense<0.000000e+00> : vector<4x4x4xf32>
    %4 = tpu.matmul %1, %2, %cst {dimension_numbers = #tpu.dot_dimension_numbers<[2], [2], [1], [1], [0, 0, 0, 1, 1, 1], [0], [0]>} : vector<4x4x16xbf16>, vector<4x4x16xbf16>, vector<4x4x4xf32> -> vector<4x4x4xf32>
    %cst_2 = arith.constant 2.500000e-01 : f32
    %5 = vector.broadcast %cst_2 : f32 to vector<4x4x4xf32>
    %6 = arith.mulf %4, %5 : vector<4x4x4xf32>
    %c0_3 = arith.constant 0 : index
    %c0_4 = arith.constant 0 : index
    %c0_5 = arith.constant 0 : index
    %7 = vector.load %arg2[%c0_3, %c0_4, %c0_5] : memref<2x4x4xf32, #tpu.memory_space<vmem>>, vector<1x4x4xf32>
    %8 = vector.shape_cast %7 : vector<1x4x4xf32> to vector<4x4xf32>
    %9 = vector.shape_cast %8 : vector<4x4xf32> to vector<1x4x4xf32>
    %10 = vector.broadcast %9 : vector<1x4x4xf32> to vector<4x4x4xf32>
    %11 = arith.addf %6, %10 : vector<4x4x4xf32>
    %12 = vector.shape_cast %11 : vector<4x4x4xf32> to vector<1x4x4x4xf32>
    %c0_6 = arith.constant 0 : index
    %c0_7 = arith.constant 0 : index
    %c0_8 = arith.constant 0 : index
    %13 = vector.load %arg3[%c0_6, %c0_7, %c0_8] : memref<4x4x4xf32, #tpu.memory_space<vmem>>, vector<4x4x4xf32>
    %14 = vector.shape_cast %13 : vector<4x4x4xf32> to vector<1x4x4x4xf32>
    %15 = arith.addf %12, %14 : vector<1x4x4x4xf32>
    %16 = vector.shape_cast %15 : vector<1x4x4x4xf32> to vector<4x4x4xf32>
    %cst_9 = arith.constant dense<0xFF800000> : vector<4x4xf32>
    %17 = vector.multi_reduction <maximumf>, %16, %cst_9 [2] : vector<4x4x4xf32> to vector<4x4xf32>
    %18 = vector.shape_cast %17 : vector<4x4xf32> to vector<4x4x1xf32>
    %19 = vector.broadcast %18 : vector<4x4x1xf32> to vector<4x4x4xf32>
    %20 = arith.subf %16, %19 : vector<4x4x4xf32>
    %21 = math.exp %20 : vector<4x4x4xf32>
    %cst_10 = arith.constant dense<0.000000e+00> : vector<4x4xf32>
    %22 = vector.multi_reduction <add>, %21, %cst_10 [2] : vector<4x4x4xf32> to vector<4x4xf32>
    %23 = vector.shape_cast %22 : vector<4x4xf32> to vector<4x4x1xf32>
    %24 = tpu.reciprocal %23 {approx = true} : vector<4x4x1xf32> -> vector<4x4x1xf32>
    %25 = vector.broadcast %24 : vector<4x4x1xf32> to vector<4x4x4xf32>
    %26 = arith.mulf %21, %25 : vector<4x4x4xf32>
    %27 = arith.truncf %26 : vector<4x4x4xf32> to vector<4x4x4xbf16>
    %cst_11 = arith.constant dense<0.000000e+00> : vector<4x4x16xf32>
    %28 = tpu.matmul %27, %3, %cst_11 {dimension_numbers = #tpu.dot_dimension_numbers<[2], [1], [1], [2], [0, 0, 0, 1, 1, 2], [0], [0]>} : vector<4x4x4xbf16>, vector<4x4x16xbf16>, vector<4x4x16xf32> -> vector<4x4x16xf32>
    %29 = vector.extract_strided_slice %0 {offsets = [0, 0, 16], sizes = [4, 4, 16], strides = [1, 1, 1]} : vector<4x4x96xbf16> to vector<4x4x16xbf16>
    %30 = vector.extract_strided_slice %0 {offsets = [0, 0, 48], sizes = [4, 4, 16], strides = [1, 1, 1]} : vector<4x4x96xbf16> to vector<4x4x16xbf16>
    %31 = vector.extract_strided_slice %0 {offsets = [0, 0, 80], sizes = [4, 4, 16], strides = [1, 1, 1]} : vector<4x4x96xbf16> to vector<4x4x16xbf16>
    %cst_12 = arith.constant dense<0.000000e+00> : vector<4x4x4xf32>
    %32 = tpu.matmul %29, %30, %cst_12 {dimension_numbers = #tpu.dot_dimension_numbers<[2], [2], [1], [1], [0, 0, 0, 1, 1, 1], [0], [0]>} : vector<4x4x16xbf16>, vector<4x4x16xbf16>, vector<4x4x4xf32> -> vector<4x4x4xf32>
    %cst_13 = arith.constant 2.500000e-01 : f32
    %33 = vector.broadcast %cst_13 : f32 to vector<4x4x4xf32>
    %34 = arith.mulf %32, %33 : vector<4x4x4xf32>
    %c1 = arith.constant 1 : index
    %c0_14 = arith.constant 0 : index
    %c0_15 = arith.constant 0 : index
    %35 = vector.load %arg2[%c1, %c0_14, %c0_15] : memref<2x4x4xf32, #tpu.memory_space<vmem>>, vector<1x4x4xf32>
    %36 = vector.shape_cast %35 : vector<1x4x4xf32> to vector<4x4xf32>
    %37 = vector.shape_cast %36 : vector<4x4xf32> to vector<1x4x4xf32>
    %38 = vector.broadcast %37 : vector<1x4x4xf32> to vector<4x4x4xf32>
    %39 = arith.addf %34, %38 : vector<4x4x4xf32>
    %40 = vector.shape_cast %39 : vector<4x4x4xf32> to vector<1x4x4x4xf32>
    %c0_16 = arith.constant 0 : index
    %c0_17 = arith.constant 0 : index
    %c0_18 = arith.constant 0 : index
    %41 = vector.load %arg3[%c0_16, %c0_17, %c0_18] : memref<4x4x4xf32, #tpu.memory_space<vmem>>, vector<4x4x4xf32>
    %42 = vector.shape_cast %41 : vector<4x4x4xf32> to vector<1x4x4x4xf32>
    %43 = arith.addf %40, %42 : vector<1x4x4x4xf32>
    %44 = vector.shape_cast %43 : vector<1x4x4x4xf32> to vector<4x4x4xf32>
    %cst_19 = arith.constant dense<0xFF800000> : vector<4x4xf32>
    %45 = vector.multi_reduction <maximumf>, %44, %cst_19 [2] : vector<4x4x4xf32> to vector<4x4xf32>
    %46 = vector.shape_cast %45 : vector<4x4xf32> to vector<4x4x1xf32>
    %47 = vector.broadcast %46 : vector<4x4x1xf32> to vector<4x4x4xf32>
    %48 = arith.subf %44, %47 : vector<4x4x4xf32>
    %49 = math.exp %48 : vector<4x4x4xf32>
    %cst_20 = arith.constant dense<0.000000e+00> : vector<4x4xf32>
    %50 = vector.multi_reduction <add>, %49, %cst_20 [2] : vector<4x4x4xf32> to vector<4x4xf32>
    %51 = vector.shape_cast %50 : vector<4x4xf32> to vector<4x4x1xf32>
    %52 = tpu.reciprocal %51 {approx = true} : vector<4x4x1xf32> -> vector<4x4x1xf32>
    %53 = vector.broadcast %52 : vector<4x4x1xf32> to vector<4x4x4xf32>
    %54 = arith.mulf %49, %53 : vector<4x4x4xf32>
    %55 = arith.truncf %54 : vector<4x4x4xf32> to vector<4x4x4xbf16>
    %cst_21 = arith.constant dense<0.000000e+00> : vector<4x4x16xf32>
    %56 = tpu.matmul %55, %31, %cst_21 {dimension_numbers = #tpu.dot_dimension_numbers<[2], [1], [1], [2], [0, 0, 0, 1, 1, 2], [0], [0]>} : vector<4x4x4xbf16>, vector<4x4x16xbf16>, vector<4x4x16xf32> -> vector<4x4x16xf32>
    %57 = tpu.concatenate %28, %56 in 2 : vector<4x4x16xf32>, vector<4x4x16xf32> -> vector<4x4x32xf32>
    %58 = arith.truncf %57 : vector<4x4x32xf32> to vector<4x4x32xbf16>
    %c0_22 = arith.constant 0 : index
    %c0_23 = arith.constant 0 : index
    %c0_24 = arith.constant 0 : index
    %59 = vector.load %arg4[%c0_22, %c0_23, %c0_24] : memref<4x4x32xbf16, #tpu.memory_space<vmem>>, vector<4x4x32xbf16>
    tpu.vector_store %arg4[%c0_22, %c0_23, %c0_24], %58 {strides = array<i32>} : memref<4x4x32xbf16, #tpu.memory_space<vmem>>, vector<4x4x32xbf16>,
    return
  }
  func.func @transform_0(%arg0: i32) -> (i32, i32, i32) {
    %c0_i32 = arith.constant 0 : i32
    %c0_i32_0 = arith.constant 0 : i32
    %c0_i32_1 = arith.constant 0 : i32
    return %arg0, %c0_i32, %c0_i32_0 : i32, i32, i32
  }
  func.func @transform_1(%arg0: i32) -> (i32, i32, i32) {
    %c0_i32 = arith.constant 0 : i32
    %c0_i32_0 = arith.constant 0 : i32
    %c0_i32_1 = arith.constant 0 : i32
    %c0_i32_2 = arith.constant 0 : i32
    return %c0_i32, %c0_i32_0, %c0_i32_1 : i32, i32, i32
  }
  func.func @transform_2(%arg0: i32) -> (i32, i32, i32) {
    %c0_i32 = arith.constant 0 : i32
    %c0_i32_0 = arith.constant 0 : i32
    %c0_i32_1 = arith.constant 0 : i32
    %c0_i32_2 = arith.constant 0 : i32
    return %c0_i32, %c0_i32_0, %c0_i32_1 : i32, i32, i32
  }
  func.func @transform_3(%arg0: i32) -> (i32, i32, i32) {
    %c0_i32 = arith.constant 0 : i32
    %c0_i32_0 = arith.constant 0 : i32
    %c0_i32_1 = arith.constant 0 : i32
    return %arg0, %c0_i32, %c0_i32_0 : i32, i32, i32
  }
}

module attributes {stable_mosaic.version = 11 : i64} {
  func.func @_linear_kernel(%arg0: i32, %arg1: i32, %arg2: i32, %arg3: memref<32x128xbf16, #tpu.memory_space<vmem>>, %arg4: memref<128x128xbf16, #tpu.memory_space<vmem>>, %arg5: memref<1x128xf32, #tpu.memory_space<vmem>>, %arg6: memref<32x128xf32, #tpu.memory_space<vmem>>, %arg7: memref<32x128xf32, #tpu.memory_space<vmem>>, %arg8: memref<32x128xf32, #tpu.memory_space<vmem>>, %arg9: memref<32x128xf32, #tpu.memory_space<vmem>>, %arg10: memref<32x128xf32, #tpu.memory_space<vmem>>) attributes {dimension_semantics = [#tpu.dimension_semantics<parallel>, #tpu.dimension_semantics<parallel>, #tpu.dimension_semantics<arbitrary>], iteration_bounds = array<i64: 1, 1, 1>, scalar_prefetch = 0 : i64, scratch_operands = 1 : i64, tpu.core_type = #tpu.core_type<tc>, window_params = [{transform_indices = @transform_0, window_bounds = array<i64: 32, 128>}, {transform_indices = @transform_1, window_bounds = array<i64: 128, 128>}, {transform_indices = @transform_2, window_bounds = array<i64: 1, 128>}, {transform_indices = @transform_3, window_bounds = array<i64: 32, 128>}, {transform_indices = @transform_4, window_bounds = array<i64: 32, 128>}, {transform_indices = @transform_5, window_bounds = array<i64: 32, 128>}, {transform_indices = @transform_6, window_bounds = array<i64: 32, 128>}]} {
    %c0_i32 = arith.constant 0 : i32
    %0 = arith.cmpi eq, %arg2, %c0_i32 : i32
    %1 = arith.extui %0 : i1 to i32
    %c0_i32_0 = arith.constant 0 : i32
    %2 = arith.cmpi ne, %1, %c0_i32_0 : i32
    scf.if %2 {
      %cst_10 = arith.constant 0.000000e+00 : f32
      %12 = vector.broadcast %cst_10 : f32 to vector<32x128xf32>
      %c0_11 = arith.constant 0 : index
      %c0_12 = arith.constant 0 : index
      %13 = vector.load %arg10[%c0_11, %c0_12] : memref<32x128xf32, #tpu.memory_space<vmem>>, vector<32x128xf32>
      tpu.vector_store %arg10[%c0_11, %c0_12], %12 {strides = array<i32>} : memref<32x128xf32, #tpu.memory_space<vmem>>, vector<32x128xf32>,
    } else {
    }
    %c0 = arith.constant 0 : index
    %c0_1 = arith.constant 0 : index
    %3 = vector.load %arg3[%c0, %c0_1] : memref<32x128xbf16, #tpu.memory_space<vmem>>, vector<32x128xbf16>
    %c0_2 = arith.constant 0 : index
    %c0_3 = arith.constant 0 : index
    %4 = vector.load %arg10[%c0_2, %c0_3] : memref<32x128xf32, #tpu.memory_space<vmem>>, vector<32x128xf32>
    %c0_4 = arith.constant 0 : index
    %c0_5 = arith.constant 0 : index
    %5 = vector.load %arg4[%c0_4, %c0_5] : memref<128x128xbf16, #tpu.memory_space<vmem>>, vector<128x128xbf16>
    %cst = arith.constant dense<0.000000e+00> : vector<32x128xf32>
    %6 = tpu.matmul %3, %5, %cst {dimension_numbers = #tpu.dot_dimension_numbers<[1], [0], [0], [1], [0, 0, 1, 1], [], []>} : vector<32x128xbf16>, vector<128x128xbf16>, vector<32x128xf32> -> vector<32x128xf32>
    %7 = arith.addf %4, %6 : vector<32x128xf32>
    %c0_6 = arith.constant 0 : index
    %c0_7 = arith.constant 0 : index
    %8 = vector.load %arg10[%c0_6, %c0_7] : memref<32x128xf32, #tpu.memory_space<vmem>>, vector<32x128xf32>
    tpu.vector_store %arg10[%c0_6, %c0_7], %7 {strides = array<i32>} : memref<32x128xf32, #tpu.memory_space<vmem>>, vector<32x128xf32>,
    %c0_i32_8 = arith.constant 0 : i32
    %9 = arith.cmpi eq, %arg2, %c0_i32_8 : i32
    %10 = arith.extui %9 : i1 to i32
    %c0_i32_9 = arith.constant 0 : i32
    %11 = arith.cmpi ne, %10, %c0_i32_9 : i32
    scf.if %11 {
      %c0_10 = arith.constant 0 : index
      %c0_11 = arith.constant 0 : index
      %12 = vector.load %arg10[%c0_10, %c0_11] : memref<32x128xf32, #tpu.memory_space<vmem>>, vector<32x128xf32>
      %c0_12 = arith.constant 0 : index
      %c0_13 = arith.constant 0 : index
      %13 = vector.load %arg5[%c0_12, %c0_13] : memref<1x128xf32, #tpu.memory_space<vmem>>, vector<1x128xf32>
      %14 = vector.broadcast %13 : vector<1x128xf32> to vector<32x128xf32>
      %15 = arith.addf %12, %14 : vector<32x128xf32>
      %c0_14 = arith.constant 0 : index
      %c0_15 = arith.constant 0 : index
      %16 = vector.load %arg6[%c0_14, %c0_15] : memref<32x128xf32, #tpu.memory_space<vmem>>, vector<32x128xf32>
      %17 = arith.addf %15, %16 : vector<32x128xf32>
      %cst_16 = arith.constant 5.000000e-01 : f32
      %18 = vector.broadcast %cst_16 : f32 to vector<32x128xf32>
      %19 = arith.mulf %18, %17 : vector<32x128xf32>
      %20 = math.tanh %19 : vector<32x128xf32>
      %cst_17 = arith.constant 1.000000e+00 : f32
      %21 = vector.broadcast %cst_17 : f32 to vector<32x128xf32>
      %22 = arith.addf %20, %21 : vector<32x128xf32>
      %cst_18 = arith.constant 5.000000e-01 : f32
      %23 = vector.broadcast %cst_18 : f32 to vector<32x128xf32>
      %24 = arith.mulf %23, %22 : vector<32x128xf32>
      %25 = math.tanh %17 : vector<32x128xf32>
      %c0_19 = arith.constant 0 : index
      %c0_20 = arith.constant 0 : index
      %26 = vector.load %arg7[%c0_19, %c0_20] : memref<32x128xf32, #tpu.memory_space<vmem>>, vector<32x128xf32>
      %27 = arith.addf %26, %25 : vector<32x128xf32>
      %28 = arith.mulf %24, %27 : vector<32x128xf32>
      %29 = math.tanh %28 : vector<32x128xf32>
      %30 = arith.mulf %24, %29 : vector<32x128xf32>
      %c0_21 = arith.constant 0 : index
      %c0_22 = arith.constant 0 : index
      %31 = vector.load %arg8[%c0_21, %c0_22] : memref<32x128xf32, #tpu.memory_space<vmem>>, vector<32x128xf32>
      tpu.vector_store %arg8[%c0_21, %c0_22], %30 {strides = array<i32>} : memref<32x128xf32, #tpu.memory_space<vmem>>, vector<32x128xf32>,
      %c0_23 = arith.constant 0 : index
      %c0_24 = arith.constant 0 : index
      %32 = vector.load %arg9[%c0_23, %c0_24] : memref<32x128xf32, #tpu.memory_space<vmem>>, vector<32x128xf32>
      tpu.vector_store %arg9[%c0_23, %c0_24], %28 {strides = array<i32>} : memref<32x128xf32, #tpu.memory_space<vmem>>, vector<32x128xf32>,
    } else {
    }
    return
  }
  func.func @transform_0(%arg0: i32, %arg1: i32, %arg2: i32) -> (i32, i32) {
    %c0_i32 = arith.constant 0 : i32
    return %arg0, %arg2 : i32, i32
  }
  func.func @transform_1(%arg0: i32, %arg1: i32, %arg2: i32) -> (i32, i32) {
    %c0_i32 = arith.constant 0 : i32
    return %arg2, %arg1 : i32, i32
  }
  func.func @transform_2(%arg0: i32, %arg1: i32, %arg2: i32) -> (i32, i32) {
    %c0_i32 = arith.constant 0 : i32
    %c0_i32_0 = arith.constant 0 : i32
    return %c0_i32, %arg1 : i32, i32
  }
  func.func @transform_3(%arg0: i32, %arg1: i32, %arg2: i32) -> (i32, i32) {
    %c0_i32 = arith.constant 0 : i32
    return %arg0, %arg1 : i32, i32
  }
  func.func @transform_4(%arg0: i32, %arg1: i32, %arg2: i32) -> (i32, i32) {
    %c0_i32 = arith.constant 0 : i32
    return %arg0, %arg1 : i32, i32
  }
  func.func @transform_5(%arg0: i32, %arg1: i32, %arg2: i32) -> (i32, i32) {
    %c0_i32 = arith.constant 0 : i32
    return %arg0, %arg1 : i32, i32
  }
  func.func @transform_6(%arg0: i32, %arg1: i32, %arg2: i32) -> (i32, i32) {
    %c0_i32 = arith.constant 0 : i32
    return %arg0, %arg1 : i32, i32
  }
}

module attributes {stable_mosaic.version = 11 : i64} {
  func.func @_linear_kernel(%arg0: i32, %arg1: i32, %arg2: i32, %arg3: memref<32x32xbf16, #tpu.memory_space<vmem>>, %arg4: memref<32x128xbf16, #tpu.memory_space<vmem>>, %arg5: memref<1x128xf32, #tpu.memory_space<vmem>>, %arg6: memref<1x16xf32, #tpu.memory_space<vmem>>, %arg7: memref<1x16xf32, #tpu.memory_space<vmem>>, %arg8: memref<32x128xbf16, #tpu.memory_space<vmem>>, %arg9: memref<32x128xf32, #tpu.memory_space<vmem>>) attributes {dimension_semantics = [#tpu.dimension_semantics<parallel>, #tpu.dimension_semantics<parallel>, #tpu.dimension_semantics<arbitrary>], iteration_bounds = array<i64: 1, 1, 1>, scalar_prefetch = 0 : i64, scratch_operands = 1 : i64, tpu.core_type = #tpu.core_type<tc>, window_params = [{transform_indices = @transform_0, window_bounds = array<i64: 32, 32>}, {transform_indices = @transform_1, window_bounds = array<i64: 32, 128>}, {transform_indices = @transform_2, window_bounds = array<i64: 1, 128>}, {pipeline_mode = #tpu.pipeline_mode<synchronous>, transform_indices = @transform_3, window_bounds = array<i64: 1, 16>}, {pipeline_mode = #tpu.pipeline_mode<synchronous>, transform_indices = @transform_4, window_bounds = array<i64: 1, 16>}, {transform_indices = @transform_5, window_bounds = array<i64: 32, 128>}]} {
    %c0_i32 = arith.constant 0 : i32
    %0 = arith.cmpi eq, %arg2, %c0_i32 : i32
    %1 = arith.extui %0 : i1 to i32
    %c0_i32_0 = arith.constant 0 : i32
    %2 = arith.cmpi ne, %1, %c0_i32_0 : i32
    scf.if %2 {
      %cst_10 = arith.constant 0.000000e+00 : f32
      %12 = vector.broadcast %cst_10 : f32 to vector<32x128xf32>
      %c0_11 = arith.constant 0 : index
      %c0_12 = arith.constant 0 : index
      %13 = vector.load %arg9[%c0_11, %c0_12] : memref<32x128xf32, #tpu.memory_space<vmem>>, vector<32x128xf32>
      tpu.vector_store %arg9[%c0_11, %c0_12], %12 {strides = array<i32>} : memref<32x128xf32, #tpu.memory_space<vmem>>, vector<32x128xf32>,
    } else {
    }
    %c0 = arith.constant 0 : index
    %c0_1 = arith.constant 0 : index
    %3 = vector.load %arg3[%c0, %c0_1] : memref<32x32xbf16, #tpu.memory_space<vmem>>, vector<32x32xbf16>
    %c0_2 = arith.constant 0 : index
    %c0_3 = arith.constant 0 : index
    %4 = vector.load %arg9[%c0_2, %c0_3] : memref<32x128xf32, #tpu.memory_space<vmem>>, vector<32x128xf32>
    %c0_4 = arith.constant 0 : index
    %c0_5 = arith.constant 0 : index
    %5 = vector.load %arg4[%c0_4, %c0_5] : memref<32x128xbf16, #tpu.memory_space<vmem>>, vector<32x128xbf16>
    %cst = arith.constant dense<0.000000e+00> : vector<32x128xf32>
    %6 = tpu.matmul %3, %5, %cst {dimension_numbers = #tpu.dot_dimension_numbers<[1], [0], [0], [1], [0, 0, 1, 1], [], []>} : vector<32x32xbf16>, vector<32x128xbf16>, vector<32x128xf32> -> vector<32x128xf32>
    %7 = arith.addf %4, %6 : vector<32x128xf32>
    %c0_6 = arith.constant 0 : index
    %c0_7 = arith.constant 0 : index
    %8 = vector.load %arg9[%c0_6, %c0_7] : memref<32x128xf32, #tpu.memory_space<vmem>>, vector<32x128xf32>
    tpu.vector_store %arg9[%c0_6, %c0_7], %7 {strides = array<i32>} : memref<32x128xf32, #tpu.memory_space<vmem>>, vector<32x128xf32>,
    %c0_i32_8 = arith.constant 0 : i32
    %9 = arith.cmpi eq, %arg2, %c0_i32_8 : i32
    %10 = arith.extui %9 : i1 to i32
    %c0_i32_9 = arith.constant 0 : i32
    %11 = arith.cmpi ne, %10, %c0_i32_9 : i32
    scf.if %11 {
      %c0_10 = arith.constant 0 : index
      %c0_11 = arith.constant 0 : index
      %12 = vector.load %arg9[%c0_10, %c0_11] : memref<32x128xf32, #tpu.memory_space<vmem>>, vector<32x128xf32>
      %c0_12 = arith.constant 0 : index
      %c0_13 = arith.constant 0 : index
      %13 = vector.load %arg5[%c0_12, %c0_13] : memref<1x128xf32, #tpu.memory_space<vmem>>, vector<1x128xf32>
      %14 = vector.broadcast %13 : vector<1x128xf32> to vector<32x128xf32>
      %15 = arith.addf %12, %14 : vector<32x128xf32>
      %16 = vector.extract_strided_slice %15 {offsets = [0, 0], sizes = [32, 16], strides = [1, 1]} : vector<32x128xf32> to vector<32x16xf32>
      %cst_14 = arith.constant dense<0.000000e+00> : vector<32xf32>
      %17 = vector.multi_reduction <add>, %16, %cst_14 [1] : vector<32x16xf32> to vector<32xf32>
      %18 = vector.shape_cast %17 : vector<32xf32> to vector<32x1xf32>
      %cst_15 = arith.constant 1.600000e+01 : f32
      %19 = vector.broadcast %cst_15 : f32 to vector<32x1xf32>
      %20 = arith.divf %18, %19 : vector<32x1xf32>
      %21 = vector.broadcast %20 : vector<32x1xf32> to vector<32x16xf32>
      %22 = arith.subf %16, %21 : vector<32x16xf32>
      %23 = arith.mulf %22, %22 : vector<32x16xf32>
      %cst_16 = arith.constant dense<0.000000e+00> : vector<32xf32>
      %24 = vector.multi_reduction <add>, %23, %cst_16 [1] : vector<32x16xf32> to vector<32xf32>
      %25 = vector.shape_cast %24 : vector<32xf32> to vector<32x1xf32>
      %cst_17 = arith.constant 1.600000e+01 : f32
      %26 = vector.broadcast %cst_17 : f32 to vector<32x1xf32>
      %27 = arith.divf %25, %26 : vector<32x1xf32>
      %28 = vector.broadcast %20 : vector<32x1xf32> to vector<32x16xf32>
      %29 = arith.subf %16, %28 : vector<32x16xf32>
      %cst_18 = arith.constant 9.99999974E-6 : f32
      %30 = vector.broadcast %cst_18 : f32 to vector<32x1xf32>
      %31 = arith.addf %27, %30 : vector<32x1xf32>
      %32 = math.rsqrt %31 : vector<32x1xf32>
      %33 = vector.broadcast %32 : vector<32x1xf32> to vector<32x16xf32>
      %34 = arith.mulf %29, %33 : vector<32x16xf32>
      %c0_19 = arith.constant 0 : index
      %c0_20 = arith.constant 0 : index
      %35 = vector.load %arg6[%c0_19, %c0_20] : memref<1x16xf32, #tpu.memory_space<vmem>>, vector<1x16xf32>
      %36 = vector.broadcast %35 : vector<1x16xf32> to vector<32x16xf32>
      %37 = arith.mulf %34, %36 : vector<32x16xf32>
      %c0_21 = arith.constant 0 : index
      %c0_22 = arith.constant 0 : index
      %38 = vector.load %arg7[%c0_21, %c0_22] : memref<1x16xf32, #tpu.memory_space<vmem>>, vector<1x16xf32>
      %39 = vector.broadcast %38 : vector<1x16xf32> to vector<32x16xf32>
      %40 = arith.addf %37, %39 : vector<32x16xf32>
      %41 = vector.extract_strided_slice %15 {offsets = [0, 16], sizes = [32, 16], strides = [1, 1]} : vector<32x128xf32> to vector<32x16xf32>
      %cst_23 = arith.constant dense<0.000000e+00> : vector<32xf32>
      %42 = vector.multi_reduction <add>, %41, %cst_23 [1] : vector<32x16xf32> to vector<32xf32>
      %43 = vector.shape_cast %42 : vector<32xf32> to vector<32x1xf32>
      %cst_24 = arith.constant 1.600000e+01 : f32
      %44 = vector.broadcast %cst_24 : f32 to vector<32x1xf32>
      %45 = arith.divf %43, %44 : vector<32x1xf32>
      %46 = vector.broadcast %45 : vector<32x1xf32> to vector<32x16xf32>
      %47 = arith.subf %41, %46 : vector<32x16xf32>
      %48 = arith.mulf %47, %47 : vector<32x16xf32>
      %cst_25 = arith.constant dense<0.000000e+00> : vector<32xf32>
      %49 = vector.multi_reduction <add>, %48, %cst_25 [1] : vector<32x16xf32> to vector<32xf32>
      %50 = vector.shape_cast %49 : vector<32xf32> to vector<32x1xf32>
      %cst_26 = arith.constant 1.600000e+01 : f32
      %51 = vector.broadcast %cst_26 : f32 to vector<32x1xf32>
      %52 = arith.divf %50, %51 : vector<32x1xf32>
      %53 = vector.broadcast %45 : vector<32x1xf32> to vector<32x16xf32>
      %54 = arith.subf %41, %53 : vector<32x16xf32>
      %cst_27 = arith.constant 9.99999974E-6 : f32
      %55 = vector.broadcast %cst_27 : f32 to vector<32x1xf32>
      %56 = arith.addf %52, %55 : vector<32x1xf32>
      %57 = math.rsqrt %56 : vector<32x1xf32>
      %58 = vector.broadcast %57 : vector<32x1xf32> to vector<32x16xf32>
      %59 = arith.mulf %54, %58 : vector<32x16xf32>
      %c0_28 = arith.constant 0 : index
      %c0_29 = arith.constant 0 : index
      %60 = vector.load %arg6[%c0_28, %c0_29] : memref<1x16xf32, #tpu.memory_space<vmem>>, vector<1x16xf32>
      %61 = vector.broadcast %60 : vector<1x16xf32> to vector<32x16xf32>
      %62 = arith.mulf %59, %61 : vector<32x16xf32>
      %c0_30 = arith.constant 0 : index
      %c0_31 = arith.constant 0 : index
      %63 = vector.load %arg7[%c0_30, %c0_31] : memref<1x16xf32, #tpu.memory_space<vmem>>, vector<1x16xf32>
      %64 = vector.broadcast %63 : vector<1x16xf32> to vector<32x16xf32>
      %65 = arith.addf %62, %64 : vector<32x16xf32>
      %66 = vector.extract_strided_slice %15 {offsets = [0, 32], sizes = [32, 16], strides = [1, 1]} : vector<32x128xf32> to vector<32x16xf32>
      %cst_32 = arith.constant dense<0.000000e+00> : vector<32xf32>
      %67 = vector.multi_reduction <add>, %66, %cst_32 [1] : vector<32x16xf32> to vector<32xf32>
      %68 = vector.shape_cast %67 : vector<32xf32> to vector<32x1xf32>
      %cst_33 = arith.constant 1.600000e+01 : f32
      %69 = vector.broadcast %cst_33 : f32 to vector<32x1xf32>
      %70 = arith.divf %68, %69 : vector<32x1xf32>
      %71 = vector.broadcast %70 : vector<32x1xf32> to vector<32x16xf32>
      %72 = arith.subf %66, %71 : vector<32x16xf32>
      %73 = arith.mulf %72, %72 : vector<32x16xf32>
      %cst_34 = arith.constant dense<0.000000e+00> : vector<32xf32>
      %74 = vector.multi_reduction <add>, %73, %cst_34 [1] : vector<32x16xf32> to vector<32xf32>
      %75 = vector.shape_cast %74 : vector<32xf32> to vector<32x1xf32>
      %cst_35 = arith.constant 1.600000e+01 : f32
      %76 = vector.broadcast %cst_35 : f32 to vector<32x1xf32>
      %77 = arith.divf %75, %76 : vector<32x1xf32>
      %78 = vector.broadcast %70 : vector<32x1xf32> to vector<32x16xf32>
      %79 = arith.subf %66, %78 : vector<32x16xf32>
      %cst_36 = arith.constant 9.99999974E-6 : f32
      %80 = vector.broadcast %cst_36 : f32 to vector<32x1xf32>
      %81 = arith.addf %77, %80 : vector<32x1xf32>
      %82 = math.rsqrt %81 : vector<32x1xf32>
      %83 = vector.broadcast %82 : vector<32x1xf32> to vector<32x16xf32>
      %84 = arith.mulf %79, %83 : vector<32x16xf32>
      %c0_37 = arith.constant 0 : index
      %c0_38 = arith.constant 0 : index
      %85 = vector.load %arg6[%c0_37, %c0_38] : memref<1x16xf32, #tpu.memory_space<vmem>>, vector<1x16xf32>
      %86 = vector.broadcast %85 : vector<1x16xf32> to vector<32x16xf32>
      %87 = arith.mulf %84, %86 : vector<32x16xf32>
      %c0_39 = arith.constant 0 : index
      %c0_40 = arith.constant 0 : index
      %88 = vector.load %arg7[%c0_39, %c0_40] : memref<1x16xf32, #tpu.memory_space<vmem>>, vector<1x16xf32>
      %89 = vector.broadcast %88 : vector<1x16xf32> to vector<32x16xf32>
      %90 = arith.addf %87, %89 : vector<32x16xf32>
      %91 = vector.extract_strided_slice %15 {offsets = [0, 48], sizes = [32, 16], strides = [1, 1]} : vector<32x128xf32> to vector<32x16xf32>
      %cst_41 = arith.constant dense<0.000000e+00> : vector<32xf32>
      %92 = vector.multi_reduction <add>, %91, %cst_41 [1] : vector<32x16xf32> to vector<32xf32>
      %93 = vector.shape_cast %92 : vector<32xf32> to vector<32x1xf32>
      %cst_42 = arith.constant 1.600000e+01 : f32
      %94 = vector.broadcast %cst_42 : f32 to vector<32x1xf32>
      %95 = arith.divf %93, %94 : vector<32x1xf32>
      %96 = vector.broadcast %95 : vector<32x1xf32> to vector<32x16xf32>
      %97 = arith.subf %91, %96 : vector<32x16xf32>
      %98 = arith.mulf %97, %97 : vector<32x16xf32>
      %cst_43 = arith.constant dense<0.000000e+00> : vector<32xf32>
      %99 = vector.multi_reduction <add>, %98, %cst_43 [1] : vector<32x16xf32> to vector<32xf32>
      %100 = vector.shape_cast %99 : vector<32xf32> to vector<32x1xf32>
      %cst_44 = arith.constant 1.600000e+01 : f32
      %101 = vector.broadcast %cst_44 : f32 to vector<32x1xf32>
      %102 = arith.divf %100, %101 : vector<32x1xf32>
      %103 = vector.broadcast %95 : vector<32x1xf32> to vector<32x16xf32>
      %104 = arith.subf %91, %103 : vector<32x16xf32>
      %cst_45 = arith.constant 9.99999974E-6 : f32
      %105 = vector.broadcast %cst_45 : f32 to vector<32x1xf32>
      %106 = arith.addf %102, %105 : vector<32x1xf32>
      %107 = math.rsqrt %106 : vector<32x1xf32>
      %108 = vector.broadcast %107 : vector<32x1xf32> to vector<32x16xf32>
      %109 = arith.mulf %104, %108 : vector<32x16xf32>
      %c0_46 = arith.constant 0 : index
      %c0_47 = arith.constant 0 : index
      %110 = vector.load %arg6[%c0_46, %c0_47] : memref<1x16xf32, #tpu.memory_space<vmem>>, vector<1x16xf32>
      %111 = vector.broadcast %110 : vector<1x16xf32> to vector<32x16xf32>
      %112 = arith.mulf %109, %111 : vector<32x16xf32>
      %c0_48 = arith.constant 0 : index
      %c0_49 = arith.constant 0 : index
      %113 = vector.load %arg7[%c0_48, %c0_49] : memref<1x16xf32, #tpu.memory_space<vmem>>, vector<1x16xf32>
      %114 = vector.broadcast %113 : vector<1x16xf32> to vector<32x16xf32>
      %115 = arith.addf %112, %114 : vector<32x16xf32>
      %cst_50 = arith.constant 0.000000e+00 : f32
      %116 = vector.broadcast %cst_50 : f32 to vector<32x64xf32>
      %117 = tpu.concatenate %40, %65, %90, %115, %116 in 1 : vector<32x16xf32>, vector<32x16xf32>, vector<32x16xf32>, vector<32x16xf32>, vector<32x64xf32> -> vector<32x128xf32>
      %118 = arith.truncf %117 : vector<32x128xf32> to vector<32x128xbf16>
      %c0_51 = arith.constant 0 : index
      %c0_52 = arith.constant 0 : index
      %119 = vector.load %arg8[%c0_51, %c0_52] : memref<32x128xbf16, #tpu.memory_space<vmem>>, vector<32x128xbf16>
      tpu.vector_store %arg8[%c0_51, %c0_52], %118 {strides = array<i32>} : memref<32x128xbf16, #tpu.memory_space<vmem>>, vector<32x128xbf16>,
    } else {
    }
    return
  }
  func.func @transform_0(%arg0: i32, %arg1: i32, %arg2: i32) -> (i32, i32) {
    %c0_i32 = arith.constant 0 : i32
    return %arg0, %arg2 : i32, i32
  }
  func.func @transform_1(%arg0: i32, %arg1: i32, %arg2: i32) -> (i32, i32) {
    %c0_i32 = arith.constant 0 : i32
    return %arg2, %arg1 : i32, i32
  }
  func.func @transform_2(%arg0: i32, %arg1: i32, %arg2: i32) -> (i32, i32) {
    %c0_i32 = arith.constant 0 : i32
    %c0_i32_0 = arith.constant 0 : i32
    return %c0_i32, %arg1 : i32, i32
  }
  func.func @transform_3(%arg0: i32, %arg1: i32, %arg2: i32) -> (i32, i32) {
    %c0_i32 = arith.constant 0 : i32
    %c0_i32_0 = arith.constant 0 : i32
    %c0_i32_1 = arith.constant 0 : i32
    return %c0_i32, %c0_i32_0 : i32, i32
  }
  func.func @transform_4(%arg0: i32, %arg1: i32, %arg2: i32) -> (i32, i32) {
    %c0_i32 = arith.constant 0 : i32
    %c0_i32_0 = arith.constant 0 : i32
    %c0_i32_1 = arith.constant 0 : i32
    return %c0_i32, %c0_i32_0 : i32, i32
  }
  func.func @transform_5(%arg0: i32, %arg1: i32, %arg2: i32) -> (i32, i32) {
    %c0_i32 = arith.constant 0 : i32
    return %arg0, %arg1 : i32, i32
  }
}

module attributes {stable_mosaic.version = 11 : i64} {
  func.func @_convt_kernel(%arg0: i32, %arg1: memref<1x9x9x16xbf16, #tpu.memory_space<vmem>>, %arg2: memref<64x128xbf16, #tpu.memory_space<vmem>>, %arg3: memref<1x128xf32, #tpu.memory_space<vmem>>, %arg4: memref<1x64x128xf32, #tpu.memory_space<vmem>>) attributes {dimension_semantics = [#tpu.dimension_semantics<parallel>], iteration_bounds = array<i64: 2>, scalar_prefetch = 0 : i64, scratch_operands = 0 : i64, tpu.core_type = #tpu.core_type<tc>, window_params = [{transform_indices = @transform_0, window_bounds = array<i64: 1, 9, 9, 16>}, {pipeline_mode = #tpu.pipeline_mode<synchronous>, transform_indices = @transform_1, window_bounds = array<i64: 64, 128>}, {pipeline_mode = #tpu.pipeline_mode<synchronous>, transform_indices = @transform_2, window_bounds = array<i64: 1, 128>}, {transform_indices = @transform_3, window_bounds = array<i64: 1, 64, 128>}]} {
    %c0 = arith.constant 0 : index
    %c0_0 = arith.constant 0 : index
    %c0_1 = arith.constant 0 : index
    %c0_2 = arith.constant 0 : index
    %0 = vector.load %arg1[%c0, %c0_0, %c0_1, %c0_2] : memref<1x9x9x16xbf16, #tpu.memory_space<vmem>>, vector<1x8x8x16xbf16>
    %1 = vector.shape_cast %0 : vector<1x8x8x16xbf16> to vector<8x8x16xbf16>
    %2 = vector.shape_cast %1 : vector<8x8x16xbf16> to vector<64x16xbf16>
    %c0_3 = arith.constant 0 : index
    %c0_4 = arith.constant 0 : index
    %c1 = arith.constant 1 : index
    %c0_5 = arith.constant 0 : index
    %3 = vector.load %arg1[%c0_3, %c0_4, %c1, %c0_5] : memref<1x9x9x16xbf16, #tpu.memory_space<vmem>>, vector<1x8x8x16xbf16>
    %4 = vector.shape_cast %3 : vector<1x8x8x16xbf16> to vector<8x8x16xbf16>
    %5 = vector.shape_cast %4 : vector<8x8x16xbf16> to vector<64x16xbf16>
    %c0_6 = arith.constant 0 : index
    %c1_7 = arith.constant 1 : index
    %c0_8 = arith.constant 0 : index
    %c0_9 = arith.constant 0 : index
    %6 = vector.load %arg1[%c0_6, %c1_7, %c0_8, %c0_9] : memref<1x9x9x16xbf16, #tpu.memory_space<vmem>>, vector<1x8x8x16xbf16>
    %7 = vector.shape_cast %6 : vector<1x8x8x16xbf16> to vector<8x8x16xbf16>
    %8 = vector.shape_cast %7 : vector<8x8x16xbf16> to vector<64x16xbf16>
    %c0_10 = arith.constant 0 : index
    %c1_11 = arith.constant 1 : index
    %c1_12 = arith.constant 1 : index
    %c0_13 = arith.constant 0 : index
    %9 = vector.load %arg1[%c0_10, %c1_11, %c1_12, %c0_13] : memref<1x9x9x16xbf16, #tpu.memory_space<vmem>>, vector<1x8x8x16xbf16>
    %10 = vector.shape_cast %9 : vector<1x8x8x16xbf16> to vector<8x8x16xbf16>
    %11 = vector.shape_cast %10 : vector<8x8x16xbf16> to vector<64x16xbf16>
    %12 = tpu.concatenate %2, %5, %8, %11 in 1 : vector<64x16xbf16>, vector<64x16xbf16>, vector<64x16xbf16>, vector<64x16xbf16> -> vector<64x64xbf16>
    %c0_14 = arith.constant 0 : index
    %c0_15 = arith.constant 0 : index
    %13 = vector.load %arg2[%c0_14, %c0_15] : memref<64x128xbf16, #tpu.memory_space<vmem>>, vector<64x128xbf16>
    %cst = arith.constant dense<0.000000e+00> : vector<64x128xf32>
    %14 = tpu.matmul %12, %13, %cst {dimension_numbers = #tpu.dot_dimension_numbers<[1], [0], [0], [1], [0, 0, 1, 1], [], []>} : vector<64x64xbf16>, vector<64x128xbf16>, vector<64x128xf32> -> vector<64x128xf32>
    %c0_16 = arith.constant 0 : index
    %c0_17 = arith.constant 0 : index
    %15 = vector.load %arg3[%c0_16, %c0_17] : memref<1x128xf32, #tpu.memory_space<vmem>>, vector<1x128xf32>
    %16 = vector.broadcast %15 : vector<1x128xf32> to vector<64x128xf32>
    %17 = arith.addf %14, %16 : vector<64x128xf32>
    %cst_18 = arith.constant 5.000000e-01 : f32
    %18 = vector.broadcast %cst_18 : f32 to vector<64x128xf32>
    %19 = arith.mulf %18, %17 : vector<64x128xf32>
    %20 = math.tanh %19 : vector<64x128xf32>
    %cst_19 = arith.constant 1.000000e+00 : f32
    %21 = vector.broadcast %cst_19 : f32 to vector<64x128xf32>
    %22 = arith.addf %20, %21 : vector<64x128xf32>
    %cst_20 = arith.constant 5.000000e-01 : f32
    %23 = vector.broadcast %cst_20 : f32 to vector<64x128xf32>
    %24 = arith.mulf %23, %22 : vector<64x128xf32>
    %c0_21 = arith.constant 0 : index
    %c0_22 = arith.constant 0 : index
    %c0_23 = arith.constant 0 : index
    %25 = vector.load %arg4[%c0_21, %c0_22, %c0_23] : memref<1x64x128xf32, #tpu.memory_space<vmem>>, vector<1x64x128xf32>
    %26 = vector.shape_cast %25 : vector<1x64x128xf32> to vector<64x128xf32>
    %27 = vector.shape_cast %24 : vector<64x128xf32> to vector<1x64x128xf32>
    tpu.vector_store %arg4[%c0_21, %c0_22, %c0_23], %27 {strides = array<i32>} : memref<1x64x128xf32, #tpu.memory_space<vmem>>, vector<1x64x128xf32>,
    return
  }
  func.func @transform_0(%arg0: i32) -> (i32, i32, i32, i32) {
    %c0_i32 = arith.constant 0 : i32
    %c0_i32_0 = arith.constant 0 : i32
    %c0_i32_1 = arith.constant 0 : i32
    %c0_i32_2 = arith.constant 0 : i32
    return %arg0, %c0_i32, %c0_i32_0, %c0_i32_1 : i32, i32, i32, i32
  }
  func.func @transform_1(%arg0: i32) -> (i32, i32) {
    %c0_i32 = arith.constant 0 : i32
    %c0_i32_0 = arith.constant 0 : i32
    %c0_i32_1 = arith.constant 0 : i32
    return %c0_i32, %c0_i32_0 : i32, i32
  }
  func.func @transform_2(%arg0: i32) -> (i32, i32) {
    %c0_i32 = arith.constant 0 : i32
    %c0_i32_0 = arith.constant 0 : i32
    %c0_i32_1 = arith.constant 0 : i32
    return %c0_i32, %c0_i32_0 : i32, i32
  }
  func.func @transform_3(%arg0: i32) -> (i32, i32, i32) {
    %c0_i32 = arith.constant 0 : i32
    %c0_i32_0 = arith.constant 0 : i32
    %c0_i32_1 = arith.constant 0 : i32
    return %arg0, %c0_i32, %c0_i32_0 : i32, i32, i32
  }
}

</mosaic_0001>

<bundles_post_ra>
// kernel: tile.8
= control target key start
LH: loop header
LB: loop body
LE: loop exit
PB: predicated region body
PF: predicated region fallthrough
CT: control target
= control target key end

     0   :  { %s22_s0 = inlined_call_operand.vmem [shape: f32[4], index: 0, kind: input, shape index: {}]   ;;  %s23_s1 = inlined_call_operand.vmem [shape: f32[4,4], index: 1, kind: output, shape index: {}]  }
   0x1   :  { %v4_v0 = vld [vmem:[%s22_s0] ss:$0 sm:$0xff] }
   0x2   :  { %5 = vst [vmem:[%s23_s1] sm:$0xf] %v4_v0 }

// kernel: tile.9
= control target key start
LH: loop header
LB: loop body
LE: loop exit
PB: predicated region body
PF: predicated region fallthrough
CT: control target
= control target key end

     0   :  { %s37_s8 = smov 4   ;;  %s38_s9 = smov 8   ;;  %vm7_vm0 = vcmask 31744   ;;  %vm13_vm1 = vcmask 130144   ;;  %vm19_vm2 = vcmask 97344   ;;  %vm25_vm3 = vcmask 64544   ;;  %s55_s0 = inlined_call_operand.vmem [shape: f32[4,4], index: 0, kind: input, shape index: {}]   ;;  %s56_s1 = inlined_call_operand.vmem [shape: f32[16], index: 1, kind: output, shape index: {}]  }
   0x1   :  { %v4_v0 = vld [vmem:[%s55_s0] sm:$0xf]  ;;  %s36_s0 = smov 12  }
   0x2   :  { %5 = vst [vmem:[#allocation1] sm:$0xf] %v4_v0 }
   0x9   :  { %v10_v1 = vld [vmem:[#allocation1 + $0x3] sm:$0x1]   ;;  %v22_v2 = vld [vmem:[#allocation1 + $0x1] sm:$0x1]   ;;  %v16_v3 = vld [vmem:[#allocation1 + $0x2] sm:$0x1]  }
   0xa   :  { %11 = vrot.lane.b32.xlu0 %v10_v1, %s36_s0  ;;  %23 = vrot.lane.b32.xlu1 %v22_v2, %s37_s8  ;;  %v6_v4 = vld [vmem:[#allocation1] sm:$0x1]  }
   0xb   :  { %8 = vst.msk [vmem:[#allocation0] sm:$0x1] %vm7_vm0, %v6_v4  }
  0x12   :  { %17 = vrot.lane.b32.xlu0 %v16_v3, %s38_s9 }
  0x7c   :  { %v12_v5 = vpop.permute.xlu0 %11   ;;  %v24_v6 = vpop.permute.xlu1 %23  }
  0x7d   :  { %14 = vst.msk [vmem:[#allocation0] sm:$0x1] %vm13_vm1, %v12_v5  }
  0x84   :  { %v18_v7 = vpop.permute.xlu0 %17  }
  0x85   :  { %20 = vst.msk [vmem:[#allocation0] sm:$0x1] %vm19_vm2, %v18_v7  }
  0x86   :  { %26 = vst.msk [vmem:[#allocation0] sm:$0x1] %vm25_vm3, %v24_v6  }
  0x8d   :  { %v29_v8 = vld [vmem:[#allocation0] sm:$0x1] }
  0x8e   :  { %32 = vst [vmem:[%s56_s1] sm:$0x1] %v29_v8 }

// kernel: _lambda_.13
= control target key start
LH: loop header
LB: loop body
LE: loop exit
PB: predicated region body
PF: predicated region fallthrough
CT: control target
= control target key end

     0   :  { %vm28_vm0 = vcmask 261120   ;;  %v410_v16 = vmov 32.0   ;;  %s690_s1 = inlined_call_operand.vmem [shape: f32[32,32], index: 1, kind: input, shape index: {}]   ;;  %s691_s0 = inlined_call_operand.vmem [shape: f32[32,32], index: 0, kind: input, shape index: {}]   ;;  %s692_s4 = inlined_call_operand.vmem [shape: f32[1,32], index: 4, kind: input, shape index: {}]   ;;  %s693_s5 = inlined_call_operand.vmem [shape: f32[1,32], index: 5, kind: input, shape index: {}]   ;;  %s694_s2 = inlined_call_operand.vmem [shape: bf16[64,128], index: 2, kind: input, shape index: {}]   ;;  %s695_s3 = inlined_call_operand.vmem [shape: f32[1,128], index: 3, kind: input, shape index: {}]   ;;  %s696_s6 = inlined_call_operand.vmem [shape: bf16[32,128], index: 6, kind: output, shape index: {}]  }
   0x1   :  { %v146_v0 = vld [vmem:[%s690_s1 + $0x10] sm:$0xff]  ;;  %v144_v1 = vld [vmem:[%s690_s1] sm:$0xff]  ;;  %v147_v6 = vld [vmem:[%s690_s1 + $0x18] sm:$0xff]  ;;  %392 = vrcp.f32 %v410_v16 }
   0x2   :  { %v24_v2 = vld [vmem:[%s691_s0] sm:$0xff]  ;;  %v154_v3 = vsel %vm28_vm0, %v146_v0, 0.0  ;;  %v148_v4 = vsel %vm28_vm0, %v144_v1, 0.0  ;;  %v145_v7 = vld [vmem:[%s690_s1 + $0x8] sm:$0xff]  ;;  %v157_v9 = vsel %vm28_vm0, %v147_v6, 0.0  ;;  %v26_v12 = vld [vmem:[%s691_s0 + $0x10] sm:$0xff] }
   0x3   :  { %v29_v5 = vsel %vm28_vm0, %v24_v2, 0.0  ;;  %155 = vadd.xlane.f32.xlu1 %v154_v3  ;;  %149 = vadd.xlane.f32.xlu0 %v148_v4  ;;  %v25_v8 = vld [vmem:[%s691_s0 + $0x8] sm:$0xff]  ;;  %v151_v10 = vsel %vm28_vm0, %v145_v7, 0.0  ;;  %v27_v13 = vld [vmem:[%s691_s0 + $0x18] sm:$0xff]  ;;  %v35_v14 = vsel %vm28_vm0, %v26_v12, 0.0 }
   0x4   :  { %30 = vadd.xlane.f32.xlu2 %v29_v5  ;;  %v32_v11 = vsel %vm28_vm0, %v25_v8, 0.0  ;;  %v38_v15 = vsel %vm28_vm0, %v27_v13, 0.0 }
   0x7   :  { %v393_v17 = vpop.eup %392 }
   0x8   :  { %v42_v18 = vmul.f32 32.0, %v393_v17  ;;  %vm46_vm1 = vweird.f32 %v393_v17 }
   0xa   :  { %v43_v19 = vsub.f32 1.0, %v42_v18 }
   0xb   :  { %158 = vadd.xlane.f32.xlu1 %v157_v9  ;;  %152 = vadd.xlane.f32.xlu0 %v151_v10 }
   0xc   :  { %33 = vadd.xlane.f32.xlu2 %v32_v11  ;;  %v44_v20 = vmul.f32 %v393_v17, %v43_v19 }
   0xe   :  { %v45_v21 = vadd.f32 %v393_v17, %v44_v20  ;;  %v371_v20 = vld [vmem:[%s694_s2 + $0x18] sm:$0xff] }
   0xf   :  { %383 = vmatpush.bf16.msra.mxu1 %v371_v20  ;;  %323 = vmatpush.bf16.msra.mxu0 %v371_v20 }
  0x10   :  { %v479_v22 = vsel %vm46_vm1, %v393_v17, %v45_v21 }
  0x13   :  { %36 = vadd.xlane.f32.xlu0 %v35_v14  ;;  %39 = vadd.xlane.f32.xlu1 %v38_v15 }
  0x76   :  { %v156_v23 = vpop.xlane.xlu1 %155  ;;  %v150_v24 = vpop.xlane.xlu0 %149 }
  0x77   :  { %v162_v25 = vmul.f32 %v156_v23, %v479_v22  ;;  %v160_v26 = vmul.f32 %v150_v24, %v479_v22  ;;  %v31_v27 = vpop.xlane.xlu2 %30 }
  0x78   :  { %v48_v36 = vmul.f32 %v479_v22, %v31_v27 }
  0x79   :  { %v483_v28 = vsub.f32 %v146_v0, %v162_v25  ;;  %v485_v29 = vsub.f32 %v144_v1, %v160_v26 }
  0x7a   :  { %v503_v44 = vsub.f32 %v24_v2, %v48_v36 }
  0x7b   :  { %v170_v30 = vmul.f32 %v483_v28, %v483_v28  ;;  %v168_v31 = vmul.f32 %v485_v29, %v485_v29 }
  0x7c   :  { %v56_v55 = vmul.f32 %v503_v44, %v503_v44 }
  0x7d   :  { %v178_v32 = vsel %vm28_vm0, %v170_v30, 0.0  ;;  %v172_v33 = vsel %vm28_vm0, %v168_v31, 0.0  ;;  %v370_v30 = vld [vmem:[%s694_s2 + $0x10] sm:$0xff] }
  0x7e   :  { %v159_v34 = vpop.xlane.xlu1 %158  ;;  %v153_v35 = vpop.xlane.xlu0 %152  ;;  %179 = vadd.xlane.f32.xlu1 %v178_v32  ;;  %173 = vadd.xlane.f32.xlu2 %v172_v33  ;;  %v60_v59 = vsel %vm28_vm0, %v56_v55, 0.0 }
  0x7f   :  { %v163_v37 = vmul.f32 %v159_v34, %v479_v22  ;;  %v161_v38 = vmul.f32 %v153_v35, %v479_v22  ;;  %v34_v39 = vpop.xlane.xlu2 %33  ;;  %384 = vmatpush.bf16.msra.mxu1 %v370_v30  ;;  %324 = vmatpush.bf16.msra.mxu0 %v370_v30 }
  0x80   :  { %v49_v40 = vmul.f32 %v479_v22, %v34_v39 }
  0x81   :  { %v497_v41 = vsub.f32 %v147_v6, %v163_v37  ;;  %v499_v42 = vsub.f32 %v145_v7, %v161_v38 }
  0x82   :  { %v501_v43 = vsub.f32 %v25_v8, %v49_v40 }
  0x83   :  { %v169_v45 = vmul.f32 %v499_v42, %v499_v42  ;;  %v171_v46 = vmul.f32 %v497_v41, %v497_v41 }
  0x84   :  { %v57_v47 = vmul.f32 %v501_v43, %v501_v43 }
  0x85   :  { %v175_v48 = vsel %vm28_vm0, %v169_v45, 0.0  ;;  %v181_v49 = vsel %vm28_vm0, %v171_v46, 0.0 }
  0x86   :  { %176 = vadd.xlane.f32.xlu0 %v175_v48  ;;  %v37_v50 = vpop.xlane.xlu0 %36  ;;  %182 = vadd.xlane.f32.xlu2 %v181_v49  ;;  %v63_v51 = vsel %vm28_vm0, %v57_v47, 0.0  ;;  %v40_v52 = vpop.xlane.xlu1 %39  ;;  %v369_v47 = vld [vmem:[%s694_s2 + $0x8] sm:$0xff] }
  0x87   :  { %v50_v53 = vmul.f32 %v479_v22, %v37_v50  ;;  %64 = vadd.xlane.f32.xlu1 %v63_v51  ;;  %v51_v54 = vmul.f32 %v479_v22, %v40_v52  ;;  %v584_v51 = vld [vmem:[%s692_s4] ss:$0 sm:$0xff]  ;;  %385 = vmatpush.bf16.msra.mxu1 %v369_v47 }
  0x88   :  { %325 = vmatpush.bf16.msra.mxu0 %v369_v47 }
  0x89   :  { %v518_v56 = vsub.f32 %v26_v12, %v50_v53  ;;  %v520_v57 = vsub.f32 %v27_v13, %v51_v54 }
  0x8b   :  { %v58_v58 = vmul.f32 %v518_v56, %v518_v56  ;;  %v59_v61 = vmul.f32 %v520_v57, %v520_v57 }
  0x8d   :  { %v66_v60 = vsel %vm28_vm0, %v58_v58, 0.0  ;;  %v69_v62 = vsel %vm28_vm0, %v59_v61, 0.0 }
  0x8e   :  { %67 = vadd.xlane.f32.xlu2 %v66_v60  ;;  %61 = vadd.xlane.f32.xlu0 %v60_v59 }
  0x96   :  { %70 = vadd.xlane.f32.xlu0 %v69_v62  ;;  %v368_v62 = vld [vmem:[%s694_s2] sm:$0xff]  ;;  %s411_s2 = smov 32  }
  0x97   :  { %386 = vmatpush.bf16.msra.mxu1 %v368_v62  ;;  %326 = vmatpush.bf16.msra.mxu0 %v368_v62 }
  0xf1   :  { %v180_v63 = vpop.xlane.xlu1 %179  ;;  %v174_v0 = vpop.xlane.xlu2 %173 }
  0xf2   :  { %v186_v1 = vmul.f32 %v180_v63, %v479_v22  ;;  %v184_v2 = vmul.f32 %v174_v0, %v479_v22  ;;  %v602_v0 = vld [vmem:[%s693_s5] ss:$0 sm:$0xff] }
  0xf4   :  { %v190_v3 = vadd.f32 1e-05, %v186_v1  ;;  %v188_v4 = vadd.f32 1e-05, %v184_v2 }
  0xf6   :  { %394 = vrsqrt.f32 %v190_v3  ;;  %vm218_vm2 = vweird.f32 %v190_v3  ;;  %vm198_vm6 = vweird.f32 %v188_v4 }
  0xf7   :  { %396 = vrsqrt.f32 %v188_v4 }
  0xf9   :  { %v177_v5 = vpop.xlane.xlu0 %176  ;;  %v183_v6 = vpop.xlane.xlu2 %182 }
  0xfa   :  { %v185_v7 = vmul.f32 %v177_v5, %v479_v22  ;;  %v65_v8 = vpop.xlane.xlu1 %64  ;;  %v187_v9 = vmul.f32 %v183_v6, %v479_v22 }
  0xfb   :  { %v73_v10 = vmul.f32 %v65_v8, %v479_v22 }
  0xfc   :  { %v395_v11 = vpop.eup %394  ;;  %v534_v12 = vadd.f32 1e-05, %v185_v7  ;;  %v536_v13 = vadd.f32 1e-05, %v187_v9 }
  0xfd   :  { %v397_v14 = vpop.eup %396  ;;  %v213_v15 = vmul.f32 %v395_v11, %v190_v3  ;;  %v538_v16 = vadd.f32 1e-05, %v73_v10  ;;  %vm219_vm3 = vweird.f32 %v395_v11 }
  0xfe   :  { %v193_v17 = vmul.f32 %v397_v14, %v188_v4  ;;  %398 = vrsqrt.f32 %v534_v12  ;;  %vm553_vm4 = vmor %vm218_vm2, %vm219_vm3  ;;  %vm199_vm5 = vweird.f32 %v397_v14  ;;  %vm208_vm7 = vweird.f32 %v534_v12 }
  0xff   :  { %v214_v18 = vmul.f32 %v395_v11, %v213_v15  ;;  %400 = vrsqrt.f32 %v538_v16  ;;  %vm200_vm8 = vmor %vm198_vm6, %vm199_vm5  ;;  %vm96_vm9 = vweird.f32 %v538_v16  ;;  %vm228_vm12 = vweird.f32 %v536_v13 }
 0x100   :  { %v194_v19 = vmul.f32 %v397_v14, %v193_v17  ;;  %402 = vrsqrt.f32 %v536_v13 }
 0x101   :  { %v215_v21 = vmul.f32 0.5, %v214_v18  ;;  %v62_v23 = vpop.xlane.xlu0 %61  ;;  %v68_v24 = vpop.xlane.xlu2 %67 }
 0x102   :  { %v195_v25 = vmul.f32 0.5, %v194_v19  ;;  %v72_v26 = vmul.f32 %v62_v23, %v479_v22  ;;  %v74_v27 = vmul.f32 %v68_v24, %v479_v22 }
 0x103   :  { %v216_v31 = vsub.f32 1.5, %v215_v21 }
 0x104   :  { %v551_v32 = vpop.eup %398  ;;  %v196_v34 = vsub.f32 1.5, %v195_v25  ;;  %v557_v35 = vadd.f32 1e-05, %v72_v26  ;;  %v563_v39 = vadd.f32 1e-05, %v74_v27 }
 0x105   :  { %v559_v36 = vpop.eup %400  ;;  %v217_v37 = vmul.f32 %v395_v11, %v216_v31  ;;  %v203_v38 = vmul.f32 %v551_v32, %v534_v12  ;;  %vm209_vm10 = vweird.f32 %v551_v32 }
 0x106   :  { %v565_v40 = vpop.eup %402  ;;  %v197_v45 = vmul.f32 %v397_v14, %v196_v34  ;;  %v91_v46 = vmul.f32 %v559_v36, %v538_v16  ;;  %404 = vrsqrt.f32 %v557_v35  ;;  %vm97_vm11 = vweird.f32 %v559_v36  ;;  %vm609_vm14 = vmor %vm208_vm7, %vm209_vm10 }
 0x107   :  { %v221_v48 = vsel %vm553_vm4, %v395_v11, %v217_v37  ;;  %v204_v49 = vmul.f32 %v551_v32, %v203_v38  ;;  %v223_v50 = vmul.f32 %v565_v40, %v536_v13  ;;  %406 = vrsqrt.f32 %v563_v39  ;;  %vm621_vm15 = vmor %vm96_vm9, %vm97_vm11 }
 0x108   :  { %v234_v52 = vmul.f32 %v221_v48, %v483_v28  ;;  %v201_v53 = vsel %vm200_vm8, %v397_v14, %v197_v45  ;;  %v92_v54 = vmul.f32 %v559_v36, %v91_v46  ;;  %vm229_vm13 = vweird.f32 %v565_v40 }
 0x109   :  { %v232_v55 = vmul.f32 %v201_v53, %v485_v29  ;;  %v205_v58 = vmul.f32 0.5, %v204_v49  ;;  %v224_v59 = vmul.f32 %v565_v40, %v223_v50  ;;  %v71_v60 = vpop.xlane.xlu0 %70  ;;  %vm629_vm1 = vmor %vm228_vm12, %vm229_vm13  ;;  %vm86_vm2 = vweird.f32 %v557_v35 }
 0x10a   :  { %v93_v61 = vmul.f32 0.5, %v92_v54  ;;  %v75_v28 = vmul.f32 %v71_v60, %v479_v22  ;;  %v238_v5 = vmul.f32 %v584_v51, %v234_v52  ;;  %vm106_vm4 = vweird.f32 %v563_v39 }
 0x10b   :  { %v206_v29 = vsub.f32 1.5, %v205_v58  ;;  %v225_v63 = vmul.f32 0.5, %v224_v59  ;;  %v236_v1 = vmul.f32 %v584_v51, %v232_v55  ;;  %vm314_vm11 = vcmask 523264  }
 0x10c   :  { %v405_v2 = vpop.eup %404  ;;  %v94_v3 = vsub.f32 1.5, %v93_v61  ;;  %v613_v4 = vadd.f32 1e-05, %v75_v28  ;;  %v242_v20 = vadd.f32 %v602_v0, %v238_v5 }
 0x10d   :  { %v207_v6 = vmul.f32 %v551_v32, %v206_v29  ;;  %v226_v8 = vsub.f32 1.5, %v225_v63  ;;  %v81_v9 = vmul.f32 %v405_v2, %v557_v35  ;;  %v407_v12 = vpop.eup %406  ;;  %v240_v13 = vadd.f32 %v602_v0, %v236_v1 }
 0x10e   :  { %v95_v10 = vmul.f32 %v559_v36, %v94_v3  ;;  %408 = vrsqrt.f32 %v613_v4  ;;  %v101_v19 = vmul.f32 %v407_v12, %v563_v39  ;;  %vm87_vm3 = vweird.f32 %v405_v2 }
 0x10f   :  { %v211_v14 = vsel %vm609_vm14, %v551_v32, %v207_v6  ;;  %v227_v15 = vmul.f32 %v565_v40, %v226_v8  ;;  %v82_v16 = vmul.f32 %v405_v2, %v81_v9  ;;  %v244_v30 = vpack.c.bf16 %v240_v13, %v240_v13  ;;  %vm656_vm5 = vmor %vm86_vm2, %vm87_vm3 }
 0x110   :  { %v233_v17 = vmul.f32 %v211_v14, %v499_v42  ;;  %v99_v18 = vsel %vm621_vm15, %v559_v36, %v95_v10  ;;  %v102_v26 = vmul.f32 %v407_v12, %v101_v19  ;;  %vm107_vm6 = vweird.f32 %v407_v12 }
 0x111   :  { %v121_v21 = vmul.f32 %v99_v18, %v501_v43  ;;  %v231_v23 = vsel %vm629_vm1, %v565_v40, %v227_v15  ;;  %v83_v24 = vmul.f32 0.5, %v82_v16  ;;  %v246_v38 = vpack.c.bf16 %v242_v20, %v242_v20  ;;  %vm108_vm7 = vmor %vm106_vm4, %vm107_vm6 }
 0x112   :  { %v235_v25 = vmul.f32 %v231_v23, %v497_v41  ;;  %v237_v42 = vmul.f32 %v584_v51, %v233_v17  ;;  %v103_v33 = vmul.f32 0.5, %v102_v26  ;;  %v262_v49 = vunpack.c.l.b16 %v244_v30 }
 0x113   :  { %v84_v27 = vsub.f32 1.5, %v83_v24  ;;  %v129_v31 = vmul.f32 %v584_v51, %v121_v21  ;;  %vm116_vm8 = vweird.f32 %v613_v4  ;;  %v264_v58 = vunpack.c.l.b16 %v246_v38 }
 0x114   :  { %v409_v32 = vpop.eup %408  ;;  %v241_v41 = vadd.f32 %v602_v0, %v237_v42  ;;  %v239_v34 = vmul.f32 %v584_v51, %v235_v25  ;;  %v104_v45 = vsub.f32 1.5, %v103_v33 }
 0x115   :  { %v85_v36 = vmul.f32 %v405_v2, %v84_v27  ;;  %v111_v37 = vmul.f32 %v409_v32, %v613_v4  ;;  %v137_v40 = vadd.f32 %v602_v0, %v129_v31  ;;  %vm117_vm9 = vweird.f32 %v409_v32 }
 0x116   :  { %v245_v46 = vpack.c.bf16 %v241_v41, %v241_v41  ;;  %v243_v35 = vadd.f32 %v602_v0, %v239_v34  ;;  %v105_v52 = vmul.f32 %v407_v12, %v104_v45  ;;  %vm118_vm10 = vmor %vm116_vm8, %vm117_vm9 }
 0x117   :  { %v89_v47 = vsel %vm656_vm5, %v405_v2, %v85_v36  ;;  %v112_v48 = vmul.f32 %v409_v32, %v111_v37  ;;  %v141_v63 = vpack.c.bf16 %v137_v40, %v137_v40 }
 0x118   :  { %v120_v50 = vmul.f32 %v89_v47, %v503_v44  ;;  %v263_v53 = vunpack.c.l.b16 %v245_v46  ;;  %v247_v54 = vpack.c.bf16 %v243_v35, %v243_v35  ;;  %v109_v59 = vsel %vm108_vm7, %v407_v12, %v105_v52 }
 0x119   :  { %v113_v55 = vmul.f32 0.5, %v112_v48  ;;  %v122_v39 = vmul.f32 %v109_v59, %v518_v56  ;;  %v253_v56 = vunpack.c.l.b16 %v141_v63 }
 0x11a   :  { %v266_v60 = vpack.c.b16 %v263_v53, %v262_v49  ;;  %v265_v61 = vunpack.c.l.b16 %v247_v54  ;;  %v128_v28 = vmul.f32 %v584_v51, %v120_v50 }
 0x11b   :  { %v114_v62 = vsub.f32 1.5, %v113_v55  ;;  %v130_v2 = vmul.f32 %v584_v51, %v122_v39 }
 0x11c   :  { %268 = vrot.lane.b32.xlu1 %v266_v60, %s411_s2  ;;  %v267_v44 = vpack.c.b16 %v265_v61, %v264_v58  ;;  %v136_v29 = vadd.f32 %v602_v0, %v128_v28 }
 0x11d   :  { %v115_v1 = vmul.f32 %v409_v32, %v114_v62  ;;  %v138_v4 = vadd.f32 %v602_v0, %v130_v2 }
 0x11e   :  { %270 = vrot.lane.b32.xlu2 %v267_v44, %s411_s2  ;;  %v140_v22 = vpack.c.bf16 %v136_v29, %v136_v29 }
 0x11f   :  { %v119_v3 = vsel %vm118_vm10, %v409_v32, %v115_v1  ;;  %v142_v10 = vpack.c.bf16 %v138_v4, %v138_v4 }
 0x120   :  { %v123_v5 = vmul.f32 %v119_v3, %v520_v57  ;;  %v252_v6 = vunpack.c.l.b16 %v140_v22 }
 0x121   :  { %v254_v12 = vunpack.c.l.b16 %v142_v10 }
 0x122   :  { %v131_v7 = vmul.f32 %v584_v51, %v123_v5  ;;  %v256_v8 = vpack.c.b16 %v253_v56, %v252_v6  ;;  %v391_v51 = vld [vmem:[%s695_s3] ss:$0 sm:$0xff] }
 0x124   :  { %v139_v9 = vadd.f32 %v602_v0, %v131_v7 }
 0x126   :  { %v143_v11 = vpack.c.bf16 %v139_v9, %v139_v9 }
 0x128   :  { %v255_v14 = vunpack.c.l.b16 %v143_v11 }
 0x12a   :  { %v257_v15 = vpack.c.b16 %v255_v14, %v254_v12 }
 0x178   :  { %v271_v16 = vpop.permute.xlu2 %270 }
 0x179   :  { %v277_v13 = vsel %vm28_vm0, %v257_v15, %v271_v16 }
 0x17a   :  { %367 = vmatmul.msk.bf16.vlgmr.msra.gmra.mxu1 %vm314_vm11, %v277_v13 }
 0x18e   :  { %v269_v17 = vpop.permute.xlu1 %268 }
 0x18f   :  { %v274_v57 = vsel %vm28_vm0, %v256_v8, %v269_v17 }
 0x190   :  { %366 = vmatmul.msk.bf16.vlgmr.msra.gmra.mxu0 %vm314_vm11, %v274_v57 }
 0x1f7   :  { %v333_v18 = vpop.f32.mrf.mxu1 }
 0x1f8   :  { %v334_v19 = vadd.f32 %v391_v51, %v333_v18 }
 0x1ff   :  { %v335_v0 = vpop.f32.mrf.mxu1 }
 0x200   :  { %v336_v20 = vadd.f32 %v391_v51, %v335_v0 }
 0x202   :  { %v380_v21 = vpack.c.bf16 %v336_v20, %v334_v19 }
 0x204   :  { %382 = vst [vmem:[%s696_s6 + $0x8] sm:$0xff] %v380_v21  }
 0x20d   :  { %v328_v23 = vpop.f32.mrf.mxu0 }
 0x20e   :  { %v329_v25 = vadd.f32 %v391_v51, %v328_v23 }
 0x215   :  { %v330_v24 = vpop.f32.mrf.mxu0 }
 0x216   :  { %v331_v26 = vadd.f32 %v391_v51, %v330_v24 }
 0x218   :  { %v375_v42 = vpack.c.bf16 %v331_v26, %v329_v25 }
 0x21a   :  { %376 = vst [vmem:[%s696_s6] sm:$0xff] %v375_v42  }

// kernel: _lambda_.14
= control target key start
LH: loop header
LB: loop body
LE: loop exit
PB: predicated region body
PF: predicated region fallthrough
CT: control target
= control target key end

     0   :  { %vm57_vm0 = vcmask 261120   ;;  %s195_s1 = inlined_call_operand.vmem [shape: bf16[32,128], index: 1, kind: input, shape index: {}]   ;;  %s196_s2 = inlined_call_operand.vmem [shape: f32[1,128], index: 2, kind: input, shape index: {}]   ;;  %s197_s0 = inlined_call_operand.vmem [shape: bf16[32,32], index: 0, kind: input, shape index: {}]   ;;  %s198_s3 = inlined_call_operand.vmem [shape: bf16[32,128], index: 3, kind: output, shape index: {}]  }
   0x1   :  { %v139_v0 = vld [vmem:[%s195_s1 + $0x8] sm:$0xff]  ;;  %v138_v1 = vld [vmem:[%s195_s1] sm:$0xff] }
   0x2   :  { %70 = vmatpush.bf16.msra.mxu0 %v139_v0  ;;  %151 = vmatpush.bf16.msra.mxu1 %v139_v0  ;;  %v136_v2 = vld [vmem:[%s197_s0] sm:$0xff]  ;;  %v137_v3 = vld [vmem:[%s197_s0 + $0x8] sm:$0xff] }
   0x3   :  { %v153_v6 = vld [vmem:[%s196_s2] ss:$0 sm:$0xff] }
   0x6   :  { %71 = vmatpush.bf16.msra.mxu0 %v138_v1  ;;  %152 = vmatpush.bf16.msra.mxu1 %v138_v1 }
   0x9   :  { %134 = vmatmul.msk.bf16.vlgmr.msra.gmra.mxu0 %vm57_vm0, %v136_v2  ;;  %135 = vmatmul.msk.bf16.vlgmr.msra.gmra.mxu1 %vm57_vm0, %v137_v3 }
  0x86   :  { %v73_v4 = vpop.f32.mrf.mxu0  ;;  %v78_v5 = vpop.f32.mrf.mxu1 }
  0x87   :  { %v102_v9 = vadd.f32 %v153_v6, %v73_v4  ;;  %v104_v10 = vadd.f32 %v153_v6, %v78_v5 }
  0x8e   :  { %v75_v7 = vpop.f32.mrf.mxu0  ;;  %v80_v8 = vpop.f32.mrf.mxu1 }
  0x8f   :  { %v103_v11 = vadd.f32 %v153_v6, %v75_v7  ;;  %v105_v12 = vadd.f32 %v153_v6, %v80_v8 }
  0x91   :  { %v143_v13 = vpack.c.bf16 %v103_v11, %v102_v9  ;;  %v148_v14 = vpack.c.bf16 %v105_v12, %v104_v10 }
  0x93   :  { %144 = vst [vmem:[%s198_s3] sm:$0xff] %v143_v13  }
  0x94   :  { %150 = vst [vmem:[%s198_s3 + $0x8] sm:$0xff] %v148_v14  }

// kernel: _lambda_.15
= control target key start
LH: loop header
LB: loop body
LE: loop exit
PB: predicated region body
PF: predicated region fallthrough
CT: control target
= control target key end

     0   :  { %s905_s12 = smov 0   ;;  %s1061_s0 = inlined_call_operand.vmem [shape: bf16[8,4,96], index: 0, kind: input, shape index: {}]   ;;  %s1062_s1 = inlined_call_operand.vmem [shape: f32[2,4,4], index: 1, kind: input, shape index: {}]   ;;  %s1063_s2 = inlined_call_operand.vmem [shape: f32[1,4,4], index: 2, kind: input, shape index: {}]   ;;  %s1064_s3 = inlined_call_operand.vmem [shape: bf16[8,4,32], index: 3, kind: output, shape index: {}]  }
   0x1 LB: > { %s787_s13 = sadd.s32 4294967295, %s877_s12   ;;  %p791_p0 = scmp.ge.s32.totalorder %s877_s12, 1  ;;  %s877_s12 = sphi %s905_s12, %s13_s12  }
   0x2   : > { %p138_p1 = scmp.lt.s32.totalorder %s877_s12, 3 }
   0x4   : > { %p139_p2 = pnand %p791_p0, %p138_p1 }
   0x5   : > { %s792_s14 = sshll.u32 (!%p139_p2), %s787_s13, 2  ;;  %s879_s18 = smov (!%p139_p2), 96  }
   0x6   : > { %142 = sbr.rel (%p139_p2) target bundleno = 1241 (0x4d9), region = 32  ;;  %p163_p3 = scmp.lt.s32.totalorder (!%p139_p2), %s792_s14, 7 }
   0x7   : > { %s880_s19 = smov (!%p139_p2), 64   ;;  %s881_s20 = smov (!%p139_p2), 80  }
   0x8   : > { %s882_s21 = smov (!%p139_p2), 112   ;;  %s883_s26 = smov (!%p139_p2), 48  }
   0x9   : > { %s884_s27 = smov (!%p139_p2), 16  }
   0xb   : > { %s1066_s14 = smov (!%p163_p3, %s792_s14), 7  ;;  %vm185_vm0 = vcmask 130048   ;;  %v280_v31 = vld [vmem:[%s1062_s1] sm:$0xf]  ;;  %vm285_vm1 = vcmask 27648   ;;  %vm343_vm2 = vcmask 1041408  }
   0xc   : > { %s793_s2 = sshll.u32 %s1066_s14, 1  ;;  %vm339_vm3 = vcmask 31744   ;;  %vm726_vm4 = vcmask 254976  }
   0xd   : > { %s166_s17 = scalar_lea.vmem %s1061_s0, %s793_s2  ;;  %s172_s30 = scalar_lea.vmem %s1064_s3, %s793_s2 }
   0xe   : > { %v921_v0 = vld [vmem:[%s166_s17] sm:$0x3]  ;;  %v924_v1 = vld [vmem:[%s166_s17 + $0x2] sm:$0x3]  ;;  %v927_v3 = vld [vmem:[%s166_s17 + $0x4] sm:$0x3] }
   0xf   : > { %180 = vst [vmem:[#allocation1] ss:$4 sm:$0xff] %v921_v0  ;;  %v930_v5 = vld [vmem:[%s166_s17 + $0x6] sm:$0x3] }
  0x16   : > { %v181_v2 = vld.sshfl [vmem:[#allocation1] sm:$0xff pattern:$0x73625140] }
  0x17   : > { %183 = vrot.lane.b32.xlu1 %v181_v2, %s879_s18  ;;  %205 = vst [vmem:[#allocation1] ss:$4 sm:$0xff] %v924_v1 }
  0x1e   : > { %v206_v4 = vld.sshfl [vmem:[#allocation1] sm:$0xff pattern:$0x73625140] }
  0x1f   : > { %208 = vrot.lane.b32.xlu1 %v206_v4, %s879_s18  ;;  %229 = vst [vmem:[#allocation1] ss:$4 sm:$0xff] %v927_v3 }
  0x26   : > { %v230_v6 = vld.sshfl [vmem:[#allocation1] sm:$0xff pattern:$0x73625140] }
  0x27   : > { %232 = vrot.lane.b32.xlu0 %v230_v6, %s879_s18  ;;  %253 = vst [vmem:[#allocation1] ss:$4 sm:$0xff] %v930_v5 }
  0x2e   : > { %v254_v7 = vld.sshfl [vmem:[#allocation1] sm:$0xff pattern:$0x73625140] }
  0x2f   : > { %256 = vrot.lane.b32.xlu0 %v254_v7, %s879_s18  ;;  %334 = vst [vmem:[#allocation1] ss:$4 sm:$0xff] %v921_v0 }
  0x36   : > { %v335_v8 = vld.sshfl [vmem:[#allocation1] sm:$0xff pattern:$0x73625140] }
  0x37   : > { %337 = vrot.lane.b32.xlu2 %v335_v8, %s880_s19  ;;  %360 = vst [vmem:[#allocation1] ss:$4 sm:$0xff] %v924_v1 }
  0x3e   : > { %v361_v10 = vld.sshfl [vmem:[#allocation1] sm:$0xff pattern:$0x73625140] }
  0x3f   : > { %384 = vst [vmem:[#allocation1] ss:$4 sm:$0xff] %v927_v3  ;;  %363 = vrot.lane.b32.xlu0 %v361_v10, %s880_s19 }
  0x46   : > { %v385_v13 = vld.sshfl [vmem:[#allocation1] sm:$0xff pattern:$0x73625140] }
  0x47   : > { %387 = vrot.lane.b32.xlu2 %v385_v13, %s880_s19  ;;  %408 = vst [vmem:[#allocation1] ss:$4 sm:$0xff] %v930_v5 }
  0x4e   : > { %v409_v16 = vld.sshfl [vmem:[#allocation1] sm:$0xff pattern:$0x73625140] }
  0x4f   : > { %411 = vrot.lane.b32.xlu2 %v409_v16, %s880_s19  ;;  %432 = vst [vmem:[#allocation1] ss:$4 sm:$0xff] %v921_v0 }
  0x56   : > { %v945_v19 = vld.sshfl [vmem:[#allocation1] sm:$0xff pattern:$0x73625140] }
  0x57   : > { %437 = vst [vmem:[#allocation1] ss:$4 sm:$0xff] %v921_v0 }
  0x5e   : > { %v951_v21 = vld.sshfl [vmem:[#allocation1] sm:$0xff pattern:$0x73625140] }
  0x5f   : > { %461 = vst [vmem:[#allocation1] ss:$4 sm:$0xff] %v924_v1 }
  0x66   : > { %v956_v22 = vld.sshfl [vmem:[#allocation1] sm:$0xff pattern:$0x73625140] }
  0x67   : > { %466 = vst [vmem:[#allocation1] ss:$4 sm:$0xff] %v924_v1 }
  0x6e   : > { %v959_v23 = vld.sshfl [vmem:[#allocation1] sm:$0xff pattern:$0x73625140] }
  0x6f   : > { %490 = vst [vmem:[#allocation1] ss:$4 sm:$0xff] %v927_v3 }
  0x76   : > { %v491_v24 = vld.sshfl [vmem:[#allocation1] sm:$0xff pattern:$0x73625140] }
  0x77   : > { %495 = vst [vmem:[#allocation1] ss:$4 sm:$0xff] %v927_v3 }
  0x7e   : > { %v496_v25 = vld.sshfl [vmem:[#allocation1] sm:$0xff pattern:$0x73625140] }
  0x7f   : > { %519 = vst [vmem:[#allocation1] ss:$4 sm:$0xff] %v930_v5 }
  0x86   : > { %v520_v26 = vld.sshfl [vmem:[#allocation1] sm:$0xff pattern:$0x73625140] }
  0x87   : > { %524 = vst [vmem:[#allocation1] ss:$4 sm:$0xff] %v930_v5 }
  0x89   : > { %v184_v9 = vpop.permute.xlu1 %183 }
  0x8a   : > { %v189_v11 = vsel %vm185_vm0, %v184_v9, 0 }
  0x8b   : > { %198 = vmatpush.bf16.xpose.msra.mxu0 %v189_v11 }
  0x8e   : > { %v525_v27 = vld.sshfl [vmem:[#allocation1] sm:$0xff pattern:$0x73625140] }
  0x8f   : > { %527 = vrot.lane.b32.xlu2 %v525_v27, %s881_s20  ;;  %606 = vst [vmem:[#allocation1] ss:$4 sm:$0xff] %v921_v0 }
  0x91   : > { %v209_v12 = vpop.permute.xlu1 %208  ;;  %v338_v34 = vpop.permute.xlu2 %337 }
  0x92   : > { %796 = vmatmul.msk.bf16.vlgmr.msra.gmra.mxu0 %vm185_vm0, %v921_v0  ;;  %v213_v14 = vsel %vm185_vm0, %v209_v12, 0  ;;  %v345_v36 = vsel %vm343_vm2, %v338_v34, 0 }
  0x93   : > { %222 = vmatpush.bf16.xpose.msra.mxu1 %v213_v14  ;;  %354 = vmatpush.bf16.msrb.mxu0 %v345_v36 }
  0x96   : > { %v967_v28 = vld.sshfl [vmem:[#allocation1] sm:$0xff pattern:$0x73625140] }
  0x97   : > { %630 = vst [vmem:[#allocation1] ss:$4 sm:$0xff] %v924_v1  ;;  %493 = vrot.lane.b32.xlu2 %v491_v24, %s882_s21 }
  0x99   : > { %v233_v15 = vpop.permute.xlu0 %232 }
  0x9a   : > { %797 = vmatmul.msk.bf16.vlgmr.msra.gmra.mxu1 %vm185_vm0, %v924_v1  ;;  %v237_v17 = vsel %vm185_vm0, %v233_v15, 0 }
  0x9b   : > { %246 = vmatpush.bf16.xpose.msra.mxu2 %v237_v17 }
  0x9e   : > { %v971_v29 = vld.sshfl [vmem:[#allocation1] sm:$0xff pattern:$0x73625140] }
  0x9f   : > { %654 = vst [vmem:[#allocation1] ss:$4 sm:$0xff] %v927_v3 }
  0xa1   : > { %v257_v18 = vpop.permute.xlu0 %256  ;;  %v388_v41 = vpop.permute.xlu2 %387 }
  0xa2   : > { %798 = vmatmul.msk.bf16.vlgmr.msra.gmra.mxu2 %vm185_vm0, %v927_v3  ;;  %v261_v20 = vsel %vm185_vm0, %v257_v18, 0  ;;  %v393_v43 = vsel %vm343_vm2, %v388_v41, 0 }
  0xa3   : > { %270 = vmatpush.bf16.xpose.msra.mxu3 %v261_v20  ;;  %402 = vmatpush.bf16.msrb.mxu2 %v393_v43 }
  0xa9   : > { %v412_v47 = vpop.permute.xlu2 %411 }
  0xaa   : > { %799 = vmatmul.msk.bf16.vlgmr.msra.gmra.mxu3 %vm185_vm0, %v930_v5  ;;  %v417_v48 = vsel %vm343_vm2, %v412_v47, 0 }
  0xab   : > { %426 = vmatpush.bf16.msrb.mxu3 %v417_v48 }
  0xb1   : > { %v364_v44 = vpop.permute.xlu0 %363 }
  0xb2   : > { %v369_v45 = vsel %vm343_vm2, %v364_v44, 0 }
  0xb3   : > { %378 = vmatpush.bf16.msrb.mxu1 %v369_v45 }
  0xe9   : > { %v528_v58 = vpop.permute.xlu2 %527 }
  0xea   : > { %v533_v60 = vsel %vm185_vm0, %v528_v58, 0 }
  0xeb   : > { %542 = vmatpush.bf16.xpose.msra.mxu3 %v533_v60 }
  0xf1   : > { %v494_v6 = vpop.permute.xlu2 %493 }
 0x10f   : > { %v200_v30 = vpop.f32.mrf.mxu0 }
 0x110   : > { %v276_v32 = vmul.f32 0.25, %v200_v30 }
 0x112   : > { %v281_v33 = vadd.f32 %v280_v31, %v276_v32 }
 0x114   : > { %v286_v35 = vsel %vm285_vm1, %v281_v33, -inf }
 0x115   : > { %287 = vmax.xlane.f32.xlu0 %v286_v35 }
 0x117   : > { %v224_v37 = vpop.f32.mrf.mxu1  ;;  %v202_v38 = vpop.f32.mrf.mxu0 }
 0x118   : > { %v277_v39 = vmul.f32 0.25, %v224_v37 }
 0x11a   : > { %v282_v40 = vadd.f32 %v280_v31, %v277_v39 }
 0x11c   : > { %v289_v42 = vsel %vm285_vm1, %v282_v40, -inf }
 0x11d   : > { %290 = vmax.xlane.f32.xlu1 %v289_v42 }
 0x11f   : > { %v226_v46 = vpop.f32.mrf.mxu1 }
 0x125   : > { %v248_v49 = vpop.f32.mrf.mxu2 }
 0x126   : > { %v278_v50 = vmul.f32 0.25, %v248_v49 }
 0x128   : > { %v283_v51 = vadd.f32 %v280_v31, %v278_v50 }
 0x129   : > { %522 = vrot.lane.b32.xlu0 %v520_v26, %s882_s21 }
 0x12a   : > { %v292_v52 = vsel %vm285_vm1, %v283_v51, -inf }
 0x12b   : > { %293 = vmax.xlane.f32.xlu2 %v292_v52 }
 0x12d   : > { %v250_v53 = vpop.f32.mrf.mxu2  ;;  %v272_v54 = vpop.f32.mrf.mxu3 }
 0x12e   : > { %v279_v55 = vmul.f32 0.25, %v272_v54 }
 0x130   : > { %v284_v56 = vadd.f32 %v280_v31, %v279_v55 }
 0x132   : > { %v295_v57 = vsel %vm285_vm1, %v284_v56, -inf }
 0x133   : > { %296 = vmax.xlane.f32.xlu2 %v295_v57 }
 0x135   : > { %v274_v59 = vpop.f32.mrf.mxu3 }
 0x136   : > { %498 = vrot.lane.b32.xlu1 %v496_v25, %s881_s20 }
 0x14b   : > { %440 = vrot.lane.b32.xlu2 %v951_v21, %s881_s20 }
 0x188   : > { %v288_v61 = vpop.xlane.xlu0 %287 }
 0x189   : > { %v298_v62 = vsub.f32 %v281_v33, %v288_v61 }
 0x18b   : > { %v302_v63 = vmul.f32 1.442695, %v298_v62 }
 0x18d   : > { %839 = vpow2.f32 %v302_v63 }
 0x190   : > { %v291_v0 = vpop.xlane.xlu1 %290 }
 0x191   : > { %v299_v1 = vsub.f32 %v282_v40, %v291_v0 }
 0x193   : > { %v840_v2 = vpop.eup %839  ;;  %v304_v3 = vmul.f32 1.442695, %v299_v1 }
 0x194   : > { %v310_v4 = vsel %vm285_vm1, %v840_v2, 0.0 }
 0x195   : > { %841 = vpow2.f32 %v304_v3  ;;  %311 = vadd.xlane.f32.xlu0 %v310_v4 }
 0x19b   : > { %v842_v7 = vpop.eup %841 }
 0x19c   : > { %v313_v8 = vsel %vm285_vm1, %v842_v7, 0.0 }
 0x19d   : > { %314 = vadd.xlane.f32.xlu1 %v313_v8 }
 0x19e   : > { %v294_v9 = vpop.xlane.xlu2 %293 }
 0x19f   : > { %v300_v10 = vsub.f32 %v283_v51, %v294_v9  ;;  %v808_v51 = vld [vmem:[%s1062_s1 + $0x4] sm:$0xf] }
 0x1a1   : > { %v306_v11 = vmul.f32 1.442695, %v300_v10 }
 0x1a3   : > { %843 = vpow2.f32 %v306_v11 }
 0x1a6   : > { %v297_v12 = vpop.xlane.xlu2 %296 }
 0x1a7   : > { %v301_v13 = vsub.f32 %v284_v56, %v297_v12  ;;  %v655_v12 = vld.sshfl [vmem:[#allocation1] sm:$0xff pattern:$0x73625140] }
 0x1a8   : > { %v499_v17 = vpop.permute.xlu1 %498  ;;  %678 = vst [vmem:[#allocation1] ss:$4 sm:$0xff] %v930_v5 }
 0x1a9   : > { %v844_v14 = vpop.eup %843  ;;  %v308_v15 = vmul.f32 1.442695, %v301_v13  ;;  %435 = vrot.lane.b32.xlu0 %v945_v19, %s882_s21  ;;  %v504_v18 = vsel %vm185_vm0, %v499_v17, 0  ;;  %v523_v19 = vpop.permute.xlu0 %522 }
 0x1aa   : > { %v316_v16 = vsel %vm285_vm1, %v844_v14, 0.0  ;;  %513 = vmatpush.bf16.xpose.msra.mxu2 %v504_v18 }
 0x1ab   : > { %845 = vpow2.f32 %v308_v15  ;;  %317 = vadd.xlane.f32.xlu2 %v316_v16 }
 0x1ae   : > { %v441_v20 = vpop.permute.xlu2 %440 }
 0x1af   : > { %v446_v21 = vsel %vm185_vm0, %v441_v20, 0  ;;  %v679_v20 = vld.sshfl [vmem:[#allocation1] sm:$0xff pattern:$0x73625140] }
 0x1b0   : > { %455 = vmatpush.bf16.xpose.msra.mxu0 %v446_v21 }
 0x1b1   : > { %v846_v24 = vpop.eup %845 }
 0x1b2   : > { %v319_v25 = vsel %vm285_vm1, %v846_v24, 0.0 }
 0x1b3   : > { %320 = vadd.xlane.f32.xlu2 %v319_v25 }
 0x1b6   : > { %469 = vrot.lane.b32.xlu1 %v959_v23, %s881_s20 }
 0x1cb   : > { %464 = vrot.lane.b32.xlu2 %v956_v22, %s882_s21 }
 0x208   : > { %v312_v26 = vpop.xlane.xlu0 %311 }
 0x209   : > { %847 = vrcp.f32 %v312_v26 }
 0x20f   : > { %v848_v27 = vpop.eup %847 }
 0x210   : > { %v326_v30 = vmul.f32 %v848_v27, %v840_v2  ;;  %v315_v31 = vpop.xlane.xlu1 %314 }
 0x211   : > { %849 = vrcp.f32 %v315_v31 }
 0x212   : > { %v330_v32 = vpack.c.bf16 %v326_v30, %v326_v30 }
 0x214   : > { %800 = vmatmul.msk.bf16.vlgmr.msrb.gmra.mxu0 %vm339_vm3, %v330_v32 }
 0x217   : > { %v850_v33 = vpop.eup %849 }
 0x218   : > { %v327_v34 = vmul.f32 %v850_v33, %v842_v7 }
 0x21a   : > { %v331_v35 = vpack.c.bf16 %v327_v34, %v327_v34 }
 0x21b   : > { %v436_v36 = vpop.permute.xlu0 %435 }
 0x21c   : > { %801 = vmatmul.msk.bf16.vlgmr.msrb.gmra.mxu1 %vm339_vm3, %v331_v35 }
 0x21e   : > { %v318_v23 = vpop.xlane.xlu2 %317 }
 0x21f   : > { %851 = vrcp.f32 %v318_v23 }
 0x224   : > { %804 = vmatmul.msk.bf16.vlgmr.msra.gmra.mxu0 %vm185_vm0, %v436_v36 }
 0x225   : > { %v852_v22 = vpop.eup %851 }
 0x226   : > { %v328_v37 = vmul.f32 %v852_v22, %v844_v14  ;;  %v321_v38 = vpop.xlane.xlu2 %320 }
 0x227   : > { %853 = vrcp.f32 %v321_v38 }
 0x228   : > { %v332_v39 = vpack.c.bf16 %v328_v37, %v328_v37  ;;  %v470_v40 = vpop.permute.xlu1 %469 }
 0x229   : > { %v475_v41 = vsel %vm185_vm0, %v470_v40, 0 }
 0x22a   : > { %802 = vmatmul.msk.bf16.vlgmr.msrb.gmra.mxu2 %vm339_vm3, %v332_v39  ;;  %484 = vmatpush.bf16.xpose.msra.mxu1 %v475_v41 }
 0x22d   : > { %v854_v42 = vpop.eup %853 }
 0x22e   : > { %v329_v43 = vmul.f32 %v854_v42, %v846_v24  ;;  %v465_v44 = vpop.permute.xlu2 %464 }
 0x230   : > { %v333_v45 = vpack.c.bf16 %v329_v43, %v329_v43 }
 0x231   : > { %805 = vmatmul.msk.bf16.vlgmr.msra.gmra.mxu1 %vm185_vm0, %v465_v44 }
 0x232   : > { %803 = vmatmul.msk.bf16.vlgmr.msrb.gmra.mxu3 %vm339_vm3, %v333_v45 }
 0x23a   : > { %806 = vmatmul.msk.bf16.vlgmr.msra.gmra.mxu2 %vm185_vm0, %v494_v6 }
 0x242   : > { %807 = vmatmul.msk.bf16.vlgmr.msra.gmra.mxu3 %vm185_vm0, %v523_v19 }
 0x291   : > { %v1011_v46 = vpop.f32.mrf.mxu0 }
 0x299   : > { %v358_v47 = vpop.f32.mrf.mxu0  ;;  %v1013_v48 = vpop.f32.mrf.mxu1 }
 0x2a1   : > { %v382_v49 = vpop.f32.mrf.mxu1  ;;  %v457_v50 = vpop.f32.mrf.mxu0 }
 0x2a2   : > { %v548_v52 = vmul.f32 0.25, %v457_v50 }
 0x2a4   : > { %v554_v53 = vadd.f32 %v808_v51, %v548_v52 }
 0x2a6   : > { %v558_v54 = vsel %vm285_vm1, %v554_v53, -inf }
 0x2a7   : > { %559 = vmax.xlane.f32.xlu2 %v558_v54 }
 0x2a9   : > { %v459_v55 = vpop.f32.mrf.mxu0 }
 0x2ad   : > { %v1019_v56 = vpop.f32.mrf.mxu2 }
 0x2ae   : > { %v486_v57 = vpop.f32.mrf.mxu1 }
 0x2af   : > { %v549_v0 = vmul.f32 0.25, %v486_v57 }
 0x2b1   : > { %v555_v3 = vadd.f32 %v808_v51, %v549_v0 }
 0x2b3   : > { %v561_v9 = vsel %vm285_vm1, %v555_v3, -inf }
 0x2b5   : > { %v406_v58 = vpop.f32.mrf.mxu2  ;;  %v1021_v59 = vpop.f32.mrf.mxu3 }
 0x2b6   : > { %v488_v60 = vpop.f32.mrf.mxu1 }
 0x2bd   : > { %v430_v61 = vpop.f32.mrf.mxu3  ;;  %v515_v62 = vpop.f32.mrf.mxu2 }
 0x2be   : > { %v550_v63 = vmul.f32 0.25, %v515_v62 }
 0x2bf   : > { %657 = vrot.lane.b32.xlu2 %v655_v12, %s883_s26 }
 0x2c0   : > { %v556_v1 = vadd.f32 %v808_v51, %v550_v63 }
 0x2c2   : > { %v564_v2 = vsel %vm285_vm1, %v556_v1, -inf }
 0x2c3   : > { %565 = vmax.xlane.f32.xlu1 %v564_v2 }
 0x2c5   : > { %v517_v4 = vpop.f32.mrf.mxu2  ;;  %v544_v6 = vpop.f32.mrf.mxu3 }
 0x2c6   : > { %v551_v7 = vmul.f32 0.25, %v544_v6 }
 0x2c8   : > { %v557_v8 = vadd.f32 %v808_v51, %v551_v7 }
 0x2ca   : > { %v567_v10 = vsel %vm285_vm1, %v557_v8, -inf }
 0x2cb   : > { %568 = vmax.xlane.f32.xlu0 %v567_v10  ;;  %562 = vmax.xlane.f32.xlu1 %v561_v9 }
 0x2cd   : > { %v546_v11 = vpop.f32.mrf.mxu3 }
 0x31a   : > { %v560_v13 = vpop.xlane.xlu2 %559 }
 0x31b   : > { %v570_v14 = vsub.f32 %v554_v53, %v560_v13 }
 0x31d   : > { %v574_v15 = vmul.f32 1.442695, %v570_v14 }
 0x31f   : > { %855 = vpow2.f32 %v574_v15 }
 0x322   : > { %v658_v36 = vpop.permute.xlu2 %657 }
 0x323   : > { %v663_v22 = vsel %vm343_vm2, %v658_v36, 0 }
 0x324   : > { %672 = vmatpush.bf16.msrb.mxu2 %v663_v22 }
 0x325   : > { %v856_v16 = vpop.eup %855 }
 0x326   : > { %v582_v17 = vsel %vm285_vm1, %v856_v16, 0.0 }
 0x327   : > { %583 = vadd.xlane.f32.xlu1 %v582_v17 }
 0x336   : > { %v566_v18 = vpop.xlane.xlu1 %565 }
 0x337   : > { %v572_v30 = vsub.f32 %v556_v1, %v566_v18 }
 0x339   : > { %v578_v5 = vmul.f32 1.442695, %v572_v30 }
 0x33e   : > { %v569_v21 = vpop.xlane.xlu0 %568  ;;  %v563_v24 = vpop.xlane.xlu1 %562 }
 0x33f   : > { %v573_v25 = vsub.f32 %v557_v8, %v569_v21  ;;  %v571_v19 = vsub.f32 %v555_v3, %v563_v24 }
 0x340   : > { %681 = vrot.lane.b32.xlu1 %v679_v20, %s883_s26 }
 0x341   : > { %v580_v26 = vmul.f32 1.442695, %v573_v25  ;;  %v576_v27 = vmul.f32 1.442695, %v571_v19 }
 0x343   : > { %857 = vpow2.f32 %v580_v26 }
 0x344   : > { %859 = vpow2.f32 %v576_v27 }
 0x345   : > { %861 = vpow2.f32 %v578_v5 }
 0x349   : > { %v858_v31 = vpop.eup %857 }
 0x34a   : > { %v860_v32 = vpop.eup %859  ;;  %v591_v33 = vsel %vm285_vm1, %v858_v31, 0.0 }
 0x34b   : > { %v585_v34 = vsel %vm285_vm1, %v860_v32, 0.0  ;;  %592 = vadd.xlane.f32.xlu2 %v591_v33  ;;  %v862_v35 = vpop.eup %861 }
 0x34c   : > { %586 = vadd.xlane.f32.xlu0 %v585_v34  ;;  %v588_v23 = vsel %vm285_vm1, %v862_v35, 0.0 }
 0x354   : > { %589 = vadd.xlane.f32.xlu0 %v588_v23 }
 0x363   : > { %633 = vrot.lane.b32.xlu2 %v971_v29, %s883_s26 }
 0x368   : > { %609 = vrot.lane.b32.xlu0 %v967_v28, %s883_s26 }
 0x39a   : > { %v584_v37 = vpop.xlane.xlu1 %583 }
 0x3b2   : > { %v682_v38 = vpop.permute.xlu1 %681 }
 0x3b3   : > { %v687_v39 = vsel %vm343_vm2, %v682_v38, 0 }
 0x3b4   : > { %696 = vmatpush.bf16.msrb.mxu3 %v687_v39 }
 0x3be   : > { %v593_v40 = vpop.xlane.xlu2 %592 }
 0x3bf   : > { %v587_v41 = vpop.xlane.xlu0 %586  ;;  %863 = vrcp.f32 %v593_v40 }
 0x3c0   : > { %865 = vrcp.f32 %v587_v41 }
 0x3c5   : > { %v864_v42 = vpop.eup %863 }
 0x3c6   : > { %v866_v43 = vpop.eup %865  ;;  %v601_v44 = vmul.f32 %v864_v42, %v858_v31  ;;  %v634_v45 = vpop.permute.xlu2 %633 }
 0x3c7   : > { %v599_v47 = vmul.f32 %v866_v43, %v860_v32  ;;  %v590_v49 = vpop.xlane.xlu0 %589  ;;  %v639_v29 = vsel %vm343_vm2, %v634_v45, 0 }
 0x3c8   : > { %v605_v50 = vpack.c.bf16 %v601_v44, %v601_v44  ;;  %867 = vrcp.f32 %v590_v49  ;;  %648 = vmatpush.bf16.msrb.mxu1 %v639_v29 }
 0x3c9   : > { %v603_v28 = vpack.c.bf16 %v599_v47, %v599_v47  ;;  %869 = vrcp.f32 %v584_v37 }
 0x3ca   : > { %812 = vmatmul.msk.bf16.vlgmr.msrb.gmra.mxu3 %vm339_vm3, %v605_v50 }
 0x3cb   : > { %810 = vmatmul.msk.bf16.vlgmr.msrb.gmra.mxu1 %vm339_vm3, %v603_v28 }
 0x3ce   : > { %v868_v51 = vpop.eup %867 }
 0x3cf   : > { %v600_v52 = vmul.f32 %v868_v51, %v862_v35  ;;  %v870_v54 = vpop.eup %869 }
 0x3d0   : > { %v598_v55 = vmul.f32 %v870_v54, %v856_v16 }
 0x3d1   : > { %v604_v53 = vpack.c.bf16 %v600_v52, %v600_v52 }
 0x3d2   : > { %v602_v60 = vpack.c.bf16 %v598_v55, %v598_v55 }
 0x3d3   : > { %811 = vmatmul.msk.bf16.vlgmr.msrb.gmra.mxu2 %vm339_vm3, %v604_v53 }
 0x3da   : > { %v610_v57 = vpop.permute.xlu0 %609 }
 0x3db   : > { %v615_v58 = vsel %vm343_vm2, %v610_v57, 0 }
 0x3dc   : > { %624 = vmatpush.bf16.msrb.mxu0 %v615_v58 }
 0x3df   : > { %809 = vmatmul.msk.bf16.vlgmr.msrb.gmra.mxu0 %vm339_vm3, %v602_v60 }
 0x448   : > { %v650_v61 = vpop.f32.mrf.mxu1 }
 0x44d   : > { %v698_v62 = vpop.f32.mrf.mxu3 }
 0x450   : > { %v652_v63 = vpop.f32.mrf.mxu1 }
 0x455   : > { %v700_v0 = vpop.f32.mrf.mxu3 }
 0x456   : > { %v674_v1 = vpop.f32.mrf.mxu2 }
 0x457   : > { %v834_v2 = vpack.i.bf16 %v698_v62, %v674_v1 }
 0x459   : > { %835 = vrot.lane.b32.xlu1 %v834_v2, %s884_s27 }
 0x45c   : > { %v626_v3 = vpop.f32.mrf.mxu0 }
 0x45d   : > { %v829_v4 = vpack.i.bf16 %v650_v61, %v626_v3 }
 0x45e   : > { %v676_v6 = vpop.f32.mrf.mxu2 }
 0x45f   : > { %830 = vrot.lane.b32.xlu0 %v829_v4, %s884_s27 }
 0x464   : > { %v628_v7 = vpop.f32.mrf.mxu0 }
 0x4cb   : > { %v836_v8 = vpop.permute.xlu1 %835 }
 0x4cc   : > { %v837_v9 = vunpack.i.l.bf16 %v836_v8  ;;  %v838_v10 = vunpack.i.h.bf16 %v836_v8 }
 0x4ce   : > { %v720_v14 = vsel %vm185_vm0, %v1019_v56, %v837_v9  ;;  %v721_v17 = vsel %vm185_vm0, %v1021_v59, %v838_v10 }
 0x4cf   : > { %v724_v21 = vpack.c.bf16 %v720_v14, %v720_v14  ;;  %v725_v56 = vpack.c.bf16 %v721_v17, %v721_v17 }
 0x4d1   : > { %v831_v11 = vpop.permute.xlu0 %830  ;;  %729 = vst.msk [vmem:[%s172_s30 + $0x4] sm:$0x3] %vm726_vm4, %v724_v21 }
 0x4d2   : > { %v833_v12 = vunpack.i.h.bf16 %v831_v11  ;;  %v832_v13 = vunpack.i.l.bf16 %v831_v11  ;;  %730 = vst.msk [vmem:[%s172_s30 + $0x6] sm:$0x3] %vm726_vm4, %v725_v56 }
 0x4d4   : > { %v719_v15 = vsel %vm185_vm0, %v1013_v48, %v833_v12  ;;  %v718_v16 = vsel %vm185_vm0, %v1011_v46, %v832_v13 }
 0x4d5   : > { %v723_v18 = vpack.c.bf16 %v719_v15, %v719_v15  ;;  %v722_v20 = vpack.c.bf16 %v718_v16, %v718_v16 }
 0x4d7   : > { %727 = vst.msk [vmem:[%s172_s30] sm:$0x3] %vm726_vm4, %v722_v20 }
 0x4d8   : > { %728 = vst.msk [vmem:[%s172_s30 + $0x2] sm:$0x3] %vm726_vm4, %v723_v18 }
 0x4d9 PF: > { %s13_s12 = sadd.s32 1, %s877_s12  }
 0x4da   : > { %p10_p4 = scmp.ge.s32.totalorder %s13_s12, 4  }
 0x4dc   :  { %12 = sbr.rel (!%p10_p4) target bundleno = 1 (0x1), region = 63 }

// kernel: _lambda_.17
= control target key start
LH: loop header
LB: loop body
LE: loop exit
PB: predicated region body
PF: predicated region fallthrough
CT: control target
= control target key end

     0   :  { %vm37_vm0 = vcmask 261120   ;;  %v478_v8 = vmov 32.0   ;;  %vm153_vm10 = vcmask 257024   ;;  %s632_s0 = inlined_call_operand.vmem [shape: f32[32,32], index: 0, kind: input, shape index: {}]   ;;  %s633_s3 = inlined_call_operand.vmem [shape: f32[1,32], index: 3, kind: input, shape index: {}]   ;;  %s634_s4 = inlined_call_operand.vmem [shape: f32[1,32], index: 4, kind: input, shape index: {}]   ;;  %s635_s2 = inlined_call_operand.vmem [shape: f32[1,128], index: 2, kind: input, shape index: {}]   ;;  %s636_s1 = inlined_call_operand.vmem [shape: bf16[32,128], index: 1, kind: input, shape index: {}]   ;;  %s637_s5 = inlined_call_operand.vmem [shape: bf16[32,128], index: 5, kind: output, shape index: {}]  }
   0x1   :  { %v35_v0 = vld [vmem:[%s632_s0 + $0x10] sm:$0xff]  ;;  %v33_v1 = vld [vmem:[%s632_s0] sm:$0xff]  ;;  %v36_v4 = vld [vmem:[%s632_s0 + $0x18] sm:$0xff]  ;;  %452 = vrcp.f32 %v478_v8 }
   0x2   :  { %v44_v2 = vsel %vm37_vm0, %v35_v0, 0.0  ;;  %v38_v3 = vsel %vm37_vm0, %v33_v1, 0.0  ;;  %v34_v5 = vld [vmem:[%s632_s0 + $0x8] sm:$0xff]  ;;  %v47_v6 = vsel %vm37_vm0, %v36_v4, 0.0  ;;  %v433_v46 = vld [vmem:[%s636_s1] sm:$0xff] }
   0x3   :  { %45 = vadd.xlane.f32.xlu1 %v44_v2  ;;  %39 = vadd.xlane.f32.xlu0 %v38_v3  ;;  %v41_v7 = vsel %vm37_vm0, %v34_v5, 0.0  ;;  %v434_v43 = vld [vmem:[%s636_s1 + $0x8] sm:$0xff]  ;;  %v449_v63 = vld [vmem:[%s633_s3] ss:$0 sm:$0xff] }
   0x4   :  { %205 = vmatpush.bf16.msra.mxu0 %v434_v43  ;;  %446 = vmatpush.bf16.msra.mxu1 %v434_v43 }
   0x7   :  { %v453_v9 = vpop.eup %452 }
   0x8   :  { %v51_v10 = vmul.f32 32.0, %v453_v9  ;;  %vm55_vm1 = vweird.f32 %v453_v9  ;;  %206 = vmatpush.bf16.msra.mxu0 %v433_v46  ;;  %447 = vmatpush.bf16.msra.mxu1 %v433_v46 }
   0xa   :  { %v52_v11 = vsub.f32 1.0, %v51_v10 }
   0xb   :  { %48 = vadd.xlane.f32.xlu1 %v47_v6  ;;  %42 = vadd.xlane.f32.xlu0 %v41_v7 }
   0xc   :  { %v53_v12 = vmul.f32 %v453_v9, %v52_v11 }
   0xe   :  { %v54_v13 = vadd.f32 %v453_v9, %v53_v12 }
  0x10   :  { %v56_v14 = vsel %vm55_vm1, %v453_v9, %v54_v13 }
  0x76   :  { %v46_v15 = vpop.xlane.xlu1 %45  ;;  %v40_v16 = vpop.xlane.xlu0 %39 }
  0x77   :  { %v59_v17 = vmul.f32 %v56_v14, %v46_v15  ;;  %v57_v18 = vmul.f32 %v56_v14, %v40_v16 }
  0x79   :  { %v525_v19 = vsub.f32 %v35_v0, %v59_v17  ;;  %v527_v20 = vsub.f32 %v33_v1, %v57_v18 }
  0x7b   :  { %v67_v21 = vmul.f32 %v525_v19, %v525_v19  ;;  %v65_v22 = vmul.f32 %v527_v20, %v527_v20 }
  0x7d   :  { %v75_v23 = vsel %vm37_vm0, %v67_v21, 0.0  ;;  %v69_v24 = vsel %vm37_vm0, %v65_v22, 0.0 }
  0x7e   :  { %v49_v25 = vpop.xlane.xlu1 %48  ;;  %76 = vadd.xlane.f32.xlu0 %v75_v23  ;;  %70 = vadd.xlane.f32.xlu2 %v69_v24  ;;  %v43_v26 = vpop.xlane.xlu0 %42 }
  0x7f   :  { %v60_v27 = vmul.f32 %v56_v14, %v49_v25  ;;  %v58_v28 = vmul.f32 %v56_v14, %v43_v26 }
  0x81   :  { %v535_v29 = vsub.f32 %v36_v4, %v60_v27  ;;  %v537_v30 = vsub.f32 %v34_v5, %v58_v28  ;;  %v450_v4 = vld [vmem:[%s634_s4] ss:$0 sm:$0xff] }
  0x83   :  { %v68_v31 = vmul.f32 %v535_v29, %v535_v29  ;;  %v66_v32 = vmul.f32 %v537_v30, %v537_v30 }
  0x85   :  { %v78_v33 = vsel %vm37_vm0, %v68_v31, 0.0  ;;  %v72_v34 = vsel %vm37_vm0, %v66_v32, 0.0 }
  0x86   :  { %79 = vadd.xlane.f32.xlu1 %v78_v33  ;;  %73 = vadd.xlane.f32.xlu2 %v72_v34 }
  0xf1   :  { %v71_v35 = vpop.xlane.xlu2 %70  ;;  %v77_v36 = vpop.xlane.xlu0 %76 }
  0xf2   :  { %v81_v37 = vmul.f32 %v71_v35, %v56_v14  ;;  %v83_v38 = vmul.f32 %v77_v36, %v56_v14 }
  0xf4   :  { %v85_v39 = vadd.f32 1e-05, %v81_v37  ;;  %v87_v40 = vadd.f32 1e-05, %v83_v38 }
  0xf6   :  { %454 = vrsqrt.f32 %v85_v39  ;;  %vm95_vm4 = vweird.f32 %v85_v39  ;;  %vm115_vm6 = vweird.f32 %v87_v40 }
  0xf7   :  { %456 = vrsqrt.f32 %v87_v40 }
  0xf9   :  { %v80_v41 = vpop.xlane.xlu1 %79  ;;  %v74_v42 = vpop.xlane.xlu2 %73 }
  0xfa   :  { %v84_v44 = vmul.f32 %v80_v41, %v56_v14  ;;  %v82_v45 = vmul.f32 %v74_v42, %v56_v14 }
  0xfc   :  { %v455_v47 = vpop.eup %454  ;;  %v88_v48 = vadd.f32 1e-05, %v84_v44  ;;  %v86_v49 = vadd.f32 1e-05, %v82_v45 }
  0xfd   :  { %v457_v50 = vpop.eup %456  ;;  %v90_v51 = vmul.f32 %v455_v47, %v85_v39  ;;  %vm96_vm2 = vweird.f32 %v455_v47 }
  0xfe   :  { %v110_v52 = vmul.f32 %v457_v50, %v87_v40  ;;  %458 = vrsqrt.f32 %v88_v48  ;;  %vm116_vm3 = vweird.f32 %v457_v50  ;;  %vm97_vm5 = vmor %vm95_vm4, %vm96_vm2  ;;  %vm125_vm11 = vweird.f32 %v88_v48 }
  0xff   :  { %v91_v53 = vmul.f32 %v455_v47, %v90_v51  ;;  %460 = vrsqrt.f32 %v86_v49  ;;  %vm117_vm7 = vmor %vm115_vm6, %vm116_vm3  ;;  %vm105_vm13 = vweird.f32 %v86_v49 }
 0x100   :  { %v111_v54 = vmul.f32 %v457_v50, %v110_v52 }
 0x101   :  { %v92_v55 = vmul.f32 0.5, %v91_v53 }
 0x102   :  { %v112_v56 = vmul.f32 0.5, %v111_v54 }
 0x103   :  { %v93_v57 = vsub.f32 1.5, %v92_v55 }
 0x104   :  { %v459_v58 = vpop.eup %458  ;;  %v113_v59 = vsub.f32 1.5, %v112_v56 }
 0x105   :  { %v461_v60 = vpop.eup %460  ;;  %v94_v61 = vmul.f32 %v455_v47, %v93_v57  ;;  %v120_v62 = vmul.f32 %v459_v58, %v88_v48  ;;  %vm126_vm8 = vweird.f32 %v459_v58 }
 0x106   :  { %v114_v0 = vmul.f32 %v457_v50, %v113_v59  ;;  %v100_v1 = vmul.f32 %v461_v60, %v86_v49  ;;  %vm106_vm9 = vweird.f32 %v461_v60  ;;  %vm127_vm12 = vmor %vm125_vm11, %vm126_vm8 }
 0x107   :  { %v98_v2 = vsel %vm97_vm5, %v455_v47, %v94_v61  ;;  %v121_v3 = vmul.f32 %v459_v58, %v120_v62  ;;  %vm107_vm14 = vmor %vm105_vm13, %vm106_vm9 }
 0x108   :  { %v129_v5 = vmul.f32 %v98_v2, %v527_v20  ;;  %v118_v6 = vsel %vm117_vm7, %v457_v50, %v114_v0  ;;  %v101_v7 = vmul.f32 %v461_v60, %v100_v1 }
 0x109   :  { %v131_v8 = vmul.f32 %v118_v6, %v525_v19  ;;  %v122_v9 = vmul.f32 0.5, %v121_v3 }
 0x10a   :  { %v137_v10 = vmul.f32 %v449_v63, %v129_v5  ;;  %v102_v11 = vmul.f32 0.5, %v101_v7 }
 0x10b   :  { %v139_v12 = vmul.f32 %v449_v63, %v131_v8  ;;  %v123_v13 = vsub.f32 1.5, %v122_v9 }
 0x10c   :  { %v145_v14 = vadd.f32 %v450_v4, %v137_v10  ;;  %v103_v15 = vsub.f32 1.5, %v102_v11 }
 0x10d   :  { %v147_v16 = vadd.f32 %v450_v4, %v139_v12  ;;  %v124_v17 = vmul.f32 %v459_v58, %v123_v13 }
 0x10e   :  { %v149_v18 = vpack.c.bf16 %v145_v14, %v145_v14  ;;  %v104_v20 = vmul.f32 %v461_v60, %v103_v15 }
 0x10f   :  { %v151_v21 = vpack.c.bf16 %v147_v16, %v147_v16  ;;  %v128_v22 = vsel %vm127_vm12, %v459_v58, %v124_v17 }
 0x110   :  { %154 = vst.msk [vmem:[#allocation3] sm:$0xf] %vm153_vm10, %v149_v18  ;;  %v132_v19 = vmul.f32 %v128_v22, %v535_v29  ;;  %v108_v23 = vsel %vm107_vm14, %v461_v60, %v104_v20  ;;  %v451_v29 = vld [vmem:[%s635_s2] ss:$0 sm:$0xff] }
 0x111   :  { %156 = vst.msk [vmem:[#allocation3 + $0x8] sm:$0xf] %vm153_vm10, %v151_v21  ;;  %v130_v24 = vmul.f32 %v108_v23, %v537_v30 }
 0x112   :  { %v140_v25 = vmul.f32 %v449_v63, %v132_v19 }
 0x113   :  { %v138_v26 = vmul.f32 %v449_v63, %v130_v24 }
 0x114   :  { %v148_v27 = vadd.f32 %v450_v4, %v140_v25 }
 0x115   :  { %v146_v28 = vadd.f32 %v450_v4, %v138_v26 }
 0x116   :  { %v152_v31 = vpack.c.bf16 %v148_v27, %v148_v27 }
 0x117   :  { %v150_v32 = vpack.c.bf16 %v146_v28, %v146_v28 }
 0x118   :  { %157 = vst.msk [vmem:[#allocation3 + $0xc] sm:$0xf] %vm153_vm10, %v152_v31 }
 0x119   :  { %155 = vst.msk [vmem:[#allocation3 + $0x4] sm:$0xf] %vm153_vm10, %v150_v32 }
 0x11f   :  { %v432_v33 = vld [vmem:[#allocation3 + $0x8] sm:$0xff] }
 0x120   :  { %v431_v34 = vld [vmem:[#allocation3] sm:$0xff]  ;;  %430 = vmatmul.msk.bf16.vlgmr.msra.gmra.mxu1 %vm37_vm0, %v432_v33 }
 0x121   :  { %429 = vmatmul.msk.bf16.vlgmr.msra.gmra.mxu0 %vm37_vm0, %v431_v34 }
 0x19d   :  { %v213_v30 = vpop.f32.mrf.mxu1 }
 0x19e   :  { %v208_v35 = vpop.f32.mrf.mxu0  ;;  %v570_v36 = vadd.f32 %v451_v29, %v213_v30 }
 0x19f   :  { %v572_v37 = vadd.f32 %v451_v29, %v208_v35 }
 0x1a0   :  { %v575_v38 = vmul.f32 0.70710677, %v570_v36 }
 0x1a1   :  { %v578_v39 = vmul.f32 0.70710677, %v572_v37 }
 0x1a2   :  { %v251_v40 = vand.u32 2147483647, %v575_v38 }
 0x1a3   :  { %v249_v41 = vand.u32 2147483647, %v578_v39 }
 0x1a4   :  { %v255_v42 = vmul.f32 0.3275911, %v251_v40  ;;  %v359_v62 = vsub.f32 0.0, %v251_v40 }
 0x1a5   :  { %v253_v43 = vmul.f32 0.3275911, %v249_v41  ;;  %v215_v44 = vpop.f32.mrf.mxu1  ;;  %v357_v60 = vsub.f32 0.0, %v249_v41 }
 0x1a6   :  { %v259_v45 = vadd.f32 1.0, %v255_v42  ;;  %v210_v46 = vpop.f32.mrf.mxu0  ;;  %v584_v49 = vadd.f32 %v451_v29, %v215_v44  ;;  %v363_v16 = vmul.f32 %v359_v62, %v251_v40 }
 0x1a7   :  { %v257_v47 = vadd.f32 1.0, %v253_v43  ;;  %v582_v48 = vadd.f32 %v451_v29, %v210_v46  ;;  %v361_v12 = vmul.f32 %v357_v60, %v249_v41 }
 0x1a8   :  { %462 = vrcp.f32 %v259_v45  ;;  %v590_v51 = vmul.f32 0.70710677, %v584_v49  ;;  %v300_v1 = vand.u32 2147483647, %v259_v45  ;;  %v302_v2 = vand.u32 2147483648, %v259_v45 }
 0x1a9   :  { %464 = vrcp.f32 %v257_v47  ;;  %v587_v50 = vmul.f32 0.70710677, %v582_v48  ;;  %v272_v4 = vand.u32 2147483648, %v257_v47  ;;  %v270_v7 = vand.u32 2147483647, %v257_v47 }
 0x1aa   :  { %v596_v54 = vand.u32 2147483647, %v590_v51  ;;  %vm296_vm1 = vweird.f32 %v259_v45  ;;  %vm266_vm2 = vweird.f32 %v257_v47  ;;  %v303_v10 = vor.u32 1.1754944e-38, %v302_v2 }
 0x1ab   :  { %v593_v52 = vand.u32 2147483647, %v587_v50  ;;  %v273_v11 = vor.u32 1.1754944e-38, %v272_v4  ;;  %vm301_vm5 = vcmp.eq.f32.partialorder %v300_v1, 8.507059e+37  ;;  %vm271_vm6 = vcmp.eq.f32.partialorder %v270_v7, 8.507059e+37 }
 0x1ac   :  { %v256_v59 = vmul.f32 0.3275911, %v596_v54  ;;  %v365_v23 = vmul.f32 1.442695, %v361_v12  ;;  %v369_v27 = vmul.f32 1.442695, %v363_v16 }
 0x1ad   :  { %v254_v57 = vmul.f32 0.3275911, %v593_v52 }
 0x1ae   :  { %v463_v53 = vpop.eup %462  ;;  %v602_v3 = vadd.f32 1.0, %v256_v59 }
 0x1af   :  { %v465_v55 = vpop.eup %464  ;;  %v292_v56 = vmul.f32 %v463_v53, %v259_v45  ;;  %v600_v63 = vadd.f32 1.0, %v254_v57  ;;  %vm297_vm15 = vweird.f32 %v463_v53  ;;  %v358_v45 = vsub.f32 0.0, %v593_v52 }
 0x1b0   :  { %v262_v58 = vmul.f32 %v465_v55, %v257_v47  ;;  %vm267_vm0 = vweird.f32 %v465_v55  ;;  %vm298_vm3 = vmor %vm296_vm1, %vm297_vm15  ;;  %v317_v35 = vand.u32 2147483648, %v602_v3  ;;  %v315_v42 = vand.u32 2147483647, %v602_v3 }
 0x1b1   :  { %v293_v61 = vsub.f32 1.0, %v292_v56  ;;  %466 = vrcp.f32 %v600_v63  ;;  %vm268_vm4 = vmor %vm266_vm2, %vm267_vm0  ;;  %v285_v32 = vand.u32 2147483647, %v600_v63  ;;  %v287_v33 = vand.u32 2147483648, %v600_v63 }
 0x1b2   :  { %v263_v0 = vsub.f32 1.0, %v262_v58  ;;  %468 = vrcp.f32 %v602_v3  ;;  %vm281_vm9 = vweird.f32 %v600_v63  ;;  %vm311_vm11 = vweird.f32 %v602_v3 }
 0x1b3   :  { %v294_v5 = vmul.f32 %v463_v53, %v293_v61  ;;  %v288_v47 = vor.u32 1.1754944e-38, %v287_v33  ;;  %vm286_vm12 = vcmp.eq.f32.partialorder %v285_v32, 8.507059e+37  ;;  %v318_v57 = vor.u32 1.1754944e-38, %v317_v35 }
 0x1b4   :  { %v264_v6 = vmul.f32 %v465_v55, %v263_v0  ;;  %vm316_vm14 = vcmp.eq.f32.partialorder %v315_v42, 8.507059e+37  ;;  %v360_v0 = vsub.f32 0.0, %v596_v54  ;;  %470 = vpow2.f32 %v365_v23 }
 0x1b5   :  { %v295_v8 = vadd.f32 %v463_v53, %v294_v5  ;;  %472 = vpow2.f32 %v369_v27  ;;  %vm381_vm15 = vcmp.ge.f32.partialorder %v578_v39, 0.0  ;;  %vm383_vm0 = vcmp.ge.f32.partialorder %v575_v38, 0.0 }
 0x1b6   :  { %v265_v9 = vadd.f32 %v465_v55, %v264_v6  ;;  %v362_v6 = vmul.f32 %v358_v45, %v593_v52  ;;  %vm382_vm1 = vcmp.ge.f32.partialorder %v587_v50, 0.0  ;;  %vm384_vm2 = vcmp.ge.f32.partialorder %v590_v51, 0.0 }
 0x1b7   :  { %v299_v13 = vsel %vm298_vm3, %v463_v53, %v295_v8  ;;  %v467_v17 = vpop.eup %466  ;;  %v242_v39 = vmul.f32 0.5, %v582_v48  ;;  %v243_v38 = vmul.f32 0.5, %v570_v36 }
 0x1b8   :  { %v269_v14 = vsel %vm268_vm4, %v465_v55, %v265_v9  ;;  %v304_v15 = vsel %vm301_vm5, %v303_v10, %v299_v13  ;;  %v469_v21 = vpop.eup %468  ;;  %v277_v19 = vmul.f32 %v467_v17, %v600_v63  ;;  %vm282_vm7 = vweird.f32 %v467_v17 }
 0x1b9   :  { %v274_v18 = vsel %vm271_vm6, %v273_v11, %v269_v14  ;;  %v323_v20 = vmul.f32 1.0614054, %v304_v15  ;;  %v307_v25 = vmul.f32 %v469_v21, %v602_v3  ;;  %vm312_vm8 = vweird.f32 %v469_v21  ;;  %vm283_vm10 = vmor %vm281_vm9, %vm282_vm7 }
 0x1ba   :  { %v321_v22 = vmul.f32 1.0614054, %v274_v18  ;;  %v278_v28 = vsub.f32 1.0, %v277_v19  ;;  %vm313_vm13 = vmor %vm311_vm11, %vm312_vm8  ;;  %v364_v10 = vmul.f32 %v360_v0, %v596_v54  ;;  %v471_v16 = vpop.eup %470 }
 0x1bb   :  { %v327_v24 = vadd.f32 -1.4531521, %v323_v20  ;;  %v308_v34 = vsub.f32 1.0, %v307_v25 }
 0x1bc   :  { %v325_v26 = vadd.f32 -1.4531521, %v321_v22  ;;  %v279_v30 = vmul.f32 %v467_v17, %v278_v28  ;;  %v371_v23 = vmul.f32 1.442695, %v364_v10 }
 0x1bd   :  { %v331_v31 = vmul.f32 %v327_v24, %v304_v15  ;;  %v309_v41 = vmul.f32 %v469_v21, %v308_v34 }
 0x1be   :  { %v329_v29 = vmul.f32 %v325_v26, %v274_v18  ;;  %v280_v44 = vadd.f32 %v467_v17, %v279_v30 }
 0x1bf   :  { %v335_v40 = vadd.f32 1.4214138, %v331_v31  ;;  %v310_v53 = vadd.f32 %v469_v21, %v309_v41 }
 0x1c0   :  { %v333_v43 = vadd.f32 1.4214138, %v329_v29  ;;  %v284_v56 = vsel %vm283_vm10, %v467_v17, %v280_v44  ;;  %v367_v17 = vmul.f32 1.442695, %v362_v6 }
 0x1c1   :  { %v339_v46 = vmul.f32 %v335_v40, %v304_v15  ;;  %v289_v59 = vsel %vm286_vm12, %v288_v47, %v284_v56  ;;  %v314_v60 = vsel %vm313_vm13, %v469_v21, %v310_v53  ;;  %v473_v21 = vpop.eup %472 }
 0x1c2   :  { %v337_v55 = vmul.f32 %v333_v43, %v274_v18  ;;  %v322_v62 = vmul.f32 1.0614054, %v289_v59  ;;  %v319_v63 = vsel %vm316_vm14, %v318_v57, %v314_v60  ;;  %474 = vpow2.f32 %v367_v17 }
 0x1c3   :  { %v343_v58 = vadd.f32 -0.28449672, %v339_v46  ;;  %v324_v2 = vmul.f32 1.0614054, %v319_v63  ;;  %476 = vpow2.f32 %v371_v23  ;;  %v241_v57 = vmul.f32 0.5, %v572_v37 }
 0x1c4   :  { %v341_v61 = vadd.f32 -0.28449672, %v337_v55  ;;  %v326_v3 = vadd.f32 -1.4531521, %v322_v62  ;;  %v244_v60 = vmul.f32 0.5, %v584_v49 }
 0x1c5   :  { %v347_v1 = vmul.f32 %v343_v58, %v304_v15  ;;  %v328_v7 = vadd.f32 -1.4531521, %v324_v2 }
 0x1c6   :  { %v345_v4 = vmul.f32 %v341_v61, %v274_v18  ;;  %v330_v9 = vmul.f32 %v326_v3, %v289_v59 }
 0x1c7   :  { %v351_v5 = vadd.f32 0.2548296, %v347_v1  ;;  %v332_v12 = vmul.f32 %v328_v7, %v319_v63 }
 0x1c8   :  { %v349_v8 = vadd.f32 0.2548296, %v345_v4  ;;  %v334_v14 = vadd.f32 1.4214138, %v330_v9  ;;  %v475_v34 = vpop.eup %474 }
 0x1c9   :  { %v355_v11 = vmul.f32 %v351_v5, %v304_v15  ;;  %v336_v20 = vadd.f32 1.4214138, %v332_v12  ;;  %v477_v35 = vpop.eup %476 }
 0x1ca   :  { %v353_v13 = vmul.f32 %v349_v8, %v274_v18  ;;  %v338_v19 = vmul.f32 %v334_v14, %v289_v59 }
 0x1cb   :  { %v375_v24 = vmul.f32 %v473_v21, %v355_v11  ;;  %v340_v25 = vmul.f32 %v336_v20, %v319_v63 }
 0x1cc   :  { %v373_v22 = vmul.f32 %v471_v16, %v353_v13  ;;  %v342_v26 = vadd.f32 -0.28449672, %v338_v19 }
 0x1cd   :  { %v344_v52 = vadd.f32 -0.28449672, %v340_v25  ;;  %v379_v54 = vsub.f32 1.0, %v375_v24 }
 0x1ce   :  { %v377_v27 = vsub.f32 1.0, %v373_v22  ;;  %v346_v28 = vmul.f32 %v342_v26, %v289_v59 }
 0x1cf   :  { %v348_v15 = vmul.f32 %v344_v52, %v319_v63  ;;  %v387_v29 = vsub.f32 0.0, %v379_v54 }
 0x1d0   :  { %v350_v31 = vadd.f32 0.2548296, %v346_v28  ;;  %v385_v32 = vsub.f32 0.0, %v377_v27 }
 0x1d1   :  { %v352_v18 = vadd.f32 0.2548296, %v348_v15  ;;  %v391_v44 = vsel %vm383_vm0, %v379_v54, %v387_v29 }
 0x1d2   :  { %v354_v33 = vmul.f32 %v350_v31, %v289_v59  ;;  %v389_v42 = vsel %vm381_vm15, %v377_v27, %v385_v32  ;;  %v395_v55 = vadd.f32 1.0, %v391_v44 }
 0x1d3   :  { %v356_v30 = vmul.f32 %v352_v18, %v319_v63  ;;  %v393_v47 = vadd.f32 1.0, %v389_v42 }
 0x1d4   :  { %v374_v40 = vmul.f32 %v475_v34, %v354_v33  ;;  %v399_v0 = vmul.f32 %v395_v55, %v243_v38 }
 0x1d5   :  { %v376_v41 = vmul.f32 %v477_v35, %v356_v30  ;;  %v397_v62 = vmul.f32 %v393_v47, %v241_v57 }
 0x1d6   :  { %v378_v43 = vsub.f32 1.0, %v374_v40 }
 0x1d7   :  { %v380_v45 = vsub.f32 1.0, %v376_v41 }
 0x1d8   :  { %v386_v46 = vsub.f32 0.0, %v378_v43 }
 0x1d9   :  { %v388_v53 = vsub.f32 0.0, %v380_v45 }
 0x1da   :  { %v390_v56 = vsel %vm382_vm1, %v378_v43, %v386_v46 }
 0x1db   :  { %v394_v58 = vadd.f32 1.0, %v390_v56  ;;  %v392_v59 = vsel %vm384_vm2, %v380_v45, %v388_v53 }
 0x1dc   :  { %v396_v61 = vadd.f32 1.0, %v392_v59 }
 0x1dd   :  { %v398_v63 = vmul.f32 %v394_v58, %v242_v39 }
 0x1de   :  { %v400_v50 = vmul.f32 %v396_v61, %v244_v60 }
 0x1df   :  { %v438_v1 = vpack.c.bf16 %v398_v63, %v397_v62 }
 0x1e0   :  { %v443_v2 = vpack.c.bf16 %v400_v50, %v399_v0 }
 0x1e1   :  { %439 = vst [vmem:[%s637_s5] sm:$0xff] %v438_v1  }
 0x1e2   :  { %445 = vst [vmem:[%s637_s5 + $0x8] sm:$0xff] %v443_v2  }

// kernel: _lambda_.18
= control target key start
LH: loop header
LB: loop body
LE: loop exit
PB: predicated region body
PF: predicated region fallthrough
CT: control target
= control target key end

     0   :  { %s308_s1 = inlined_call_operand.vmem [shape: bf16[128,128], index: 1, kind: input, shape index: {}]   ;;  %s309_s2 = inlined_call_operand.vmem [shape: f32[1,128], index: 2, kind: input, shape index: {}]   ;;  %s310_s0 = inlined_call_operand.vmem [shape: bf16[32,128], index: 0, kind: input, shape index: {}]   ;;  %s311_s3 = inlined_call_operand.vmem [shape: f32[32,128], index: 3, kind: input, shape index: {}]   ;;  %s312_s4 = inlined_call_operand.vmem [shape: f32[32,128], index: 4, kind: output, shape index: {}]  }
   0x1   :  { %v216_v0 = vld [vmem:[%s308_s1 + $0x38] sm:$0xff]  ;;  %v215_v1 = vld [vmem:[%s308_s1 + $0x30] sm:$0xff]  ;;  %v214_v2 = vld [vmem:[%s308_s1 + $0x28] sm:$0xff] }
   0x2   :  { %109 = vmatpush.bf16.msra.mxu0 %v216_v0  ;;  %217 = vmatpush.bf16.msra.mxu1 %v216_v0  ;;  %v213_v3 = vld [vmem:[%s308_s1 + $0x20] sm:$0xff]  ;;  %v212_v4 = vld [vmem:[%s308_s1 + $0x18] sm:$0xff]  ;;  %v211_v5 = vld [vmem:[%s308_s1 + $0x10] sm:$0xff] }
   0x3   :  { %v210_v6 = vld [vmem:[%s308_s1 + $0x8] sm:$0xff]  ;;  %v209_v7 = vld [vmem:[%s308_s1] sm:$0xff]  ;;  %v153_v14 = vld [vmem:[%s311_s3 + $0x10] sm:$0xff] }
   0x4   :  { %v207_v8 = vld [vmem:[%s310_s0] sm:$0xff]  ;;  %v208_v9 = vld [vmem:[%s310_s0 + $0x8] sm:$0xff]  ;;  %v154_v22 = vld [vmem:[%s311_s3 + $0x18] sm:$0xff] }
   0x5   :  { %v225_v10 = vld [vmem:[%s309_s2] ss:$0 sm:$0xff]  ;;  %v152_v20 = vld [vmem:[%s311_s3 + $0x8] sm:$0xff] }
   0x6   :  { %110 = vmatpush.bf16.msra.mxu0 %v215_v1  ;;  %218 = vmatpush.bf16.msra.mxu1 %v215_v1  ;;  %v151_v12 = vld [vmem:[%s311_s3] sm:$0xff] }
   0xa   :  { %111 = vmatpush.bf16.msra.mxu0 %v214_v2  ;;  %219 = vmatpush.bf16.msra.mxu1 %v214_v2 }
   0xe   :  { %112 = vmatpush.bf16.msra.mxu0 %v213_v3  ;;  %220 = vmatpush.bf16.msra.mxu1 %v213_v3 }
  0x12   :  { %113 = vmatpush.bf16.msra.mxu0 %v212_v4  ;;  %221 = vmatpush.bf16.msra.mxu1 %v212_v4 }
  0x16   :  { %114 = vmatpush.bf16.msra.mxu0 %v211_v5  ;;  %222 = vmatpush.bf16.msra.mxu1 %v211_v5 }
  0x1a   :  { %115 = vmatpush.bf16.msra.mxu0 %v210_v6  ;;  %223 = vmatpush.bf16.msra.mxu1 %v210_v6 }
  0x1e   :  { %116 = vmatpush.bf16.msra.mxu0 %v209_v7  ;;  %224 = vmatpush.bf16.msra.mxu1 %v209_v7 }
  0x21   :  { %117 = vmatmul.bf16.vlgmr.msra.gmra.mxu0 %v207_v8  ;;  %122 = vmatmul.bf16.vlgmr.msra.gmra.mxu1 %v208_v9 }
  0x9e   :  { %v118_v11 = vpop.f32.mrf.mxu0  ;;  %v123_v13 = vpop.f32.mrf.mxu1 }
  0x9f   :  { %v147_v15 = vadd.f32 %v225_v10, %v118_v11  ;;  %v149_v16 = vadd.f32 %v225_v10, %v123_v13 }
  0xa1   :  { %v155_v17 = vadd.f32 %v151_v12, %v147_v15  ;;  %v157_v18 = vadd.f32 %v153_v14, %v149_v16 }
  0xa3   :  { %159 = vst [vmem:[%s312_s4] sm:$0xff] %v155_v17 }
  0xa4   :  { %161 = vst [vmem:[%s312_s4 + $0x10] sm:$0xff] %v157_v18 }
  0xa6   :  { %v120_v19 = vpop.f32.mrf.mxu0  ;;  %v125_v21 = vpop.f32.mrf.mxu1 }
  0xa7   :  { %v148_v23 = vadd.f32 %v225_v10, %v120_v19  ;;  %v150_v24 = vadd.f32 %v225_v10, %v125_v21 }
  0xa9   :  { %v156_v25 = vadd.f32 %v152_v20, %v148_v23  ;;  %v158_v26 = vadd.f32 %v154_v22, %v150_v24 }
  0xab   :  { %160 = vst [vmem:[%s312_s4 + $0x8] sm:$0xff] %v156_v25 }
  0xac   :  { %162 = vst [vmem:[%s312_s4 + $0x18] sm:$0xff] %v158_v26 }

// kernel: _lambda_.19
= control target key start
LH: loop header
LB: loop body
LE: loop exit
PB: predicated region body
PF: predicated region fallthrough
CT: control target
= control target key end

     0   :  { %vm37_vm0 = vcmask 261120   ;;  %v302_v8 = vmov 32.0   ;;  %vm153_vm10 = vcmask 257024   ;;  %s400_s0 = inlined_call_operand.vmem [shape: f32[32,32], index: 0, kind: input, shape index: {}]   ;;  %s401_s3 = inlined_call_operand.vmem [shape: f32[1,32], index: 3, kind: input, shape index: {}]   ;;  %s402_s4 = inlined_call_operand.vmem [shape: f32[1,32], index: 4, kind: input, shape index: {}]   ;;  %s403_s2 = inlined_call_operand.vmem [shape: f32[1,128], index: 2, kind: input, shape index: {}]   ;;  %s404_s1 = inlined_call_operand.vmem [shape: bf16[32,128], index: 1, kind: input, shape index: {}]   ;;  %s405_s5 = inlined_call_operand.vmem [shape: bf16[32,128], index: 5, kind: output, shape index: {}]  }
   0x1   :  { %v35_v0 = vld [vmem:[%s400_s0 + $0x10] sm:$0xff]  ;;  %v33_v1 = vld [vmem:[%s400_s0] sm:$0xff]  ;;  %v36_v4 = vld [vmem:[%s400_s0 + $0x18] sm:$0xff]  ;;  %292 = vrcp.f32 %v302_v8 }
   0x2   :  { %v44_v2 = vsel %vm37_vm0, %v35_v0, 0.0  ;;  %v38_v3 = vsel %vm37_vm0, %v33_v1, 0.0  ;;  %v34_v5 = vld [vmem:[%s400_s0 + $0x8] sm:$0xff]  ;;  %v47_v6 = vsel %vm37_vm0, %v36_v4, 0.0  ;;  %v273_v46 = vld [vmem:[%s404_s1] sm:$0xff] }
   0x3   :  { %45 = vadd.xlane.f32.xlu1 %v44_v2  ;;  %39 = vadd.xlane.f32.xlu0 %v38_v3  ;;  %v41_v7 = vsel %vm37_vm0, %v34_v5, 0.0  ;;  %v274_v43 = vld [vmem:[%s404_s1 + $0x8] sm:$0xff]  ;;  %v289_v63 = vld [vmem:[%s401_s3] ss:$0 sm:$0xff] }
   0x4   :  { %205 = vmatpush.bf16.msra.mxu0 %v274_v43  ;;  %286 = vmatpush.bf16.msra.mxu1 %v274_v43 }
   0x7   :  { %v293_v9 = vpop.eup %292 }
   0x8   :  { %v51_v10 = vmul.f32 32.0, %v293_v9  ;;  %vm55_vm1 = vweird.f32 %v293_v9  ;;  %206 = vmatpush.bf16.msra.mxu0 %v273_v46  ;;  %287 = vmatpush.bf16.msra.mxu1 %v273_v46 }
   0xa   :  { %v52_v11 = vsub.f32 1.0, %v51_v10 }
   0xb   :  { %48 = vadd.xlane.f32.xlu1 %v47_v6  ;;  %42 = vadd.xlane.f32.xlu0 %v41_v7 }
   0xc   :  { %v53_v12 = vmul.f32 %v293_v9, %v52_v11 }
   0xe   :  { %v54_v13 = vadd.f32 %v293_v9, %v53_v12 }
  0x10   :  { %v56_v14 = vsel %vm55_vm1, %v293_v9, %v54_v13 }
  0x76   :  { %v46_v15 = vpop.xlane.xlu1 %45  ;;  %v40_v16 = vpop.xlane.xlu0 %39 }
  0x77   :  { %v59_v17 = vmul.f32 %v56_v14, %v46_v15  ;;  %v57_v18 = vmul.f32 %v56_v14, %v40_v16 }
  0x79   :  { %v349_v19 = vsub.f32 %v35_v0, %v59_v17  ;;  %v351_v20 = vsub.f32 %v33_v1, %v57_v18 }
  0x7b   :  { %v67_v21 = vmul.f32 %v349_v19, %v349_v19  ;;  %v65_v22 = vmul.f32 %v351_v20, %v351_v20 }
  0x7d   :  { %v75_v23 = vsel %vm37_vm0, %v67_v21, 0.0  ;;  %v69_v24 = vsel %vm37_vm0, %v65_v22, 0.0 }
  0x7e   :  { %v49_v25 = vpop.xlane.xlu1 %48  ;;  %76 = vadd.xlane.f32.xlu0 %v75_v23  ;;  %70 = vadd.xlane.f32.xlu2 %v69_v24  ;;  %v43_v26 = vpop.xlane.xlu0 %42 }
  0x7f   :  { %v60_v27 = vmul.f32 %v56_v14, %v49_v25  ;;  %v58_v28 = vmul.f32 %v56_v14, %v43_v26 }
  0x81   :  { %v359_v29 = vsub.f32 %v36_v4, %v60_v27  ;;  %v361_v30 = vsub.f32 %v34_v5, %v58_v28  ;;  %v290_v4 = vld [vmem:[%s402_s4] ss:$0 sm:$0xff] }
  0x83   :  { %v68_v31 = vmul.f32 %v359_v29, %v359_v29  ;;  %v66_v32 = vmul.f32 %v361_v30, %v361_v30 }
  0x85   :  { %v78_v33 = vsel %vm37_vm0, %v68_v31, 0.0  ;;  %v72_v34 = vsel %vm37_vm0, %v66_v32, 0.0 }
  0x86   :  { %79 = vadd.xlane.f32.xlu1 %v78_v33  ;;  %73 = vadd.xlane.f32.xlu2 %v72_v34 }
  0xf1   :  { %v71_v35 = vpop.xlane.xlu2 %70  ;;  %v77_v36 = vpop.xlane.xlu0 %76 }
  0xf2   :  { %v81_v37 = vmul.f32 %v71_v35, %v56_v14  ;;  %v83_v38 = vmul.f32 %v77_v36, %v56_v14 }
  0xf4   :  { %v85_v39 = vadd.f32 1e-05, %v81_v37  ;;  %v87_v40 = vadd.f32 1e-05, %v83_v38 }
  0xf6   :  { %294 = vrsqrt.f32 %v85_v39  ;;  %vm95_vm4 = vweird.f32 %v85_v39  ;;  %vm115_vm6 = vweird.f32 %v87_v40 }
  0xf7   :  { %296 = vrsqrt.f32 %v87_v40 }
  0xf9   :  { %v80_v41 = vpop.xlane.xlu1 %79  ;;  %v74_v42 = vpop.xlane.xlu2 %73 }
  0xfa   :  { %v84_v44 = vmul.f32 %v80_v41, %v56_v14  ;;  %v82_v45 = vmul.f32 %v74_v42, %v56_v14 }
  0xfc   :  { %v295_v47 = vpop.eup %294  ;;  %v88_v48 = vadd.f32 1e-05, %v84_v44  ;;  %v86_v49 = vadd.f32 1e-05, %v82_v45 }
  0xfd   :  { %v297_v50 = vpop.eup %296  ;;  %v90_v51 = vmul.f32 %v295_v47, %v85_v39  ;;  %vm96_vm2 = vweird.f32 %v295_v47 }
  0xfe   :  { %v110_v52 = vmul.f32 %v297_v50, %v87_v40  ;;  %298 = vrsqrt.f32 %v88_v48  ;;  %vm116_vm3 = vweird.f32 %v297_v50  ;;  %vm97_vm5 = vmor %vm95_vm4, %vm96_vm2  ;;  %vm125_vm11 = vweird.f32 %v88_v48 }
  0xff   :  { %v91_v53 = vmul.f32 %v295_v47, %v90_v51  ;;  %300 = vrsqrt.f32 %v86_v49  ;;  %vm117_vm7 = vmor %vm115_vm6, %vm116_vm3  ;;  %vm105_vm13 = vweird.f32 %v86_v49 }
 0x100   :  { %v111_v54 = vmul.f32 %v297_v50, %v110_v52 }
 0x101   :  { %v92_v55 = vmul.f32 0.5, %v91_v53 }
 0x102   :  { %v112_v56 = vmul.f32 0.5, %v111_v54 }
 0x103   :  { %v93_v57 = vsub.f32 1.5, %v92_v55 }
 0x104   :  { %v299_v58 = vpop.eup %298  ;;  %v113_v59 = vsub.f32 1.5, %v112_v56 }
 0x105   :  { %v301_v60 = vpop.eup %300  ;;  %v94_v61 = vmul.f32 %v295_v47, %v93_v57  ;;  %v120_v62 = vmul.f32 %v299_v58, %v88_v48  ;;  %vm126_vm8 = vweird.f32 %v299_v58 }
 0x106   :  { %v114_v0 = vmul.f32 %v297_v50, %v113_v59  ;;  %v100_v1 = vmul.f32 %v301_v60, %v86_v49  ;;  %vm106_vm9 = vweird.f32 %v301_v60  ;;  %vm127_vm12 = vmor %vm125_vm11, %vm126_vm8 }
 0x107   :  { %v98_v2 = vsel %vm97_vm5, %v295_v47, %v94_v61  ;;  %v121_v3 = vmul.f32 %v299_v58, %v120_v62  ;;  %vm107_vm14 = vmor %vm105_vm13, %vm106_vm9 }
 0x108   :  { %v129_v5 = vmul.f32 %v98_v2, %v351_v20  ;;  %v118_v6 = vsel %vm117_vm7, %v297_v50, %v114_v0  ;;  %v101_v7 = vmul.f32 %v301_v60, %v100_v1 }
 0x109   :  { %v131_v8 = vmul.f32 %v118_v6, %v349_v19  ;;  %v122_v9 = vmul.f32 0.5, %v121_v3 }
 0x10a   :  { %v137_v10 = vmul.f32 %v289_v63, %v129_v5  ;;  %v102_v11 = vmul.f32 0.5, %v101_v7 }
 0x10b   :  { %v139_v12 = vmul.f32 %v289_v63, %v131_v8  ;;  %v123_v13 = vsub.f32 1.5, %v122_v9 }
 0x10c   :  { %v145_v14 = vadd.f32 %v290_v4, %v137_v10  ;;  %v103_v15 = vsub.f32 1.5, %v102_v11 }
 0x10d   :  { %v147_v16 = vadd.f32 %v290_v4, %v139_v12  ;;  %v124_v17 = vmul.f32 %v299_v58, %v123_v13 }
 0x10e   :  { %v149_v18 = vpack.c.bf16 %v145_v14, %v145_v14  ;;  %v104_v20 = vmul.f32 %v301_v60, %v103_v15 }
 0x10f   :  { %v151_v21 = vpack.c.bf16 %v147_v16, %v147_v16  ;;  %v128_v22 = vsel %vm127_vm12, %v299_v58, %v124_v17 }
 0x110   :  { %154 = vst.msk [vmem:[#allocation3] sm:$0xf] %vm153_vm10, %v149_v18  ;;  %v132_v19 = vmul.f32 %v128_v22, %v359_v29  ;;  %v108_v23 = vsel %vm107_vm14, %v301_v60, %v104_v20 }
 0x111   :  { %156 = vst.msk [vmem:[#allocation3 + $0x8] sm:$0xf] %vm153_vm10, %v151_v21  ;;  %v130_v24 = vmul.f32 %v108_v23, %v361_v30  ;;  %v291_v30 = vld [vmem:[%s403_s2] ss:$0 sm:$0xff] }
 0x112   :  { %v140_v25 = vmul.f32 %v289_v63, %v132_v19 }
 0x113   :  { %v138_v26 = vmul.f32 %v289_v63, %v130_v24 }
 0x114   :  { %v148_v27 = vadd.f32 %v290_v4, %v140_v25 }
 0x115   :  { %v146_v28 = vadd.f32 %v290_v4, %v138_v26 }
 0x116   :  { %v152_v31 = vpack.c.bf16 %v148_v27, %v148_v27 }
 0x117   :  { %v150_v32 = vpack.c.bf16 %v146_v28, %v146_v28 }
 0x118   :  { %157 = vst.msk [vmem:[#allocation3 + $0xc] sm:$0xf] %vm153_vm10, %v152_v31 }
 0x119   :  { %155 = vst.msk [vmem:[#allocation3 + $0x4] sm:$0xf] %vm153_vm10, %v150_v32 }
 0x11f   :  { %v272_v33 = vld [vmem:[#allocation3 + $0x8] sm:$0xff] }
 0x120   :  { %v271_v34 = vld [vmem:[#allocation3] sm:$0xff]  ;;  %270 = vmatmul.msk.bf16.vlgmr.msra.gmra.mxu1 %vm37_vm0, %v272_v33 }
 0x121   :  { %269 = vmatmul.msk.bf16.vlgmr.msra.gmra.mxu0 %vm37_vm0, %v271_v34 }
 0x19d   :  { %v213_v29 = vpop.f32.mrf.mxu1 }
 0x19e   :  { %v208_v35 = vpop.f32.mrf.mxu0  ;;  %v239_v37 = vadd.f32 %v291_v30, %v213_v29 }
 0x19f   :  { %v237_v40 = vadd.f32 %v291_v30, %v208_v35 }
 0x1a5   :  { %v215_v36 = vpop.f32.mrf.mxu1 }
 0x1a6   :  { %v210_v38 = vpop.f32.mrf.mxu0  ;;  %v240_v39 = vadd.f32 %v291_v30, %v215_v36 }
 0x1a7   :  { %v238_v41 = vadd.f32 %v291_v30, %v210_v38 }
 0x1a8   :  { %v283_v42 = vpack.c.bf16 %v240_v39, %v239_v37 }
 0x1a9   :  { %v278_v43 = vpack.c.bf16 %v238_v41, %v237_v40 }
 0x1aa   :  { %285 = vst [vmem:[%s405_s5 + $0x8] sm:$0xff] %v283_v42  }
 0x1ab   :  { %279 = vst [vmem:[%s405_s5] sm:$0xff] %v278_v43  }

// kernel: _lambda_.20
= control target key start
LH: loop header
LB: loop body
LE: loop exit
PB: predicated region body
PF: predicated region fallthrough
CT: control target
= control target key end

     0   :  { %s917_s12 = smov 0   ;;  %s1104_s0 = inlined_call_operand.vmem [shape: bf16[8,4,96], index: 0, kind: input, shape index: {}]   ;;  %s1105_s1 = inlined_call_operand.vmem [shape: f32[2,4,4], index: 1, kind: input, shape index: {}]   ;;  %s1106_s2 = inlined_call_operand.vmem [shape: f32[4,4,4], index: 2, kind: input, shape index: {}]   ;;  %s1107_s3 = inlined_call_operand.vmem [shape: bf16[8,4,32], index: 3, kind: output, shape index: {}]  }
   0x1 LB: > { %s799_s13 = sadd.s32 4294967295, %s889_s12   ;;  %p803_p0 = scmp.ge.s32.totalorder %s889_s12, 1  ;;  %s889_s12 = sphi %s917_s12, %s13_s12  }
   0x2   : > { %p138_p1 = scmp.lt.s32.totalorder %s889_s12, 3 }
   0x4   : > { %p139_p2 = pnand %p803_p0, %p138_p1 }
   0x5   : > { %s804_s14 = sshll.u32 (!%p139_p2), %s799_s13, 2  ;;  %s891_s19 = smov (!%p139_p2), 96  }
   0x6   : > { %142 = sbr.rel (%p139_p2) target bundleno = 1245 (0x4dd), region = 32  ;;  %p163_p3 = scmp.lt.s32.totalorder (!%p139_p2), %s804_s14, 7 }
   0x7   : > { %s892_s20 = smov (!%p139_p2), 64   ;;  %s893_s21 = smov (!%p139_p2), 80  }
   0x8   : > { %s894_s22 = smov (!%p139_p2), 112   ;;  %s895_s8 = smov (!%p139_p2), 48  }
   0x9   : > { %s896_s9 = smov (!%p139_p2), 16  }
   0xb   : > { %s1109_s14 = smov (!%p163_p3, %s804_s14), 7  ;;  %vm185_vm0 = vcmask 130048   ;;  %v280_v31 = vld [vmem:[%s1105_s1] sm:$0xf]  ;;  %vm293_vm1 = vcmask 27648   ;;  %vm351_vm2 = vcmask 1041408  }
   0xc   : > { %s805_s15 = sshll.u32 %s1109_s14, 1  ;;  %v994_v33 = vld [vmem:[%s1106_s2] sm:$0xf]  ;;  %v1002_v42 = vld [vmem:[%s1106_s2 + $0x4] sm:$0xf]  ;;  %vm347_vm3 = vcmask 31744  }
   0xd   : > { %s166_s18 = scalar_lea.vmem %s1104_s0, %s805_s15  ;;  %v1012_v55 = vld [vmem:[%s1106_s2 + $0x8] sm:$0xf]  ;;  %v1020_v62 = vld [vmem:[%s1106_s2 + $0xc] sm:$0xf]  ;;  %s172_s13 = scalar_lea.vmem %s1107_s3, %s805_s15  ;;  %vm738_vm4 = vcmask 254976  }
   0xe   : > { %v933_v0 = vld [vmem:[%s166_s18] sm:$0x3]  ;;  %v936_v1 = vld [vmem:[%s166_s18 + $0x2] sm:$0x3]  ;;  %v939_v3 = vld [vmem:[%s166_s18 + $0x4] sm:$0x3] }
   0xf   : > { %180 = vst [vmem:[#allocation1] ss:$4 sm:$0xff] %v933_v0  ;;  %v942_v5 = vld [vmem:[%s166_s18 + $0x6] sm:$0x3] }
  0x16   : > { %v181_v2 = vld.sshfl [vmem:[#allocation1] sm:$0xff pattern:$0x73625140] }
  0x17   : > { %183 = vrot.lane.b32.xlu1 %v181_v2, %s891_s19  ;;  %205 = vst [vmem:[#allocation1] ss:$4 sm:$0xff] %v936_v1 }
  0x1e   : > { %v206_v4 = vld.sshfl [vmem:[#allocation1] sm:$0xff pattern:$0x73625140] }
  0x1f   : > { %208 = vrot.lane.b32.xlu1 %v206_v4, %s891_s19  ;;  %229 = vst [vmem:[#allocation1] ss:$4 sm:$0xff] %v939_v3 }
  0x26   : > { %v230_v6 = vld.sshfl [vmem:[#allocation1] sm:$0xff pattern:$0x73625140] }
  0x27   : > { %232 = vrot.lane.b32.xlu0 %v230_v6, %s891_s19  ;;  %253 = vst [vmem:[#allocation1] ss:$4 sm:$0xff] %v942_v5 }
  0x2e   : > { %v254_v7 = vld.sshfl [vmem:[#allocation1] sm:$0xff pattern:$0x73625140] }
  0x2f   : > { %256 = vrot.lane.b32.xlu0 %v254_v7, %s891_s19  ;;  %342 = vst [vmem:[#allocation1] ss:$4 sm:$0xff] %v933_v0 }
  0x36   : > { %v343_v8 = vld.sshfl [vmem:[#allocation1] sm:$0xff pattern:$0x73625140] }
  0x37   : > { %345 = vrot.lane.b32.xlu2 %v343_v8, %s892_s20  ;;  %368 = vst [vmem:[#allocation1] ss:$4 sm:$0xff] %v936_v1 }
  0x3e   : > { %v369_v11 = vld.sshfl [vmem:[#allocation1] sm:$0xff pattern:$0x73625140] }
  0x3f   : > { %392 = vst [vmem:[#allocation1] ss:$4 sm:$0xff] %v939_v3  ;;  %371 = vrot.lane.b32.xlu0 %v369_v11, %s892_s20 }
  0x46   : > { %v393_v14 = vld.sshfl [vmem:[#allocation1] sm:$0xff pattern:$0x73625140] }
  0x47   : > { %395 = vrot.lane.b32.xlu2 %v393_v14, %s892_s20  ;;  %416 = vst [vmem:[#allocation1] ss:$4 sm:$0xff] %v942_v5 }
  0x4e   : > { %v417_v17 = vld.sshfl [vmem:[#allocation1] sm:$0xff pattern:$0x73625140] }
  0x4f   : > { %419 = vrot.lane.b32.xlu2 %v417_v17, %s892_s20  ;;  %440 = vst [vmem:[#allocation1] ss:$4 sm:$0xff] %v933_v0 }
  0x56   : > { %v960_v20 = vld.sshfl [vmem:[#allocation1] sm:$0xff pattern:$0x73625140] }
  0x57   : > { %445 = vst [vmem:[#allocation1] ss:$4 sm:$0xff] %v933_v0 }
  0x5e   : > { %v965_v21 = vld.sshfl [vmem:[#allocation1] sm:$0xff pattern:$0x73625140] }
  0x5f   : > { %469 = vst [vmem:[#allocation1] ss:$4 sm:$0xff] %v936_v1 }
  0x66   : > { %v968_v22 = vld.sshfl [vmem:[#allocation1] sm:$0xff pattern:$0x73625140] }
  0x67   : > { %474 = vst [vmem:[#allocation1] ss:$4 sm:$0xff] %v936_v1 }
  0x6e   : > { %v971_v23 = vld.sshfl [vmem:[#allocation1] sm:$0xff pattern:$0x73625140] }
  0x6f   : > { %498 = vst [vmem:[#allocation1] ss:$4 sm:$0xff] %v939_v3 }
  0x76   : > { %v499_v24 = vld.sshfl [vmem:[#allocation1] sm:$0xff pattern:$0x73625140] }
  0x77   : > { %503 = vst [vmem:[#allocation1] ss:$4 sm:$0xff] %v939_v3 }
  0x7e   : > { %v975_v25 = vld.sshfl [vmem:[#allocation1] sm:$0xff pattern:$0x73625140] }
  0x7f   : > { %527 = vst [vmem:[#allocation1] ss:$4 sm:$0xff] %v942_v5 }
  0x86   : > { %v528_v26 = vld.sshfl [vmem:[#allocation1] sm:$0xff pattern:$0x73625140] }
  0x87   : > { %532 = vst [vmem:[#allocation1] ss:$4 sm:$0xff] %v942_v5 }
  0x89   : > { %v184_v9 = vpop.permute.xlu1 %183 }
  0x8a   : > { %v189_v10 = vsel %vm185_vm0, %v184_v9, 0 }
  0x8b   : > { %198 = vmatpush.bf16.xpose.msra.mxu0 %v189_v10 }
  0x8e   : > { %v533_v27 = vld.sshfl [vmem:[#allocation1] sm:$0xff pattern:$0x73625140] }
  0x8f   : > { %535 = vrot.lane.b32.xlu2 %v533_v27, %s893_s21  ;;  %618 = vst [vmem:[#allocation1] ss:$4 sm:$0xff] %v933_v0 }
  0x91   : > { %v209_v12 = vpop.permute.xlu1 %208  ;;  %v346_v36 = vpop.permute.xlu2 %345 }
  0x92   : > { %808 = vmatmul.msk.bf16.vlgmr.msra.gmra.mxu0 %vm185_vm0, %v933_v0  ;;  %v213_v13 = vsel %vm185_vm0, %v209_v12, 0  ;;  %v353_v38 = vsel %vm351_vm2, %v346_v36, 0 }
  0x93   : > { %222 = vmatpush.bf16.xpose.msra.mxu1 %v213_v13  ;;  %362 = vmatpush.bf16.msrb.mxu0 %v353_v38 }
  0x96   : > { %v981_v28 = vld.sshfl [vmem:[#allocation1] sm:$0xff pattern:$0x73625140] }
  0x97   : > { %642 = vst [vmem:[#allocation1] ss:$4 sm:$0xff] %v936_v1  ;;  %501 = vrot.lane.b32.xlu2 %v499_v24, %s894_s22 }
  0x99   : > { %v233_v15 = vpop.permute.xlu0 %232 }
  0x9a   : > { %809 = vmatmul.msk.bf16.vlgmr.msra.gmra.mxu1 %vm185_vm0, %v936_v1  ;;  %v237_v16 = vsel %vm185_vm0, %v233_v15, 0 }
  0x9b   : > { %246 = vmatpush.bf16.xpose.msra.mxu2 %v237_v16 }
  0x9e   : > { %v985_v29 = vld.sshfl [vmem:[#allocation1] sm:$0xff pattern:$0x73625140] }
  0x9f   : > { %666 = vst [vmem:[#allocation1] ss:$4 sm:$0xff] %v939_v3 }
  0xa1   : > { %v257_v18 = vpop.permute.xlu0 %256  ;;  %v396_v45 = vpop.permute.xlu2 %395 }
  0xa2   : > { %810 = vmatmul.msk.bf16.vlgmr.msra.gmra.mxu2 %vm185_vm0, %v939_v3  ;;  %v261_v19 = vsel %vm185_vm0, %v257_v18, 0  ;;  %v401_v47 = vsel %vm351_vm2, %v396_v45, 0 }
  0xa3   : > { %270 = vmatpush.bf16.xpose.msra.mxu3 %v261_v19  ;;  %410 = vmatpush.bf16.msrb.mxu2 %v401_v47 }
  0xa9   : > { %v420_v52 = vpop.permute.xlu2 %419 }
  0xaa   : > { %811 = vmatmul.msk.bf16.vlgmr.msra.gmra.mxu3 %vm185_vm0, %v942_v5  ;;  %v425_v54 = vsel %vm351_vm2, %v420_v52, 0 }
  0xab   : > { %434 = vmatpush.bf16.msrb.mxu3 %v425_v54 }
  0xb1   : > { %v372_v48 = vpop.permute.xlu0 %371 }
  0xb2   : > { %v377_v50 = vsel %vm351_vm2, %v372_v48, 0 }
  0xb3   : > { %386 = vmatpush.bf16.msrb.mxu1 %v377_v50 }
  0xe9   : > { %v536_v3 = vpop.permute.xlu2 %535 }
  0xea   : > { %v541_v4 = vsel %vm185_vm0, %v536_v3, 0 }
  0xeb   : > { %550 = vmatpush.bf16.xpose.msra.mxu3 %v541_v4 }
  0xf1   : > { %v502_v14 = vpop.permute.xlu2 %501 }
 0x10f   : > { %v200_v30 = vpop.f32.mrf.mxu0 }
 0x110   : > { %v276_v32 = vmul.f32 0.25, %v200_v30 }
 0x112   : > { %v281_v34 = vadd.f32 %v280_v31, %v276_v32 }
 0x114   : > { %v289_v35 = vadd.f32 %v994_v33, %v281_v34 }
 0x116   : > { %v294_v37 = vsel %vm293_vm1, %v289_v35, -inf }
 0x117   : > { %v224_v39 = vpop.f32.mrf.mxu1  ;;  %295 = vmax.xlane.f32.xlu0 %v294_v37  ;;  %v202_v40 = vpop.f32.mrf.mxu0 }
 0x118   : > { %v277_v41 = vmul.f32 0.25, %v224_v39 }
 0x11a   : > { %v282_v43 = vadd.f32 %v280_v31, %v277_v41 }
 0x11c   : > { %v290_v44 = vadd.f32 %v1002_v42, %v282_v43 }
 0x11e   : > { %v297_v46 = vsel %vm293_vm1, %v290_v44, -inf }
 0x11f   : > { %298 = vmax.xlane.f32.xlu1 %v297_v46  ;;  %v226_v49 = vpop.f32.mrf.mxu1 }
 0x125   : > { %v248_v51 = vpop.f32.mrf.mxu2 }
 0x126   : > { %v278_v53 = vmul.f32 0.25, %v248_v51 }
 0x128   : > { %v283_v56 = vadd.f32 %v280_v31, %v278_v53 }
 0x12a   : > { %v291_v57 = vadd.f32 %v1012_v55, %v283_v56 }
 0x12b   : > { %530 = vrot.lane.b32.xlu0 %v528_v26, %s894_s22 }
 0x12c   : > { %v300_v58 = vsel %vm293_vm1, %v291_v57, -inf }
 0x12d   : > { %v250_v59 = vpop.f32.mrf.mxu2  ;;  %v272_v60 = vpop.f32.mrf.mxu3  ;;  %301 = vmax.xlane.f32.xlu2 %v300_v58 }
 0x12e   : > { %v279_v61 = vmul.f32 0.25, %v272_v60 }
 0x130   : > { %v284_v63 = vadd.f32 %v280_v31, %v279_v61 }
 0x132   : > { %v292_v0 = vadd.f32 %v1020_v62, %v284_v63  ;;  %v820_v63 = vld [vmem:[%s1105_s1 + $0x4] sm:$0xf] }
 0x134   : > { %v303_v1 = vsel %vm293_vm1, %v292_v0, -inf }
 0x135   : > { %304 = vmax.xlane.f32.xlu2 %v303_v1  ;;  %v274_v2 = vpop.f32.mrf.mxu3 }
 0x138   : > { %506 = vrot.lane.b32.xlu1 %v975_v25, %s893_s21 }
 0x14d   : > { %448 = vrot.lane.b32.xlu2 %v965_v21, %s893_s21 }
 0x18a   : > { %v296_v6 = vpop.xlane.xlu0 %295 }
 0x18b   : > { %v306_v7 = vsub.f32 %v289_v35, %v296_v6 }
 0x18d   : > { %v310_v8 = vmul.f32 1.442695, %v306_v7 }
 0x18f   : > { %851 = vpow2.f32 %v310_v8 }
 0x192   : > { %v299_v9 = vpop.xlane.xlu1 %298 }
 0x193   : > { %v307_v10 = vsub.f32 %v290_v44, %v299_v9 }
 0x195   : > { %v852_v11 = vpop.eup %851  ;;  %v312_v12 = vmul.f32 1.442695, %v307_v10 }
 0x196   : > { %v318_v13 = vsel %vm293_vm1, %v852_v11, 0.0 }
 0x197   : > { %853 = vpow2.f32 %v312_v12  ;;  %319 = vadd.xlane.f32.xlu0 %v318_v13 }
 0x19d   : > { %v854_v15 = vpop.eup %853 }
 0x19e   : > { %v321_v16 = vsel %vm293_vm1, %v854_v15, 0.0 }
 0x19f   : > { %322 = vadd.xlane.f32.xlu1 %v321_v16 }
 0x1a0   : > { %v302_v17 = vpop.xlane.xlu2 %301 }
 0x1a1   : > { %v308_v18 = vsub.f32 %v291_v57, %v302_v17 }
 0x1a3   : > { %v314_v19 = vmul.f32 1.442695, %v308_v18 }
 0x1a5   : > { %855 = vpow2.f32 %v314_v19 }
 0x1a8   : > { %v305_v21 = vpop.xlane.xlu2 %304 }
 0x1a9   : > { %v309_v24 = vsub.f32 %v292_v0, %v305_v21 }
 0x1aa   : > { %v507_v30 = vpop.permute.xlu1 %506 }
 0x1ab   : > { %v856_v25 = vpop.eup %855  ;;  %v316_v26 = vmul.f32 1.442695, %v309_v24  ;;  %443 = vrot.lane.b32.xlu0 %v960_v20, %s894_s22  ;;  %v512_v31 = vsel %vm185_vm0, %v507_v30, 0  ;;  %v531_v20 = vpop.permute.xlu0 %530 }
 0x1ac   : > { %v324_v27 = vsel %vm293_vm1, %v856_v25, 0.0  ;;  %521 = vmatpush.bf16.xpose.msra.mxu2 %v512_v31 }
 0x1ad   : > { %857 = vpow2.f32 %v316_v26  ;;  %325 = vadd.xlane.f32.xlu2 %v324_v27 }
 0x1b0   : > { %v449_v32 = vpop.permute.xlu2 %448 }
 0x1b1   : > { %v454_v34 = vsel %vm185_vm0, %v449_v32, 0  ;;  %v667_v32 = vld.sshfl [vmem:[#allocation1] sm:$0xff pattern:$0x73625140] }
 0x1b2   : > { %463 = vmatpush.bf16.xpose.msra.mxu0 %v454_v34  ;;  %690 = vst [vmem:[#allocation1] ss:$4 sm:$0xff] %v942_v5 }
 0x1b3   : > { %v858_v35 = vpop.eup %857 }
 0x1b4   : > { %v327_v36 = vsel %vm293_vm1, %v858_v35, 0.0 }
 0x1b5   : > { %328 = vadd.xlane.f32.xlu2 %v327_v36 }
 0x1b8   : > { %477 = vrot.lane.b32.xlu1 %v971_v23, %s893_s21 }
 0x1cd   : > { %472 = vrot.lane.b32.xlu2 %v968_v22, %s894_s22 }
 0x20a   : > { %v320_v37 = vpop.xlane.xlu0 %319 }
 0x20b   : > { %859 = vrcp.f32 %v320_v37 }
 0x211   : > { %v860_v38 = vpop.eup %859 }
 0x212   : > { %v334_v39 = vmul.f32 %v860_v38, %v852_v11  ;;  %v323_v40 = vpop.xlane.xlu1 %322 }
 0x213   : > { %861 = vrcp.f32 %v323_v40 }
 0x214   : > { %v338_v41 = vpack.c.bf16 %v334_v39, %v334_v39 }
 0x216   : > { %812 = vmatmul.msk.bf16.vlgmr.msrb.gmra.mxu0 %vm347_vm3, %v338_v41 }
 0x219   : > { %v862_v43 = vpop.eup %861 }
 0x21a   : > { %v335_v44 = vmul.f32 %v862_v43, %v854_v15 }
 0x21c   : > { %v339_v45 = vpack.c.bf16 %v335_v44, %v335_v44 }
 0x21d   : > { %v444_v46 = vpop.permute.xlu0 %443 }
 0x21e   : > { %813 = vmatmul.msk.bf16.vlgmr.msrb.gmra.mxu1 %vm347_vm3, %v339_v45 }
 0x220   : > { %v326_v23 = vpop.xlane.xlu2 %325 }
 0x221   : > { %863 = vrcp.f32 %v326_v23 }
 0x226   : > { %816 = vmatmul.msk.bf16.vlgmr.msra.gmra.mxu0 %vm185_vm0, %v444_v46 }
 0x227   : > { %v864_v22 = vpop.eup %863 }
 0x228   : > { %v336_v47 = vmul.f32 %v864_v22, %v856_v25  ;;  %v329_v48 = vpop.xlane.xlu2 %328 }
 0x229   : > { %865 = vrcp.f32 %v329_v48 }
 0x22a   : > { %v340_v49 = vpack.c.bf16 %v336_v47, %v336_v47  ;;  %v478_v50 = vpop.permute.xlu1 %477 }
 0x22b   : > { %v483_v51 = vsel %vm185_vm0, %v478_v50, 0 }
 0x22c   : > { %814 = vmatmul.msk.bf16.vlgmr.msrb.gmra.mxu2 %vm347_vm3, %v340_v49  ;;  %492 = vmatpush.bf16.xpose.msra.mxu1 %v483_v51 }
 0x22f   : > { %v866_v52 = vpop.eup %865 }
 0x230   : > { %v337_v53 = vmul.f32 %v866_v52, %v858_v35  ;;  %v473_v54 = vpop.permute.xlu2 %472 }
 0x232   : > { %v341_v56 = vpack.c.bf16 %v337_v53, %v337_v53 }
 0x233   : > { %817 = vmatmul.msk.bf16.vlgmr.msra.gmra.mxu1 %vm185_vm0, %v473_v54 }
 0x234   : > { %815 = vmatmul.msk.bf16.vlgmr.msrb.gmra.mxu3 %vm347_vm3, %v341_v56 }
 0x23c   : > { %818 = vmatmul.msk.bf16.vlgmr.msra.gmra.mxu2 %vm185_vm0, %v502_v14 }
 0x244   : > { %819 = vmatmul.msk.bf16.vlgmr.msra.gmra.mxu3 %vm185_vm0, %v531_v20  ;;  %v691_v20 = vld.sshfl [vmem:[#allocation1] sm:$0xff pattern:$0x73625140] }
 0x293   : > { %v1050_v57 = vpop.f32.mrf.mxu0 }
 0x29b   : > { %v366_v58 = vpop.f32.mrf.mxu0  ;;  %v1052_v59 = vpop.f32.mrf.mxu1 }
 0x2a3   : > { %v390_v60 = vpop.f32.mrf.mxu1  ;;  %v465_v61 = vpop.f32.mrf.mxu0 }
 0x2a4   : > { %v556_v0 = vmul.f32 0.25, %v465_v61 }
 0x2a6   : > { %v562_v1 = vadd.f32 %v820_v63, %v556_v0 }
 0x2a8   : > { %v566_v2 = vadd.f32 %v562_v1, %v994_v33 }
 0x2aa   : > { %v570_v3 = vsel %vm293_vm1, %v566_v2, -inf }
 0x2ab   : > { %571 = vmax.xlane.f32.xlu2 %v570_v3  ;;  %v467_v4 = vpop.f32.mrf.mxu0 }
 0x2af   : > { %v1059_v6 = vpop.f32.mrf.mxu2 }
 0x2b0   : > { %v494_v7 = vpop.f32.mrf.mxu1 }
 0x2b1   : > { %v557_v13 = vmul.f32 0.25, %v494_v7 }
 0x2b3   : > { %v563_v16 = vadd.f32 %v820_v63, %v557_v13 }
 0x2b5   : > { %v567_v24 = vadd.f32 %v563_v16, %v1002_v42 }
 0x2b7   : > { %v414_v8 = vpop.f32.mrf.mxu2  ;;  %v1061_v9 = vpop.f32.mrf.mxu3  ;;  %v573_v27 = vsel %vm293_vm1, %v567_v24, -inf }
 0x2b8   : > { %v496_v10 = vpop.f32.mrf.mxu1 }
 0x2bf   : > { %v438_v11 = vpop.f32.mrf.mxu3  ;;  %v523_v12 = vpop.f32.mrf.mxu2 }
 0x2c0   : > { %v558_v14 = vmul.f32 0.25, %v523_v12 }
 0x2c2   : > { %v564_v15 = vadd.f32 %v820_v63, %v558_v14 }
 0x2c3   : > { %669 = vrot.lane.b32.xlu2 %v667_v32, %s895_s8 }
 0x2c4   : > { %v568_v17 = vadd.f32 %v564_v15, %v1012_v55 }
 0x2c6   : > { %v576_v33 = vsel %vm293_vm1, %v568_v17, -inf }
 0x2c7   : > { %577 = vmax.xlane.f32.xlu1 %v576_v33  ;;  %v525_v18 = vpop.f32.mrf.mxu2  ;;  %v552_v19 = vpop.f32.mrf.mxu3 }
 0x2c8   : > { %v559_v21 = vmul.f32 0.25, %v552_v19 }
 0x2ca   : > { %v565_v25 = vadd.f32 %v820_v63, %v559_v21 }
 0x2cc   : > { %v569_v26 = vadd.f32 %v565_v25, %v1020_v62 }
 0x2ce   : > { %v579_v30 = vsel %vm293_vm1, %v569_v26, -inf }
 0x2cf   : > { %580 = vmax.xlane.f32.xlu0 %v579_v30  ;;  %v554_v31 = vpop.f32.mrf.mxu3  ;;  %574 = vmax.xlane.f32.xlu1 %v573_v27 }
 0x31e   : > { %v572_v55 = vpop.xlane.xlu2 %571 }
 0x31f   : > { %v582_v34 = vsub.f32 %v566_v2, %v572_v55 }
 0x321   : > { %v586_v35 = vmul.f32 1.442695, %v582_v34 }
 0x323   : > { %867 = vpow2.f32 %v586_v35 }
 0x326   : > { %v670_v49 = vpop.permute.xlu2 %669 }
 0x327   : > { %v675_v50 = vsel %vm351_vm2, %v670_v49, 0 }
 0x328   : > { %684 = vmatpush.bf16.msrb.mxu2 %v675_v50 }
 0x329   : > { %v868_v42 = vpop.eup %867 }
 0x32a   : > { %v594_v62 = vsel %vm293_vm1, %v868_v42, 0.0 }
 0x32b   : > { %595 = vadd.xlane.f32.xlu1 %v594_v62 }
 0x33a   : > { %v578_v36 = vpop.xlane.xlu1 %577 }
 0x33b   : > { %v584_v44 = vsub.f32 %v568_v17, %v578_v36 }
 0x33d   : > { %v590_v5 = vmul.f32 1.442695, %v584_v44 }
 0x342   : > { %v581_v37 = vpop.xlane.xlu0 %580  ;;  %v575_v38 = vpop.xlane.xlu1 %574 }
 0x343   : > { %v585_v39 = vsub.f32 %v569_v26, %v581_v37  ;;  %v583_v40 = vsub.f32 %v567_v24, %v575_v38 }
 0x344   : > { %693 = vrot.lane.b32.xlu1 %v691_v20, %s895_s8 }
 0x345   : > { %v592_v41 = vmul.f32 1.442695, %v585_v39  ;;  %v588_v43 = vmul.f32 1.442695, %v583_v40 }
 0x347   : > { %869 = vpow2.f32 %v592_v41 }
 0x348   : > { %871 = vpow2.f32 %v588_v43 }
 0x349   : > { %873 = vpow2.f32 %v590_v5 }
 0x34d   : > { %v870_v45 = vpop.eup %869 }
 0x34e   : > { %v872_v23 = vpop.eup %871  ;;  %v603_v46 = vsel %vm293_vm1, %v870_v45, 0.0 }
 0x34f   : > { %v597_v22 = vsel %vm293_vm1, %v872_v23, 0.0  ;;  %604 = vadd.xlane.f32.xlu2 %v603_v46  ;;  %v874_v47 = vpop.eup %873 }
 0x350   : > { %598 = vadd.xlane.f32.xlu0 %v597_v22  ;;  %v600_v48 = vsel %vm293_vm1, %v874_v47, 0.0 }
 0x358   : > { %601 = vadd.xlane.f32.xlu0 %v600_v48 }
 0x367   : > { %645 = vrot.lane.b32.xlu2 %v985_v29, %s895_s8 }
 0x36c   : > { %621 = vrot.lane.b32.xlu0 %v981_v28, %s895_s8 }
 0x39e   : > { %v596_v51 = vpop.xlane.xlu1 %595 }
 0x3b6   : > { %v694_v52 = vpop.permute.xlu1 %693 }
 0x3b7   : > { %v699_v53 = vsel %vm351_vm2, %v694_v52, 0 }
 0x3b8   : > { %708 = vmatpush.bf16.msrb.mxu3 %v699_v53 }
 0x3c2   : > { %v605_v54 = vpop.xlane.xlu2 %604 }
 0x3c3   : > { %v599_v56 = vpop.xlane.xlu0 %598  ;;  %875 = vrcp.f32 %v605_v54 }
 0x3c4   : > { %877 = vrcp.f32 %v599_v56 }
 0x3c9   : > { %v876_v58 = vpop.eup %875 }
 0x3ca   : > { %v878_v60 = vpop.eup %877  ;;  %v613_v61 = vmul.f32 %v876_v58, %v870_v45  ;;  %v646_v63 = vpop.permute.xlu2 %645 }
 0x3cb   : > { %v611_v0 = vmul.f32 %v878_v60, %v872_v23  ;;  %v602_v1 = vpop.xlane.xlu0 %601  ;;  %v651_v29 = vsel %vm351_vm2, %v646_v63, 0 }
 0x3cc   : > { %v617_v2 = vpack.c.bf16 %v613_v61, %v613_v61  ;;  %879 = vrcp.f32 %v602_v1  ;;  %660 = vmatpush.bf16.msrb.mxu1 %v651_v29 }
 0x3cd   : > { %v615_v28 = vpack.c.bf16 %v611_v0, %v611_v0  ;;  %881 = vrcp.f32 %v596_v51 }
 0x3ce   : > { %824 = vmatmul.msk.bf16.vlgmr.msrb.gmra.mxu3 %vm347_vm3, %v617_v2 }
 0x3cf   : > { %822 = vmatmul.msk.bf16.vlgmr.msrb.gmra.mxu1 %vm347_vm3, %v615_v28 }
 0x3d2   : > { %v880_v3 = vpop.eup %879 }
 0x3d3   : > { %v612_v4 = vmul.f32 %v880_v3, %v874_v47  ;;  %v882_v8 = vpop.eup %881 }
 0x3d4   : > { %v610_v10 = vmul.f32 %v882_v8, %v868_v42 }
 0x3d5   : > { %v616_v7 = vpack.c.bf16 %v612_v4, %v612_v4 }
 0x3d6   : > { %v614_v13 = vpack.c.bf16 %v610_v10, %v610_v10 }
 0x3d7   : > { %823 = vmatmul.msk.bf16.vlgmr.msrb.gmra.mxu2 %vm347_vm3, %v616_v7 }
 0x3de   : > { %v622_v11 = vpop.permute.xlu0 %621 }
 0x3df   : > { %v627_v12 = vsel %vm351_vm2, %v622_v11, 0 }
 0x3e0   : > { %636 = vmatpush.bf16.msrb.mxu0 %v627_v12 }
 0x3e3   : > { %821 = vmatmul.msk.bf16.vlgmr.msrb.gmra.mxu0 %vm347_vm3, %v614_v13 }
 0x44c   : > { %v662_v14 = vpop.f32.mrf.mxu1 }
 0x451   : > { %v710_v15 = vpop.f32.mrf.mxu3 }
 0x454   : > { %v664_v16 = vpop.f32.mrf.mxu1 }
 0x459   : > { %v712_v17 = vpop.f32.mrf.mxu3 }
 0x45a   : > { %v686_v33 = vpop.f32.mrf.mxu2 }
 0x45b   : > { %v846_v18 = vpack.i.bf16 %v710_v15, %v686_v33 }
 0x45d   : > { %847 = vrot.lane.b32.xlu1 %v846_v18, %s896_s9 }
 0x460   : > { %v638_v19 = vpop.f32.mrf.mxu0 }
 0x461   : > { %v841_v21 = vpack.i.bf16 %v662_v14, %v638_v19 }
 0x462   : > { %v688_v24 = vpop.f32.mrf.mxu2 }
 0x463   : > { %842 = vrot.lane.b32.xlu0 %v841_v21, %s896_s9 }
 0x468   : > { %v640_v25 = vpop.f32.mrf.mxu0 }
 0x4cf   : > { %v848_v26 = vpop.permute.xlu1 %847 }
 0x4d0   : > { %v849_v27 = vunpack.i.l.bf16 %v848_v26  ;;  %v850_v30 = vunpack.i.h.bf16 %v848_v26 }
 0x4d2   : > { %v732_v34 = vsel %vm185_vm0, %v1059_v6, %v849_v27  ;;  %v733_v62 = vsel %vm185_vm0, %v1061_v9, %v850_v30 }
 0x4d3   : > { %v736_v37 = vpack.c.bf16 %v732_v34, %v732_v34  ;;  %v737_v6 = vpack.c.bf16 %v733_v62, %v733_v62 }
 0x4d5   : > { %v843_v31 = vpop.permute.xlu0 %842  ;;  %741 = vst.msk [vmem:[%s172_s13 + $0x4] sm:$0x3] %vm738_vm4, %v736_v37 }
 0x4d6   : > { %v845_v32 = vunpack.i.h.bf16 %v843_v31  ;;  %v844_v55 = vunpack.i.l.bf16 %v843_v31  ;;  %742 = vst.msk [vmem:[%s172_s13 + $0x6] sm:$0x3] %vm738_vm4, %v737_v6 }
 0x4d8   : > { %v731_v35 = vsel %vm185_vm0, %v1052_v59, %v845_v32  ;;  %v730_v42 = vsel %vm185_vm0, %v1050_v57, %v844_v55 }
 0x4d9   : > { %v735_v36 = vpack.c.bf16 %v731_v35, %v731_v35  ;;  %v734_v20 = vpack.c.bf16 %v730_v42, %v730_v42 }
 0x4db   : > { %739 = vst.msk [vmem:[%s172_s13] sm:$0x3] %vm738_vm4, %v734_v20 }
 0x4dc   : > { %740 = vst.msk [vmem:[%s172_s13 + $0x2] sm:$0x3] %vm738_vm4, %v735_v36 }
 0x4dd PF: > { %s13_s12 = sadd.s32 1, %s889_s12  }
 0x4de   : > { %p10_p4 = scmp.ge.s32.totalorder %s13_s12, 4  }
 0x4e0   :  { %12 = sbr.rel (!%p10_p4) target bundleno = 1 (0x1), region = 63 }

// kernel: _lambda_.23
= control target key start
LH: loop header
LB: loop body
LE: loop exit
PB: predicated region body
PF: predicated region fallthrough
CT: control target
= control target key end

     0   :  { %s457_s0 = inlined_call_operand.vmem [shape: bf16[32,128], index: 0, kind: input, shape index: {}]   ;;  %s458_s1 = inlined_call_operand.vmem [shape: bf16[128,128], index: 1, kind: input, shape index: {}]   ;;  %s459_s2 = inlined_call_operand.vmem [shape: f32[1,128], index: 2, kind: input, shape index: {}]   ;;  %s460_s3 = inlined_call_operand.vmem [shape: f32[32,128], index: 3, kind: input, shape index: {}]   ;;  %s461_s4 = inlined_call_operand.vmem [shape: f32[32,128], index: 4, kind: input, shape index: {}]   ;;  %s462_s5 = inlined_call_operand.vmem [shape: f32[32,128], index: 5, kind: output, shape index: {0}]   ;;  %s463_s6 = inlined_call_operand.hbm [shape: f32[32,128], index: 6, kind: output, shape index: {1}]  }
   0x1   :  { %v284_v0 = vld [vmem:[%s458_s1 + $0x38] sm:$0xff]  ;;  %v283_v1 = vld [vmem:[%s458_s1 + $0x30] sm:$0xff] }
   0x2   :  { %115 = vmatpush.bf16.msra.mxu0 %v284_v0  ;;  %285 = vmatpush.bf16.msra.mxu1 %v284_v0 }
   0x3   :  { %12 = vsyncpa [#allocation4], 0  ;;  %v282_v2 = vld [vmem:[%s458_s1 + $0x28] sm:$0xff]  ;;  %v281_v3 = vld [vmem:[%s458_s1 + $0x20] sm:$0xff]  ;;  %s347_s7 = smov [#allocation3]   ;;  %s221_s11 = sshll.u32 %s463_s6, 4  ;;  %s222_s11 = int_to_ptr.hbm [resolvable:$true] %s221_s11 }
   0x4   :  { %v280_v4 = vld [vmem:[%s458_s1 + $0x18] sm:$0xff]  ;;  %v279_v5 = vld [vmem:[%s458_s1 + $0x10] sm:$0xff]  ;;  %v278_v6 = vld [vmem:[%s458_s1 + $0x8] sm:$0xff]  ;;  %s219_s8 = sshll.u32 %s347_s7, 4  ;;  %s348_s6 = smov 128   ;;  %s220_s8 = int_to_ptr.vmem [resolvable:$true] %s219_s8 }
   0x5   :  { %v277_v7 = vld [vmem:[%s458_s1] sm:$0xff]  ;;  %v276_v9 = vld [vmem:[%s457_s0 + $0x8] sm:$0xff]  ;;  %v159_v14 = vld [vmem:[%s460_s3 + $0x10] sm:$0xff]  ;;  %s349_s15 = smov 8  }
   0x6   :  { %116 = vmatpush.bf16.msra.mxu0 %v283_v1  ;;  %286 = vmatpush.bf16.msra.mxu1 %v283_v1  ;;  %v275_v8 = vld [vmem:[%s457_s0] sm:$0xff]  ;;  %v158_v22 = vld [vmem:[%s460_s3 + $0x8] sm:$0xff]  ;;  %v160_v24 = vld [vmem:[%s460_s3 + $0x18] sm:$0xff] }
   0x7   :  { %v296_v10 = vld [vmem:[%s459_s2] ss:$0 sm:$0xff]  ;;  %v187_v37 = vld [vmem:[%s461_s4 + $0x10] sm:$0xff]  ;;  %v186_v48 = vld [vmem:[%s461_s4 + $0x8] sm:$0xff] }
   0x8   :  { %v157_v12 = vld [vmem:[%s460_s3] sm:$0xff]  ;;  %v188_v51 = vld [vmem:[%s461_s4 + $0x18] sm:$0xff] }
   0x9   :  { %v185_v32 = vld [vmem:[%s461_s4] sm:$0xff] }
   0xa   :  { %117 = vmatpush.bf16.msra.mxu0 %v282_v2  ;;  %287 = vmatpush.bf16.msra.mxu1 %v282_v2 }
   0xe   :  { %118 = vmatpush.bf16.msra.mxu0 %v281_v3  ;;  %288 = vmatpush.bf16.msra.mxu1 %v281_v3 }
  0x12   :  { %119 = vmatpush.bf16.msra.mxu0 %v280_v4  ;;  %289 = vmatpush.bf16.msra.mxu1 %v280_v4 }
  0x16   :  { %120 = vmatpush.bf16.msra.mxu0 %v279_v5  ;;  %290 = vmatpush.bf16.msra.mxu1 %v279_v5 }
  0x1a   :  { %121 = vmatpush.bf16.msra.mxu0 %v278_v6  ;;  %291 = vmatpush.bf16.msra.mxu1 %v278_v6 }
  0x1e   :  { %122 = vmatpush.bf16.msra.mxu0 %v277_v7  ;;  %292 = vmatpush.bf16.msra.mxu1 %v277_v7 }
  0x21   :  { %123 = vmatmul.bf16.vlgmr.msra.gmra.mxu0 %v275_v8  ;;  %128 = vmatmul.bf16.vlgmr.msra.gmra.mxu1 %v276_v9 }
  0x9e   :  { %v124_v11 = vpop.f32.mrf.mxu0  ;;  %v129_v13 = vpop.f32.mrf.mxu1 }
  0x9f   :  { %v153_v15 = vadd.f32 %v296_v10, %v124_v11  ;;  %v155_v16 = vadd.f32 %v296_v10, %v129_v13 }
  0xa1   :  { %v161_v17 = vadd.f32 %v157_v12, %v153_v15  ;;  %v163_v18 = vadd.f32 %v159_v14, %v155_v16 }
  0xa3   :  { %v165_v19 = vmul.f32 0.5, %v161_v17  ;;  %297 = vtanh.f32 %v161_v17  ;;  %v167_v20 = vmul.f32 0.5, %v163_v18 }
  0xa4   :  { %299 = vtanh.f32 %v163_v18 }
  0xa5   :  { %301 = vtanh.f32 %v165_v19 }
  0xa6   :  { %303 = vtanh.f32 %v167_v20  ;;  %v126_v21 = vpop.f32.mrf.mxu0  ;;  %v131_v23 = vpop.f32.mrf.mxu1 }
  0xa7   :  { %v154_v25 = vadd.f32 %v296_v10, %v126_v21  ;;  %v156_v26 = vadd.f32 %v296_v10, %v131_v23 }
  0xa9   :  { %v298_v27 = vpop.eup %297  ;;  %v162_v28 = vadd.f32 %v158_v22, %v154_v25  ;;  %v164_v29 = vadd.f32 %v160_v24, %v156_v26 }
  0xaa   :  { %v300_v30 = vpop.eup %299  ;;  %v189_v40 = vadd.f32 %v298_v27, %v185_v32 }
  0xab   :  { %v302_v31 = vpop.eup %301  ;;  %v166_v33 = vmul.f32 0.5, %v162_v28  ;;  %305 = vtanh.f32 %v162_v28  ;;  %v168_v34 = vmul.f32 0.5, %v164_v29  ;;  %v191_v42 = vadd.f32 %v300_v30, %v187_v37 }
  0xac   :  { %v304_v35 = vpop.eup %303  ;;  %v173_v36 = vadd.f32 1.0, %v302_v31  ;;  %307 = vtanh.f32 %v164_v29 }
  0xad   :  { %v175_v38 = vadd.f32 1.0, %v304_v35  ;;  %309 = vtanh.f32 %v166_v33 }
  0xae   :  { %v177_v39 = vmul.f32 0.5, %v173_v36  ;;  %311 = vtanh.f32 %v168_v34 }
  0xaf   :  { %v179_v41 = vmul.f32 0.5, %v175_v38 }
  0xb0   :  { %v193_v43 = vmul.f32 %v189_v40, %v177_v39 }
  0xb1   :  { %v306_v44 = vpop.eup %305  ;;  %v195_v45 = vmul.f32 %v191_v42, %v179_v41 }
  0xb2   :  { %v308_v46 = vpop.eup %307  ;;  %313 = vtanh.f32 %v193_v43  ;;  %209 = vst [vmem:[#allocation3] sm:$0xff] %v193_v43  ;;  %v190_v54 = vadd.f32 %v306_v44, %v186_v48 }
  0xb3   :  { %v310_v47 = vpop.eup %309  ;;  %315 = vtanh.f32 %v195_v45  ;;  %211 = vst [vmem:[#allocation3 + $0x10] sm:$0xff] %v195_v45  ;;  %v192_v56 = vadd.f32 %v308_v46, %v188_v51 }
  0xb4   :  { %v312_v49 = vpop.eup %311  ;;  %v174_v50 = vadd.f32 1.0, %v310_v47 }
  0xb5   :  { %v176_v52 = vadd.f32 1.0, %v312_v49 }
  0xb6   :  { %v178_v53 = vmul.f32 0.5, %v174_v50 }
  0xb7   :  { %v180_v55 = vmul.f32 0.5, %v176_v52 }
  0xb8   :  { %v314_v57 = vpop.eup %313  ;;  %v194_v58 = vmul.f32 %v190_v54, %v178_v53 }
  0xb9   :  { %v316_v59 = vpop.eup %315  ;;  %v201_v60 = vmul.f32 %v314_v57, %v177_v39  ;;  %v196_v61 = vmul.f32 %v192_v56, %v180_v55 }
  0xba   :  { %v203_v62 = vmul.f32 %v316_v59, %v179_v41  ;;  %317 = vtanh.f32 %v194_v58  ;;  %210 = vst [vmem:[#allocation3 + $0x8] sm:$0xff] %v194_v58 }
  0xbb   :  { %205 = vst [vmem:[%s462_s5] sm:$0xff] %v201_v60  ;;  %319 = vtanh.f32 %v196_v61 }
  0xbc   :  { %207 = vst [vmem:[%s462_s5 + $0x10] sm:$0xff] %v203_v62 }
  0xbd   :  { %212 = vst [vmem:[#allocation3 + $0x18] sm:$0xff] %v196_v61 }
  0xbe   :  { %227 = dma.vmem_to_hbm [thread:$0]  %s220_s8, 512, %s222_s11, [#allocation4], %s348_s6, %s348_s6, %s349_s15  }
  0xc0   :  { %v318_v63 = vpop.eup %317 }
  0xc1   :  { %v320_v0 = vpop.eup %319  ;;  %v202_v1 = vmul.f32 %v318_v63, %v178_v53 }
  0xc2   :  { %v204_v2 = vmul.f32 %v320_v0, %v180_v55 }
  0xc3   :  { %206 = vst [vmem:[%s462_s5 + $0x8] sm:$0xff] %v202_v1 }
  0xc4   :  { %208 = vst [vmem:[%s462_s5 + $0x18] sm:$0xff] %v204_v2 }
  0xc5   :  { %345 = dma.done.wait [#allocation4], 512  }
  0xc6   :  { %346 = vsyncadd [#allocation4], 4294966784 }
  0xc7   :  { %234 = vsyncpa [#allocation4], 1 }

// kernel: _lambda_.25
= control target key start
LH: loop header
LB: loop body
LE: loop exit
PB: predicated region body
PF: predicated region fallthrough
CT: control target
= control target key end

     0   :  { %s883_s12 = smov 0   ;;  %s1054_s0 = inlined_call_operand.vmem [shape: bf16[2,9,9,16], index: 0, kind: input, shape index: {}]   ;;  %s1055_s1 = inlined_call_operand.vmem [shape: bf16[64,128], index: 1, kind: input, shape index: {}]   ;;  %s1056_s2 = inlined_call_operand.vmem [shape: f32[1,128], index: 2, kind: input, shape index: {}]   ;;  %s1057_s3 = inlined_call_operand.vmem [shape: f32[2,64,128], index: 3, kind: output, shape index: {}]  }
   0x1 LB: > { %s720_s13 = sadd.s32 4294967295, %s858_s12   ;;  %p724_p0 = scmp.ge.s32.totalorder %s858_s12, 1  ;;  %s858_s12 = sphi %s883_s12, %s13_s12  }
   0x2   : > { %p137_p1 = scmp.lt.s32.totalorder %s858_s12, 3 }
   0x4   : > { %p138_p2 = pnand %p724_p0, %p137_p1 }
   0x5   : > { %p161_p3 = scmp.lt.s32.totalorder (!%p138_p2), %s720_s13, 1  ;;  %s860_s18 = smov (!%p138_p2), 32  }
   0x6   : > { %141 = sbr.rel (%p138_p2) target bundleno = 322 (0x142), region = 32  ;;  %s861_s19 = smov (!%p138_p2), 16  }
   0x7   : > { %s862_s24 = smov (!%p138_p2), 48  }
   0xb   : > { %s1061_s13 = smov (!%p161_p3, %s720_s13), 1  ;;  %vm188_vm0 = vsmask.f32 3328  ;;  %vm189_vm1 = vsmask.f32 7440  ;;  %v807_v30 = vld [vmem:[%s1055_s1] sm:$0xff] }
   0xc   : > { %s823_s14 = smul.u32 72, %s1061_s13  ;;  %vm914_vm2 = vmor %vm188_vm0, %vm189_vm1  ;;  %vm520_vm3 = vcmask 130048   ;;  %vm533_vm4 = vcmask 261120   ;;  %vm542_vm5 = vcmask 392192   ;;  %vm587_vm6 = vcmask 523264   ;;  %s798_s4 = sshll.u32 %s1061_s13, 6 }
   0xd   : > { %s1041_s7 = scalar_lea.vmem %s1057_s3, %s798_s4 }
   0xe   : > { %s897_s17 = scalar_lea.vmem %s1054_s0, %s823_s14 }
   0xf   : > { %v770_v0 = vld [vmem:[%s897_s17 + $0x28] sm:$0xf]  ;;  %v805_v1 = vld [vmem:[%s897_s17 + $0x2c] sm:$0xf0]  ;;  %v176_v2 = vld [vmem:[%s897_s17 + $0x20] sm:$0xf] }
  0x10   : > { %v771_v3 = vor.u32 %v805_v1, %v770_v0  ;;  %v177_v4 = vld [vmem:[%s897_s17 + $0x28] sm:$0xf]  ;;  %v184_v5 = vld [vmem:[%s897_s17 + $0x24] sm:$0x1]  ;;  %v185_v6 = vld [vmem:[%s897_s17 + $0x2c] sm:$0x1] }
  0x11   : > { %v248_v7 = vshrl.u32 %v176_v2, 16  ;;  %v251_v8 = vshll.u32 %v176_v2, 16  ;;  %v257_v9 = vshll.u32 %v184_v5, 16  ;;  %v262_v10 = vshrl.u32 %v177_v4, 16  ;;  %v774_v11 = vld [vmem:[%s897_s17 + $0x38] sm:$0xf] }
  0x12   : > { %496 = vrot.lane.b32.xlu1 %v771_v3, %s860_s18  ;;  %v265_v12 = vshll.u32 %v177_v4, 16  ;;  %v271_v13 = vshll.u32 %v185_v6, 16  ;;  %v806_v14 = vld [vmem:[%s897_s17 + $0x3c] sm:$0xf0]  ;;  %v178_v15 = vld [vmem:[%s897_s17 + $0x30] sm:$0xf] }
  0x13   : > { %v250_v16 = vrot.slane %v248_v7, 4  ;;  %v253_v17 = vrot.slane %v251_v8, 5  ;;  %v259_v18 = vrot.slane %v257_v9, 5  ;;  %v264_v19 = vrot.slane %v262_v10, 4  ;;  %v179_v20 = vld [vmem:[%s897_s17 + $0x38] sm:$0xf] }
  0x14   : > { %v267_v21 = vrot.slane %v265_v12, 5  ;;  %v273_v22 = vrot.slane %v271_v13, 5  ;;  %v775_v23 = vor.u32 %v806_v14, %v774_v11  ;;  %v186_v24 = vld [vmem:[%s897_s17 + $0x34] sm:$0x1]  ;;  %v187_v25 = vld [vmem:[%s897_s17 + $0x3c] sm:$0x1] }
  0x15   : > { %v254_v26 = vor.u32 %v253_v17, %v250_v16  ;;  %v276_v27 = vshrl.u32 %v178_v15, 16  ;;  %v279_v28 = vshll.u32 %v178_v15, 16  ;;  %v285_v29 = vshll.u32 %v186_v24, 16  ;;  %v174_v35 = vld [vmem:[%s897_s17 + $0x10] sm:$0xf] }
  0x16   : > { %v268_v31 = vor.u32 %v267_v21, %v264_v19  ;;  %v290_v32 = vshrl.u32 %v179_v20, 16  ;;  %v293_v33 = vshll.u32 %v179_v20, 16  ;;  %v299_v34 = vshll.u32 %v187_v25, 16  ;;  %v182_v40 = vld [vmem:[%s897_s17 + $0x14] sm:$0x1] }
  0x17   : > { %v255_v36 = vrot.slane %v254_v26, 4  ;;  %v278_v37 = vrot.slane %v276_v27, 4  ;;  %v281_v38 = vrot.slane %v279_v28, 5  ;;  %v287_v39 = vrot.slane %v285_v29, 5  ;;  %v175_v47 = vld [vmem:[%s897_s17 + $0x18] sm:$0xf] }
  0x18   : > { %v269_v41 = vrot.slane %v268_v31, 4  ;;  %v292_v42 = vrot.slane %v290_v32, 4  ;;  %v295_v43 = vrot.slane %v293_v33, 5  ;;  %v301_v44 = vrot.slane %v299_v34, 5  ;;  %v183_v53 = vld [vmem:[%s897_s17 + $0x1c] sm:$0x1] }
  0x19   : > { %v260_v45 = vsel %vm914_vm2, %v255_v36, %v259_v18  ;;  %v282_v46 = vor.u32 %v281_v38, %v278_v37  ;;  %v220_v48 = vshrl.u32 %v174_v35, 16  ;;  %v223_v49 = vshll.u32 %v174_v35, 16  ;;  %v172_v63 = vld [vmem:[%s897_s17] sm:$0xf]  ;;  %v173_v4 = vld [vmem:[%s897_s17 + $0x8] sm:$0xf] }
  0x1a   : > { %v274_v50 = vsel %vm914_vm2, %v269_v41, %v273_v22  ;;  %v456_v51 = vunpack.c.l.b16 %v260_v45  ;;  %498 = vrot.lane.b32.xlu1 %v775_v23, %s860_s18  ;;  %v296_v52 = vor.u32 %v295_v43, %v292_v42  ;;  %v229_v54 = vshll.u32 %v182_v40, 16  ;;  %v180_v5 = vld [vmem:[%s897_s17 + $0x4] sm:$0x1]  ;;  %v181_v10 = vld [vmem:[%s897_s17 + $0xc] sm:$0x1] }
  0x1b   : > { %v457_v55 = vunpack.c.l.b16 %v274_v50  ;;  %v283_v56 = vrot.slane %v282_v46, 4  ;;  %v222_v57 = vrot.slane %v220_v48, 4  ;;  %v225_v58 = vrot.slane %v223_v49, 5  ;;  %v762_v15 = vld [vmem:[%s897_s17 + $0x8] sm:$0xf] }
  0x1c   : > { %v297_v59 = vrot.slane %v296_v52, 4  ;;  %v231_v60 = vrot.slane %v229_v54, 5  ;;  %v234_v61 = vshrl.u32 %v175_v47, 16  ;;  %v237_v62 = vshll.u32 %v175_v47, 16  ;;  %v803_v20 = vld [vmem:[%s897_s17 + $0xc] sm:$0xf0] }
  0x1d   : > { %v462_v0 = vpack.c.b16 %v457_v55, %v456_v51  ;;  %v288_v1 = vsel %vm914_vm2, %v283_v56, %v287_v39  ;;  %v226_v2 = vor.u32 %v225_v58, %v222_v57  ;;  %v243_v3 = vshll.u32 %v183_v53, 16  ;;  %v728_v25 = vld [vmem:[%s897_s17 + $0x8] sm:$0xf]  ;;  %v736_v31 = vld [vmem:[%s897_s17 + $0xc] sm:$0x1] }
  0x1e   : > { %v302_v6 = vsel %vm914_vm2, %v297_v59, %v301_v44  ;;  %v458_v7 = vunpack.c.l.b16 %v288_v1  ;;  %v236_v8 = vrot.slane %v234_v61, 4  ;;  %v239_v9 = vrot.slane %v237_v62, 5  ;;  %v729_v36 = vld [vmem:[%s897_s17 + $0x10] sm:$0xf]  ;;  %v737_v44 = vld [vmem:[%s897_s17 + $0x14] sm:$0x1] }
  0x1f   : > { %468 = vrot.lane.b32.xlu0 %v462_v0, %s861_s19  ;;  %v459_v11 = vunpack.c.l.b16 %v302_v6  ;;  %v227_v12 = vrot.slane %v226_v2, 4  ;;  %v245_v13 = vrot.slane %v243_v3, 5  ;;  %v192_v14 = vshrl.u32 %v172_v63, 16  ;;  %v948_v46 = vld [vmem:[%s897_s17 + $0x18] sm:$0xf] }
  0x20   : > { %v240_v16 = vor.u32 %v239_v9, %v236_v8  ;;  %v195_v17 = vshll.u32 %v172_v63, 16  ;;  %v201_v18 = vshll.u32 %v180_v5, 16  ;;  %v206_v19 = vshrl.u32 %v173_v4, 16  ;;  %v951_v51 = vld [vmem:[%s897_s17 + $0x1c] sm:$0xf0]  ;;  %v810_v3 = vld [vmem:[%s1055_s1 + $0x18] sm:$0xff] }
  0x21   : > { %v463_v21 = vpack.c.b16 %v459_v11, %v458_v7  ;;  %v232_v22 = vsel %vm914_vm2, %v227_v12, %v231_v60  ;;  %v194_v23 = vrot.slane %v192_v14, 4  ;;  %v209_v24 = vshll.u32 %v173_v4, 16  ;;  %v732_v56 = vld [vmem:[%s897_s17 + $0x28] sm:$0xf]  ;;  %v733_v61 = vld [vmem:[%s897_s17 + $0x30] sm:$0xf]  ;;  %812 = vmatpush.bf16.msra.mxu2 %v810_v3  ;;  %813 = vmatpush.bf16.msra.mxu3 %v810_v3 }
  0x22   : > { %v241_v26 = vrot.slane %v240_v16, 4  ;;  %v454_v27 = vunpack.c.l.b16 %v232_v22  ;;  %v197_v28 = vrot.slane %v195_v17, 5  ;;  %v203_v29 = vrot.slane %v201_v18, 5  ;;  %v740_v62 = vld [vmem:[%s897_s17 + $0x2c] sm:$0x1]  ;;  %v809_v14 = vld [vmem:[%s1055_s1 + $0x10] sm:$0xff]  ;;  %600 = vmatpush.bf16.msra.mxu0 %v810_v3  ;;  %811 = vmatpush.bf16.msra.mxu1 %v810_v3 }
  0x23   : > { %v208_v32 = vrot.slane %v206_v19, 4  ;;  %v211_v33 = vrot.slane %v209_v24, 5  ;;  %v215_v34 = vshll.u32 %v181_v10, 16  ;;  %v763_v35 = vor.u32 %v803_v20, %v762_v15  ;;  %v741_v7 = vld [vmem:[%s897_s17 + $0x34] sm:$0x1] }
  0x24   : > { %v246_v37 = vsel %vm914_vm2, %v241_v26, %v245_v13  ;;  %v198_v38 = vor.u32 %v197_v28, %v194_v23  ;;  %v321_v39 = vshrl.u32 %v728_v25, 16  ;;  %v324_v40 = vshll.u32 %v728_v25, 16  ;;  %v734_v13 = vld [vmem:[%s897_s17 + $0x38] sm:$0xf]  ;;  %v742_v19 = vld [vmem:[%s897_s17 + $0x3c] sm:$0x1] }
  0x25   : > { %v455_v41 = vunpack.c.l.b16 %v246_v37  ;;  %v212_v42 = vor.u32 %v211_v33, %v208_v32  ;;  %v217_v43 = vrot.slane %v215_v34, 5  ;;  %492 = vrot.lane.b32.xlu2 %v763_v35, %s860_s18  ;;  %v330_v45 = vshll.u32 %v736_v31, 16  ;;  %v743_v32 = vld [vmem:[%s897_s17 + $0x44] sm:$0x1]  ;;  %815 = vmatpush.bf16.msra.mxu2 %v809_v14 }
  0x26   : > { %v199_v47 = vrot.slane %v198_v38, 4  ;;  %v323_v48 = vrot.slane %v321_v39, 4  ;;  %v326_v49 = vrot.slane %v324_v40, 5  ;;  %v335_v50 = vshrl.u32 %v729_v36, 16  ;;  %v730_v39 = vld [vmem:[%s897_s17 + $0x18] sm:$0xf]  ;;  %816 = vmatpush.bf16.msra.mxu3 %v809_v14  ;;  %601 = vmatpush.bf16.msra.mxu0 %v809_v14 }
  0x27   : > { %470 = vrot.lane.b32.xlu0 %v463_v21, %s861_s19  ;;  %v461_v52 = vpack.c.b16 %v455_v41, %v454_v27  ;;  %v213_v53 = vrot.slane %v212_v42, 4  ;;  %v332_v54 = vrot.slane %v330_v45, 5  ;;  %v338_v55 = vshll.u32 %v729_v36, 16  ;;  %v735_v27 = vld [vmem:[%s897_s17 + $0x40] sm:$0xf]  ;;  %814 = vmatpush.bf16.msra.mxu1 %v809_v14 }
  0x28   : > { %v204_v57 = vsel %vm914_vm2, %v199_v47, %v203_v29  ;;  %v327_v58 = vor.u32 %v326_v49, %v323_v48  ;;  %v337_v59 = vrot.slane %v335_v50, 4  ;;  %v344_v60 = vshll.u32 %v737_v44, 16 }
  0x29   : > { %466 = vrot.lane.b32.xlu1 %v461_v52, %s861_s19  ;;  %v218_v63 = vsel %vm914_vm2, %v213_v53, %v217_v43  ;;  %v452_v0 = vunpack.c.l.b16 %v204_v57  ;;  %v340_v1 = vrot.slane %v338_v55, 5  ;;  %v767_v2 = vor.u32 %v951_v51, %v948_v46  ;;  %v731_v53 = vld [vmem:[%s897_s17 + $0x20] sm:$0xf] }
  0x2a   : > { %v453_v4 = vunpack.c.l.b16 %v218_v63  ;;  %v328_v5 = vrot.slane %v327_v58, 4  ;;  %v346_v6 = vrot.slane %v344_v60, 5  ;;  %v377_v8 = vshrl.u32 %v732_v56, 16  ;;  %v739_v60 = vld [vmem:[%s897_s17 + $0x24] sm:$0x1] }
  0x2b   : > { %v341_v9 = vor.u32 %v340_v1, %v337_v59  ;;  %v380_v10 = vshll.u32 %v732_v56, 16  ;;  %v386_v11 = vshll.u32 %v740_v62, 16  ;;  %v391_v12 = vshrl.u32 %v733_v61, 16 }
  0x2c   : > { %v460_v15 = vpack.c.b16 %v453_v4, %v452_v0  ;;  %v333_v16 = vsel %vm914_vm2, %v328_v5, %v332_v54  ;;  %v379_v17 = vrot.slane %v377_v8, 4  ;;  %v394_v18 = vshll.u32 %v733_v61, 16  ;;  %v738_v54 = vld [vmem:[%s897_s17 + $0x1c] sm:$0x1] }
  0x2d   : > { %v342_v20 = vrot.slane %v341_v9, 4  ;;  %v500_v21 = vunpack.c.l.b16 %v333_v16  ;;  %v382_v22 = vrot.slane %v380_v10, 5  ;;  %v388_v23 = vrot.slane %v386_v11, 5 }
  0x2e   : > { %v393_v24 = vrot.slane %v391_v12, 4  ;;  %v396_v25 = vrot.slane %v394_v18, 5  ;;  %v400_v26 = vshll.u32 %v741_v7, 16  ;;  %v405_v28 = vshrl.u32 %v734_v13, 16 }
  0x2f   : > { %464 = vrot.lane.b32.xlu0 %v460_v15, %s861_s19  ;;  %v347_v29 = vsel %vm914_vm2, %v342_v20, %v346_v6  ;;  %v383_v31 = vor.u32 %v382_v22, %v379_v17  ;;  %v408_v33 = vshll.u32 %v734_v13, 16  ;;  %v414_v34 = vshll.u32 %v742_v19, 16 }
  0x30   : > { %v501_v35 = vunpack.c.l.b16 %v347_v29  ;;  %v397_v36 = vor.u32 %v396_v25, %v393_v24  ;;  %v402_v37 = vrot.slane %v400_v26, 5  ;;  %v407_v38 = vrot.slane %v405_v28, 4  ;;  %v808_v25 = vld [vmem:[%s1055_s1 + $0x8] sm:$0xff]  ;;  %v754_v28 = vld [vmem:[%s897_s17 + $0x20] sm:$0xf] }
  0x31   : > { %v384_v40 = vrot.slane %v383_v31, 4  ;;  %v410_v41 = vrot.slane %v408_v33, 5  ;;  %v416_v42 = vrot.slane %v414_v34, 5  ;;  %v419_v43 = vshrl.u32 %v735_v27, 16  ;;  %818 = vmatpush.bf16.msra.mxu2 %v808_v25  ;;  %819 = vmatpush.bf16.msra.mxu3 %v808_v25  ;;  %v801_v29 = vld [vmem:[%s897_s17 + $0x24] sm:$0xf0] }
  0x32   : > { %v508_v44 = vpack.c.b16 %v501_v35, %v500_v21  ;;  %v398_v45 = vrot.slane %v397_v36, 4  ;;  %v422_v47 = vshll.u32 %v735_v27, 16  ;;  %v428_v48 = vshll.u32 %v743_v32, 16  ;;  %602 = vmatpush.bf16.msra.mxu0 %v808_v25  ;;  %817 = vmatpush.bf16.msra.mxu1 %v808_v25 }
  0x33   : > { %v389_v49 = vsel %vm914_vm2, %v384_v40, %v388_v23  ;;  %v411_v50 = vor.u32 %v410_v41, %v407_v38  ;;  %v421_v52 = vrot.slane %v419_v43, 4  ;;  %v349_v55 = vshrl.u32 %v730_v39, 16  ;;  %v802_v38 = vld [vmem:[%s897_s17 + $0x34] sm:$0xf0] }
  0x34   : > { %512 = vrot.lane.b32.xlu1 %v508_v44, %s862_s24  ;;  %v403_v56 = vsel %vm914_vm2, %v398_v45, %v402_v37  ;;  %v504_v57 = vunpack.c.l.b16 %v389_v49  ;;  %v424_v58 = vrot.slane %v422_v47, 5  ;;  %v430_v59 = vrot.slane %v428_v48, 5  ;;  %v758_v37 = vld [vmem:[%s897_s17 + $0x30] sm:$0xf]  ;;  %v746_v45 = vld [vmem:[%s897_s17] sm:$0xf] }
  0x35   : > { %v505_v61 = vunpack.c.l.b16 %v403_v56  ;;  %v412_v62 = vrot.slane %v411_v50, 4  ;;  %v351_v63 = vrot.slane %v349_v55, 4  ;;  %v352_v0 = vshll.u32 %v730_v39, 16  ;;  %821 = vmatpush.bf16.msra.mxu2 %v807_v30  ;;  %822 = vmatpush.bf16.msra.mxu3 %v807_v30  ;;  %v799_v47 = vld [vmem:[%s897_s17 + $0x4] sm:$0xf0] }
  0x36   : > { %v425_v1 = vor.u32 %v424_v58, %v421_v52  ;;  %v358_v3 = vshll.u32 %v738_v54, 16  ;;  %v363_v4 = vshrl.u32 %v731_v53, 16  ;;  %v366_v5 = vshll.u32 %v731_v53, 16  ;;  %603 = vmatpush.bf16.msra.mxu0 %v807_v30  ;;  %820 = vmatpush.bf16.msra.mxu1 %v807_v30  ;;  %v750_v53 = vld [vmem:[%s897_s17 + $0x10] sm:$0xf] }
  0x37   : > { %494 = vrot.lane.b32.xlu0 %v767_v2, %s860_s18  ;;  %v510_v6 = vpack.c.b16 %v505_v61, %v504_v57  ;;  %v417_v7 = vsel %vm914_vm2, %v412_v62, %v416_v42  ;;  %v354_v8 = vrot.slane %v352_v0, 5  ;;  %v372_v9 = vshll.u32 %v739_v60, 16  ;;  %v800_v54 = vld [vmem:[%s897_s17 + $0x14] sm:$0xf0] }
  0x38   : > { %v426_v10 = vrot.slane %v425_v1, 4  ;;  %v365_v11 = vrot.slane %v363_v4, 4  ;;  %v506_v12 = vunpack.c.l.b16 %v417_v7  ;;  %v368_v14 = vrot.slane %v366_v5, 5  ;;  %v835_v1 = vld [vmem:[%s1056_s2] ss:$0 sm:$0xff] }
  0x39   : > { %516 = vrot.lane.b32.xlu2 %v510_v6, %s862_s24  ;;  %v355_v13 = vor.u32 %v354_v8, %v351_v63  ;;  %v360_v16 = vrot.slane %v358_v3, 5  ;;  %v374_v2 = vrot.slane %v372_v9, 5  ;;  %v755_v31 = vor.u32 %v801_v29, %v754_v28 }
  0x3a   : > { %v431_v15 = vsel %vm914_vm2, %v426_v10, %v430_v59  ;;  %v369_v51 = vor.u32 %v368_v14, %v365_v11  ;;  %v759_v40 = vor.u32 %v802_v38, %v758_v37  ;;  %v747_v50 = vor.u32 %v799_v47, %v746_v45 }
  0x3b   : > { %v507_v17 = vunpack.c.l.b16 %v431_v15  ;;  %v356_v46 = vrot.slane %v355_v13, 4  ;;  %v751_v57 = vor.u32 %v800_v54, %v750_v53 }
  0x3c   : > { %v370_v19 = vrot.slane %v369_v51, 4 }
  0x3d   : > { %v511_v18 = vpack.c.b16 %v507_v17, %v506_v12  ;;  %v361_v20 = vsel %vm914_vm2, %v356_v46, %v360_v16 }
  0x3e   : > { %v375_v21 = vsel %vm914_vm2, %v370_v19, %v374_v2  ;;  %v502_v22 = vunpack.c.l.b16 %v361_v20 }
  0x3f   : > { %v503_v23 = vunpack.c.l.b16 %v375_v21 }
  0x41   : > { %518 = vrot.lane.b32.xlu2 %v511_v18, %s862_s24  ;;  %v509_v24 = vpack.c.b16 %v503_v23, %v502_v22 }
  0x49   : > { %514 = vrot.lane.b32.xlu2 %v509_v24, %s862_s24 }
  0x7f   : > { %v493_v27 = vpop.permute.xlu2 %492 }
  0x84   : > { %v497_v26 = vpop.permute.xlu1 %496 }
  0x8c   : > { %v499_v34 = vpop.permute.xlu1 %498 }
  0x91   : > { %v469_v32 = vpop.permute.xlu0 %468 }
  0x92   : > { %v529_v33 = vsel %vm520_vm3, %v755_v31, %v469_v32 }
  0x93   : > { %v517_v35 = vpop.permute.xlu2 %516  ;;  %v539_v36 = vsel %vm533_vm4, %v529_v33, %v497_v26 }
  0x94   : > { %v548_v39 = vsel %vm542_vm5, %v539_v36, %v517_v35 }
  0x95   : > { %794 = vmatmul.msk.bf16.vlgmr.msra.gmra.mxu2 %vm587_vm6, %v548_v39 }
  0x99   : > { %v471_v41 = vpop.permute.xlu0 %470 }
  0x9a   : > { %v532_v42 = vsel %vm520_vm3, %v759_v40, %v471_v41 }
  0x9b   : > { %v519_v43 = vpop.permute.xlu2 %518  ;;  %v541_v44 = vsel %vm533_vm4, %v532_v42, %v499_v34  ;;  %v467_v48 = vpop.permute.xlu1 %466 }
  0x9c   : > { %v550_v49 = vsel %vm542_vm5, %v541_v44, %v519_v43  ;;  %v526_v61 = vsel %vm520_vm3, %v751_v57, %v467_v48 }
  0x9d   : > { %795 = vmatmul.msk.bf16.vlgmr.msra.gmra.mxu3 %vm587_vm6, %v550_v49 }
  0xa1   : > { %v465_v52 = vpop.permute.xlu0 %464 }
  0xa2   : > { %v523_v55 = vsel %vm520_vm3, %v747_v50, %v465_v52 }
  0xa3   : > { %v535_v56 = vsel %vm533_vm4, %v523_v55, %v493_v27  ;;  %v515_v60 = vpop.permute.xlu2 %514 }
  0xa6   : > { %v513_v58 = vpop.permute.xlu1 %512 }
  0xa7   : > { %v544_v59 = vsel %vm542_vm5, %v535_v56, %v513_v58 }
  0xa8   : > { %792 = vmatmul.msk.bf16.vlgmr.msra.gmra.mxu0 %vm587_vm6, %v544_v59 }
  0xa9   : > { %v495_v62 = vpop.permute.xlu0 %494 }
  0xaa   : > { %v537_v63 = vsel %vm533_vm4, %v526_v61, %v495_v62 }
  0xab   : > { %v546_v0 = vsel %vm542_vm5, %v537_v63, %v515_v60 }
  0xac   : > { %793 = vmatmul.msk.bf16.vlgmr.msra.gmra.mxu1 %vm587_vm6, %v546_v0 }
 0x118   : > { %v615_v3 = vpop.f32.mrf.mxu2 }
 0x119   : > { %v616_v4 = vadd.f32 %v835_v1, %v615_v3 }
 0x11b   : > { %v629_v5 = vmul.f32 0.5, %v616_v4 }
 0x11d   : > { %836 = vtanh.f32 %v629_v5 }
 0x120   : > { %v617_v6 = vpop.f32.mrf.mxu2  ;;  %v620_v7 = vpop.f32.mrf.mxu3 }
 0x121   : > { %v618_v8 = vadd.f32 %v835_v1, %v617_v6  ;;  %v621_v9 = vadd.f32 %v835_v1, %v620_v7 }
 0x123   : > { %v837_v10 = vpop.eup %836  ;;  %v630_v11 = vmul.f32 0.5, %v618_v8  ;;  %v631_v12 = vmul.f32 0.5, %v621_v9 }
 0x124   : > { %v645_v13 = vadd.f32 1.0, %v837_v10 }
 0x125   : > { %838 = vtanh.f32 %v630_v11  ;;  %v605_v14 = vpop.f32.mrf.mxu0 }
 0x126   : > { %v653_v15 = vmul.f32 0.5, %v645_v13  ;;  %840 = vtanh.f32 %v631_v12  ;;  %v606_v16 = vadd.f32 %v835_v1, %v605_v14 }
 0x128   : > { %661 = vst [vmem:[%s1041_s7 + $0x20] sm:$0xff] %v653_v15  ;;  %v625_v17 = vmul.f32 0.5, %v606_v16  ;;  %v622_v46 = vpop.f32.mrf.mxu3 }
 0x129   : > { %v623_v51 = vadd.f32 %v835_v1, %v622_v46  ;;  %v610_v2 = vpop.f32.mrf.mxu1 }
 0x12a   : > { %842 = vtanh.f32 %v625_v17  ;;  %v611_v18 = vadd.f32 %v835_v1, %v610_v2 }
 0x12b   : > { %v839_v19 = vpop.eup %838  ;;  %v632_v20 = vmul.f32 0.5, %v623_v51 }
 0x12c   : > { %v841_v21 = vpop.eup %840  ;;  %v646_v22 = vadd.f32 1.0, %v839_v19  ;;  %v627_v23 = vmul.f32 0.5, %v611_v18 }
 0x12d   : > { %v647_v24 = vadd.f32 1.0, %v841_v21  ;;  %844 = vtanh.f32 %v632_v20  ;;  %v607_v25 = vpop.f32.mrf.mxu0 }
 0x12e   : > { %v654_v30 = vmul.f32 0.5, %v646_v22  ;;  %846 = vtanh.f32 %v627_v23  ;;  %v608_v26 = vadd.f32 %v835_v1, %v607_v25 }
 0x12f   : > { %v655_v27 = vmul.f32 0.5, %v647_v24 }
 0x130   : > { %v843_v28 = vpop.eup %842  ;;  %662 = vst [vmem:[%s1041_s7 + $0x28] sm:$0xff] %v654_v30  ;;  %v626_v29 = vmul.f32 0.5, %v608_v26 }
 0x131   : > { %663 = vst [vmem:[%s1041_s7 + $0x30] sm:$0xff] %v655_v27  ;;  %v641_v31 = vadd.f32 1.0, %v843_v28  ;;  %v612_v32 = vpop.f32.mrf.mxu1 }
 0x132   : > { %848 = vtanh.f32 %v626_v29  ;;  %v613_v33 = vadd.f32 %v835_v1, %v612_v32 }
 0x133   : > { %v845_v34 = vpop.eup %844  ;;  %v649_v35 = vmul.f32 0.5, %v641_v31 }
 0x134   : > { %v847_v36 = vpop.eup %846  ;;  %v648_v37 = vadd.f32 1.0, %v845_v34  ;;  %v628_v38 = vmul.f32 0.5, %v613_v33 }
 0x135   : > { %657 = vst [vmem:[%s1041_s7] sm:$0xff] %v649_v35  ;;  %v643_v39 = vadd.f32 1.0, %v847_v36 }
 0x136   : > { %v656_v40 = vmul.f32 0.5, %v648_v37  ;;  %850 = vtanh.f32 %v628_v38 }
 0x137   : > { %v651_v41 = vmul.f32 0.5, %v643_v39 }
 0x138   : > { %v849_v42 = vpop.eup %848  ;;  %664 = vst [vmem:[%s1041_s7 + $0x38] sm:$0xff] %v656_v40 }
 0x139   : > { %659 = vst [vmem:[%s1041_s7 + $0x10] sm:$0xff] %v651_v41  ;;  %v642_v43 = vadd.f32 1.0, %v849_v42 }
 0x13b   : > { %v650_v44 = vmul.f32 0.5, %v642_v43 }
 0x13c   : > { %v851_v45 = vpop.eup %850 }
 0x13d   : > { %658 = vst [vmem:[%s1041_s7 + $0x8] sm:$0xff] %v650_v44  ;;  %v644_v47 = vadd.f32 1.0, %v851_v45 }
 0x13f   : > { %v652_v48 = vmul.f32 0.5, %v644_v47 }
 0x141   : > { %660 = vst [vmem:[%s1041_s7 + $0x18] sm:$0xff] %v652_v48 }
 0x142 PF: > { %s13_s12 = sadd.s32 1, %s858_s12  }
 0x143   : > { %p10_p4 = scmp.ge.s32.totalorder %s13_s12, 4  }
 0x145   :  { %12 = sbr.rel (!%p10_p4) target bundleno = 1 (0x1), region = 63 }

// kernel: _lambda_.24
= control target key start
LH: loop header
LB: loop body
LE: loop exit
PB: predicated region body
PF: predicated region fallthrough
CT: control target
= control target key end

     0   :  { %s727_s26 = smov 16   ;;  %vm63_vm0 = vcmask 261120   ;;  %vm112_vm1 = vcmask 130048   ;;  %s731_s6 = smov 80   ;;  %v732_v20 = vmov 16.0   ;;  %s1380_s1 = inlined_call_operand.vmem [shape: bf16[32,128], index: 1, kind: input, shape index: {}]   ;;  %s1381_s4 = inlined_call_operand.vmem [shape: f32[1,16], index: 4, kind: input, shape index: {}]   ;;  %s1382_s3 = inlined_call_operand.vmem [shape: f32[1,16], index: 3, kind: input, shape index: {}]   ;;  %s1383_s2 = inlined_call_operand.vmem [shape: f32[1,128], index: 2, kind: input, shape index: {}]   ;;  %s1384_s0 = inlined_call_operand.vmem [shape: bf16[32,32], index: 0, kind: input, shape index: {}]   ;;  %s1385_s5 = inlined_call_operand.vmem [shape: bf16[32,128], index: 5, kind: output, shape index: {}]  }
   0x1   :  { %v669_v0 = vld [vmem:[%s1380_s1 + $0x8] sm:$0xff]  ;;  %v668_v1 = vld [vmem:[%s1380_s1] sm:$0xff]  ;;  %693 = vrcp.f32 %v732_v20  ;;  %s733_s7 = smov 48  }
   0x2   :  { %v773_v2 = vld [vmem:[%s1381_s4] ss:$0 sm:$0xff]  ;;  %76 = vmatpush.bf16.msra.mxu0 %v669_v0  ;;  %681 = vmatpush.bf16.msra.mxu1 %v669_v0  ;;  %v667_v5 = vld [vmem:[%s1384_s0 + $0x8] sm:$0xff] }
   0x3   :  { %v778_v3 = vld [vmem:[%s1382_s3] ss:$0 sm:$0xff]  ;;  %351 = vrot.lane.b32.xlu0 %v773_v2, %s727_s26  ;;  %s728_s3 = smov 32  }
   0x4   :  { %344 = vrot.lane.b32.xlu2 %v778_v3, %s727_s26  ;;  %v666_v4 = vld [vmem:[%s1384_s0] sm:$0xff]  ;;  %s729_s0 = smov 112  }
   0x5   :  { %v692_v6 = vld [vmem:[%s1383_s2] ss:$0 sm:$0xff]  ;;  %s730_s2 = smov 96  }
   0x6   :  { %77 = vmatpush.bf16.msra.mxu0 %v668_v1  ;;  %682 = vmatpush.bf16.msra.mxu1 %v668_v1 }
   0x7   :  { %v694_v23 = vpop.eup %693 }
   0x8   :  { %v126_v26 = vmul.f32 16.0, %v694_v23  ;;  %vm130_vm2 = vweird.f32 %v694_v23 }
   0x9   :  { %664 = vmatmul.msk.bf16.vlgmr.msra.gmra.mxu0 %vm63_vm0, %v666_v4  ;;  %665 = vmatmul.msk.bf16.vlgmr.msra.gmra.mxu1 %vm63_vm0, %v667_v5 }
   0xa   :  { %v127_v27 = vsub.f32 1.0, %v126_v26 }
   0xb   :  { %474 = vrot.lane.b32.xlu0 %v778_v3, %s728_s3 }
   0xc   :  { %v128_v30 = vmul.f32 %v694_v23, %v127_v27 }
   0xe   :  { %v129_v31 = vadd.f32 %v694_v23, %v128_v30 }
  0x10   :  { %v842_v34 = vsel %vm130_vm2, %v694_v23, %v129_v31 }
  0x5e   :  { %v833_v18 = vpop.permute.xlu2 %344 }
  0x75   :  { %v838_v24 = vpop.permute.xlu0 %351 }
  0x7d   :  { %v840_v29 = vpop.permute.xlu0 %474 }
  0x86   :  { %v79_v7 = vpop.f32.mrf.mxu0  ;;  %v84_v8 = vpop.f32.mrf.mxu1 }
  0x87   :  { %v795_v9 = vadd.f32 %v692_v6, %v79_v7  ;;  %v797_v10 = vadd.f32 %v692_v6, %v84_v8 }
  0x89   :  { %232 = vrot.lane.b32.xlu1 %v797_v10, %s729_s0  ;;  %228 = vrot.lane.b32.xlu2 %v795_v9, %s729_s0  ;;  %v113_v11 = vsel %vm112_vm1, %v795_v9, 0.0  ;;  %v119_v17 = vsel %vm112_vm1, %v797_v10, 0.0 }
  0x8a   :  { %114 = vadd.xlane.f32.xlu0 %v113_v11 }
  0x8e   :  { %v86_v12 = vpop.f32.mrf.mxu1  ;;  %v81_v14 = vpop.f32.mrf.mxu0 }
  0x8f   :  { %v805_v13 = vadd.f32 %v692_v6, %v86_v12  ;;  %v811_v15 = vadd.f32 %v692_v6, %v81_v14 }
  0x91   :  { %358 = vrot.lane.b32.xlu1 %v795_v9, %s730_s2  ;;  %234 = vrot.lane.b32.xlu2 %v805_v13, %s729_s0  ;;  %v116_v16 = vsel %vm112_vm1, %v811_v15, 0.0  ;;  %v122_v19 = vsel %vm112_vm1, %v805_v13, 0.0 }
  0x99   :  { %362 = vrot.lane.b32.xlu1 %v797_v10, %s730_s2  ;;  %360 = vrot.lane.b32.xlu2 %v811_v15, %s730_s2 }
  0x9e   :  { %230 = vrot.lane.b32.xlu0 %v811_v15, %s729_s0 }
  0xa1   :  { %488 = vrot.lane.b32.xlu1 %v795_v9, %s731_s6  ;;  %364 = vrot.lane.b32.xlu2 %v805_v13, %s730_s2 }
  0xa9   :  { %492 = vrot.lane.b32.xlu1 %v797_v10, %s731_s6  ;;  %490 = vrot.lane.b32.xlu2 %v811_v15, %s731_s6 }
  0xb1   :  { %494 = vrot.lane.b32.xlu2 %v805_v13, %s731_s6 }
  0xc8   :  { %117 = vadd.xlane.f32.xlu0 %v116_v16 }
  0xd3   :  { %120 = vadd.xlane.f32.xlu1 %v119_v17 }
  0xdb   :  { %123 = vadd.xlane.f32.xlu1 %v122_v19 }
  0xe3   :  { %v229_v21 = vpop.permute.xlu2 %228 }
  0xe4   :  { %v240_v22 = vsel %vm112_vm1, %v229_v21, 0.0 }
  0xe5   :  { %241 = vadd.xlane.f32.xlu0 %v240_v22 }
  0xeb   :  { %v235_v25 = vpop.permute.xlu2 %234 }
  0xec   :  { %v249_v8 = vsel %vm112_vm1, %v235_v25, 0.0 }
  0xf3   :  { %v361_v28 = vpop.permute.xlu2 %360 }
  0xf4   :  { %v373_v52 = vsel %vm112_vm1, %v361_v28, 0.0 }
  0xfb   :  { %v233_v32 = vpop.permute.xlu1 %232  ;;  %v365_v33 = vpop.permute.xlu2 %364 }
  0xfc   :  { %v246_v35 = vsel %vm112_vm1, %v233_v32, 0.0  ;;  %v379_v16 = vsel %vm112_vm1, %v365_v33, 0.0 }
  0xfd   :  { %247 = vadd.xlane.f32.xlu1 %v246_v35  ;;  %v115_v36 = vpop.xlane.xlu0 %114 }
  0xfe   :  { %v132_v37 = vmul.f32 %v842_v34, %v115_v36 }
 0x100   :  { %v847_v38 = vsub.f32 %v795_v9, %v132_v37 }
 0x102   :  { %v140_v39 = vmul.f32 %v847_v38, %v847_v38 }
 0x103   :  { %v359_v40 = vpop.permute.xlu1 %358  ;;  %v491_v41 = vpop.permute.xlu2 %490 }
 0x104   :  { %v370_v42 = vsel %vm112_vm1, %v359_v40, 0.0  ;;  %v144_v43 = vsel %vm112_vm1, %v140_v39, 0.0  ;;  %v503_v19 = vsel %vm112_vm1, %v491_v41, 0.0 }
 0x105   :  { %371 = vadd.xlane.f32.xlu1 %v370_v42  ;;  %145 = vadd.xlane.f32.xlu2 %v144_v43 }
 0x10b   :  { %v363_v44 = vpop.permute.xlu1 %362  ;;  %v495_v45 = vpop.permute.xlu2 %494 }
 0x10c   :  { %v509_v46 = vsel %vm112_vm1, %v495_v45, 0.0  ;;  %v376_v47 = vsel %vm112_vm1, %v363_v44, 0.0 }
 0x10d   :  { %510 = vadd.xlane.f32.xlu1 %v509_v46  ;;  %377 = vadd.xlane.f32.xlu0 %v376_v47 }
 0x110   :  { %v231_v48 = vpop.permute.xlu0 %230 }
 0x111   :  { %v243_v49 = vsel %vm112_vm1, %v231_v48, 0.0 }
 0x112   :  { %244 = vadd.xlane.f32.xlu2 %v243_v49 }
 0x113   :  { %v489_v50 = vpop.permute.xlu1 %488 }
 0x114   :  { %v500_v51 = vsel %vm112_vm1, %v489_v50, 0.0 }
 0x115   :  { %501 = vadd.xlane.f32.xlu0 %v500_v51 }
 0x11a   :  { %374 = vadd.xlane.f32.xlu2 %v373_v52 }
 0x11b   :  { %v493_v53 = vpop.permute.xlu1 %492 }
 0x11c   :  { %v506_v54 = vsel %vm112_vm1, %v493_v53, 0.0 }
 0x11d   :  { %507 = vadd.xlane.f32.xlu0 %v506_v54 }
 0x13b   :  { %v118_v55 = vpop.xlane.xlu0 %117 }
 0x13c   :  { %v133_v56 = vmul.f32 %v842_v34, %v118_v55 }
 0x13e   :  { %v861_v57 = vsub.f32 %v811_v15, %v133_v56 }
 0x140   :  { %v141_v58 = vmul.f32 %v861_v57, %v861_v57 }
 0x142   :  { %v147_v59 = vsel %vm112_vm1, %v141_v58, 0.0 }
 0x143   :  { %148 = vadd.xlane.f32.xlu2 %v147_v59 }
 0x146   :  { %v121_v60 = vpop.xlane.xlu1 %120 }
 0x147   :  { %v134_v61 = vmul.f32 %v842_v34, %v121_v60 }
 0x149   :  { %v868_v62 = vsub.f32 %v797_v10, %v134_v61 }
 0x14b   :  { %v142_v63 = vmul.f32 %v868_v62, %v868_v62 }
 0x14d   :  { %v150_v0 = vsel %vm112_vm1, %v142_v63, 0.0 }
 0x14e   :  { %v124_v1 = vpop.xlane.xlu1 %123  ;;  %151 = vadd.xlane.f32.xlu0 %v150_v0 }
 0x14f   :  { %v135_v4 = vmul.f32 %v842_v34, %v124_v1 }
 0x151   :  { %v875_v5 = vsub.f32 %v805_v13, %v135_v4 }
 0x153   :  { %v143_v6 = vmul.f32 %v875_v5, %v875_v5 }
 0x155   :  { %v153_v7 = vsel %vm112_vm1, %v143_v6, 0.0 }
 0x156   :  { %154 = vadd.xlane.f32.xlu1 %v153_v7  ;;  %250 = vadd.xlane.f32.xlu0 %v249_v8 }
 0x158   :  { %v242_v11 = vpop.xlane.xlu0 %241 }
 0x159   :  { %v252_v12 = vmul.f32 %v242_v11, %v842_v34 }
 0x15b   :  { %v883_v14 = vsub.f32 %v795_v9, %v252_v12 }
 0x15d   :  { %v260_v17 = vmul.f32 %v883_v14, %v883_v14 }
 0x15e   :  { %380 = vadd.xlane.f32.xlu0 %v379_v16 }
 0x15f   :  { %268 = vrot.lane.b32.xlu2 %v260_v17, %s729_s0 }
 0x166   :  { %504 = vadd.xlane.f32.xlu0 %v503_v19 }
 0x170   :  { %v248_v20 = vpop.xlane.xlu1 %247 }
 0x171   :  { %v254_v21 = vmul.f32 %v248_v20, %v842_v34 }
 0x173   :  { %v892_v22 = vsub.f32 %v797_v10, %v254_v21 }
 0x175   :  { %v262_v25 = vmul.f32 %v892_v22, %v892_v22 }
 0x178   :  { %v372_v23 = vpop.xlane.xlu1 %371  ;;  %v901_v28 = vpop.xlane.xlu2 %145 }
 0x179   :  { %v382_v26 = vmul.f32 %v372_v23, %v842_v34 }
 0x17a   :  { %272 = vrot.lane.b32.xlu0 %v262_v25, %s729_s0 }
 0x17b   :  { %v899_v27 = vsub.f32 %v795_v9, %v382_v26 }
 0x17d   :  { %v390_v31 = vmul.f32 %v899_v27, %v899_v27 }
 0x180   :  { %v378_v30 = vpop.xlane.xlu0 %377  ;;  %v511_v51 = vpop.xlane.xlu1 %510 }
 0x181   :  { %v384_v32 = vmul.f32 %v378_v30, %v842_v34  ;;  %v515_v52 = vmul.f32 %v511_v51, %v842_v34  ;;  %v156_v51 = vmul.f32 %v901_v28, %v842_v34 }
 0x182   :  { %398 = vrot.lane.b32.xlu0 %v390_v31, %s730_s2 }
 0x183   :  { %v908_v33 = vsub.f32 %v797_v10, %v384_v32  ;;  %v943_v53 = vsub.f32 %v805_v13, %v515_v52  ;;  %v989_v52 = vadd.f32 1e-05, %v156_v51 }
 0x185   :  { %v245_v35 = vpop.xlane.xlu2 %244  ;;  %v392_v37 = vmul.f32 %v908_v33, %v908_v33  ;;  %v523_v54 = vmul.f32 %v943_v53, %v943_v53  ;;  %695 = vrsqrt.f32 %v989_v52  ;;  %vm170_vm4 = vweird.f32 %v989_v52 }
 0x186   :  { %v253_v41 = vmul.f32 %v245_v35, %v842_v34 }
 0x188   :  { %v502_v36 = vpop.xlane.xlu0 %501  ;;  %v922_v44 = vsub.f32 %v811_v15, %v253_v41 }
 0x189   :  { %v512_v39 = vmul.f32 %v502_v36, %v842_v34 }
 0x18a   :  { %402 = vrot.lane.b32.xlu0 %v392_v37, %s730_s2  ;;  %v261_v48 = vmul.f32 %v922_v44, %v922_v44 }
 0x18b   :  { %v915_v40 = vsub.f32 %v795_v9, %v512_v39  ;;  %v1002_v28 = vpop.eup %695 }
 0x18c   :  { %vm171_vm3 = vweird.f32 %v1002_v28 }
 0x18d   :  { %v520_v42 = vmul.f32 %v915_v40, %v915_v40  ;;  %v375_v46 = vpop.xlane.xlu2 %374  ;;  %vm1072_vm5 = vmor %vm170_vm4, %vm171_vm3 }
 0x18e   :  { %v383_v9 = vmul.f32 %v375_v46, %v842_v34 }
 0x18f   :  { %528 = vrot.lane.b32.xlu1 %v520_v42, %s731_s6 }
 0x190   :  { %v508_v43 = vpop.xlane.xlu0 %507  ;;  %v936_v50 = vsub.f32 %v811_v15, %v383_v9 }
 0x191   :  { %v514_v45 = vmul.f32 %v508_v43, %v842_v34 }
 0x192   :  { %1388 = vst [vmem:[#allocation3_spill] sm:$0xff] %v936_v50 }
 0x193   :  { %v926_v47 = vsub.f32 %v797_v10, %v514_v45  ;;  %v391_v10 = vmul.f32 %v936_v50, %v936_v50 }
 0x195   :  { %v522_v49 = vmul.f32 %v926_v47, %v926_v47 }
 0x197   :  { %270 = vrot.lane.b32.xlu1 %v261_v48, %s729_s0  ;;  %532 = vrot.lane.b32.xlu2 %v522_v49, %s731_s6 }
 0x19f   :  { %400 = vrot.lane.b32.xlu1 %v391_v10, %s730_s2 }
 0x1a7   :  { %534 = vrot.lane.b32.xlu1 %v523_v54, %s731_s6 }
 0x1b6   :  { %v149_v11 = vpop.xlane.xlu2 %148 }
 0x1b7   :  { %v157_v54 = vmul.f32 %v149_v11, %v842_v34 }
 0x1be   :  { %v269_v16 = vpop.permute.xlu2 %268 }
 0x1bf   :  { %v280_v25 = vsel %vm112_vm1, %v269_v16, 0.0 }
 0x1c1   :  { %v948_v55 = vpop.xlane.xlu0 %151 }
 0x1c9   :  { %v251_v56 = vpop.xlane.xlu0 %250 }
 0x1ca   :  { %v255_v58 = vmul.f32 %v251_v56, %v842_v34 }
 0x1cc   :  { %v952_v59 = vsub.f32 %v805_v13, %v255_v58  ;;  %v158_v58 = vmul.f32 %v948_v55, %v842_v34 }
 0x1ce   :  { %v263_v60 = vmul.f32 %v952_v59, %v952_v59 }
 0x1d0   :  { %274 = vrot.lane.b32.xlu2 %v263_v60, %s729_s0 }
 0x1d1   :  { %v381_v61 = vpop.xlane.xlu0 %380 }
 0x1d2   :  { %v385_v63 = vmul.f32 %v381_v61, %v842_v34 }
 0x1d4   :  { %v959_v0 = vsub.f32 %v805_v13, %v385_v63  ;;  %v155_v13 = vpop.xlane.xlu1 %154  ;;  %v996_v63 = vadd.f32 1e-05, %v157_v54 }
 0x1d5   :  { %v159_v60 = vmul.f32 %v155_v13, %v842_v34 }
 0x1d6   :  { %v393_v1 = vmul.f32 %v959_v0, %v959_v0  ;;  %697 = vrsqrt.f32 %v996_v63  ;;  %vm180_vm7 = vweird.f32 %v996_v63 }
 0x1d8   :  { %404 = vrot.lane.b32.xlu2 %v393_v1, %s730_s2  ;;  %v998_v1 = vadd.f32 1e-05, %v158_v58 }
 0x1d9   :  { %v505_v4 = vpop.xlane.xlu0 %504 }
 0x1da   :  { %v513_v6 = vmul.f32 %v505_v4, %v842_v34  ;;  %v1000_v4 = vadd.f32 1e-05, %v159_v60  ;;  %699 = vrsqrt.f32 %v998_v1  ;;  %vm190_vm11 = vweird.f32 %v998_v1 }
 0x1dc   :  { %v966_v7 = vsub.f32 %v811_v15, %v513_v6  ;;  %701 = vrsqrt.f32 %v1000_v4  ;;  %vm200_vm13 = vweird.f32 %v1000_v4 }
 0x1de   :  { %1389 = vst [vmem:[#allocation4_spill] sm:$0xff] %v966_v7  ;;  %v521_v8 = vmul.f32 %v966_v7, %v966_v7 }
 0x1e0   :  { %530 = vrot.lane.b32.xlu0 %v521_v8, %s731_s6  ;;  %v165_v8 = vmul.f32 %v1002_v28, %v989_v52 }
 0x1e2   :  { %v166_v13 = vmul.f32 %v1002_v28, %v165_v8 }
 0x1ec   :  { %v273_v12 = vpop.permute.xlu0 %272 }
 0x1ed   :  { %v286_v31 = vsel %vm112_vm1, %v273_v12, 0.0  ;;  %v1009_v12 = vpop.eup %697 }
 0x1ee   :  { %vm181_vm6 = vweird.f32 %v1009_v12 }
 0x1ef   :  { %vm1110_vm10 = vmor %vm180_vm7, %vm181_vm6 }
 0x1f1   :  { %v533_v23 = vpop.permute.xlu2 %532 }
 0x1f2   :  { %v546_v15 = vsel %vm112_vm1, %v533_v23, 0.0 }
 0x1f4   :  { %v399_v17 = vpop.permute.xlu0 %398 }
 0x1f5   :  { %v410_v19 = vsel %vm112_vm1, %v399_v17, 0.0  ;;  %v1013_v17 = vpop.eup %699 }
 0x1f6   :  { %vm191_vm8 = vweird.f32 %v1013_v17 }
 0x1f7   :  { %vm1123_vm12 = vmor %vm190_vm11, %vm191_vm8 }
 0x1fc   :  { %v403_v32 = vpop.permute.xlu0 %402 }
 0x1fd   :  { %v416_v35 = vsel %vm112_vm1, %v403_v32, 0.0 }
 0x201   :  { %v529_v20 = vpop.permute.xlu1 %528  ;;  %411 = vadd.xlane.f32.xlu2 %v410_v19 }
 0x202   :  { %v540_v21 = vsel %vm112_vm1, %v529_v20, 0.0  ;;  %v1016_v20 = vpop.eup %701 }
 0x203   :  { %541 = vadd.xlane.f32.xlu1 %v540_v21  ;;  %v175_v21 = vmul.f32 %v1009_v12, %v996_v63  ;;  %vm201_vm9 = vweird.f32 %v1016_v20 }
 0x204   :  { %vm1137_vm14 = vmor %vm200_vm13, %vm201_vm9 }
 0x209   :  { %547 = vadd.xlane.f32.xlu2 %v546_v15  ;;  %v271_v26 = vpop.permute.xlu1 %270 }
 0x20a   :  { %281 = vadd.xlane.f32.xlu0 %v280_v25  ;;  %v283_v30 = vsel %vm112_vm1, %v271_v26, 0.0  ;;  %v167_v25 = vmul.f32 0.5, %v166_v13  ;;  %v185_v26 = vmul.f32 %v1013_v17, %v998_v1 }
 0x211   :  { %284 = vadd.xlane.f32.xlu2 %v283_v30  ;;  %v401_v39 = vpop.permute.xlu1 %400 }
 0x212   :  { %287 = vadd.xlane.f32.xlu0 %v286_v31  ;;  %v413_v42 = vsel %vm112_vm1, %v401_v39, 0.0 }
 0x219   :  { %v535_v45 = vpop.permute.xlu1 %534 }
 0x21a   :  { %417 = vadd.xlane.f32.xlu0 %v416_v35  ;;  %v549_v46 = vsel %vm112_vm1, %v535_v45, 0.0 }
 0x22a   :  { %v275_v36 = vpop.permute.xlu2 %274 }
 0x22b   :  { %v289_v37 = vsel %vm112_vm1, %v275_v36, 0.0  ;;  %v195_v36 = vmul.f32 %v1016_v20, %v1000_v4 }
 0x22c   :  { %290 = vadd.xlane.f32.xlu1 %v289_v37 }
 0x232   :  { %v405_v41 = vpop.permute.xlu2 %404 }
 0x233   :  { %v419_v43 = vsel %vm112_vm1, %v405_v41, 0.0 }
 0x234   :  { %414 = vadd.xlane.f32.xlu1 %v413_v42  ;;  %420 = vadd.xlane.f32.xlu2 %v419_v43  ;;  %v176_v42 = vmul.f32 %v1009_v12, %v175_v21 }
 0x236   :  { %v177_v58 = vmul.f32 0.5, %v176_v42 }
 0x23c   :  { %550 = vadd.xlane.f32.xlu1 %v549_v46  ;;  %v168_v46 = vsub.f32 1.5, %v167_v25 }
 0x24c   :  { %604 = vrot.lane.b32.xlu2 %v778_v3, %s733_s7 }
 0x252   :  { %v531_v9 = vpop.permute.xlu0 %530 }
 0x253   :  { %v543_v48 = vsel %vm112_vm1, %v531_v9, 0.0  ;;  %v186_v9 = vmul.f32 %v1013_v17, %v185_v26 }
 0x254   :  { %544 = vadd.xlane.f32.xlu0 %v543_v48 }
 0x255   :  { %481 = vrot.lane.b32.xlu1 %v773_v2, %s728_s3  ;;  %v187_v8 = vmul.f32 0.5, %v186_v9 }
 0x257   :  { %v188_v52 = vsub.f32 1.5, %v187_v8 }
 0x268   :  { %611 = vrot.lane.b32.xlu0 %v773_v2, %s733_s7 }
 0x274   :  { %v412_v49 = vpop.xlane.xlu2 %411 }
 0x275   :  { %v422_v16 = vmul.f32 %v412_v49, %v842_v34  ;;  %v196_v49 = vmul.f32 %v1016_v20, %v195_v36 }
 0x276   :  { %v542_v61 = vpop.xlane.xlu1 %541 }
 0x277   :  { %v1023_v30 = vadd.f32 1e-05, %v422_v16  ;;  %v552_v37 = vmul.f32 %v542_v61, %v842_v34 }
 0x279   :  { %703 = vrsqrt.f32 %v1023_v30  ;;  %v1041_v51 = vadd.f32 1e-05, %v552_v37  ;;  %vm436_vm4 = vweird.f32 %v1023_v30 }
 0x27b   :  { %vm566_vm11 = vweird.f32 %v1041_v51 }
 0x27c   :  { %v548_v56 = vpop.xlane.xlu2 %547 }
 0x27d   :  { %v282_v10 = vpop.xlane.xlu0 %281  ;;  %v554_v60 = vmul.f32 %v548_v56, %v842_v34 }
 0x27e   :  { %v292_v23 = vmul.f32 %v282_v10, %v842_v34 }
 0x27f   :  { %v1058_v56 = vpop.eup %703 }
 0x280   :  { %v1033_v43 = vadd.f32 1e-05, %v292_v23  ;;  %v178_v23 = vsub.f32 1.5, %v177_v58  ;;  %v431_v37 = vmul.f32 %v1058_v56, %v1023_v30  ;;  %vm437_vm15 = vweird.f32 %v1058_v56 }
 0x282   :  { %v432_v63 = vmul.f32 %v1058_v56, %v431_v37  ;;  %vm306_vm2 = vweird.f32 %v1033_v43 }
 0x284   :  { %v285_v55 = vpop.xlane.xlu2 %284 }
 0x285   :  { %v288_v6 = vpop.xlane.xlu0 %287  ;;  %v293_v10 = vmul.f32 %v285_v55, %v842_v34  ;;  %v197_v55 = vmul.f32 0.5, %v196_v49  ;;  %v189_v49 = vmul.f32 %v1013_v17, %v188_v52 }
 0x286   :  { %v294_v19 = vmul.f32 %v288_v6, %v842_v34  ;;  %v169_v6 = vmul.f32 %v1002_v28, %v168_v46  ;;  %v179_v46 = vmul.f32 %v1009_v12, %v178_v23 }
 0x287   :  { %v1055_v13 = vadd.f32 1e-05, %v293_v10 }
 0x288   :  { %v1029_v39 = vadd.f32 1e-05, %v294_v19 }
 0x28a   :  { %705 = vrsqrt.f32 %v1029_v39  ;;  %vm326_vm7 = vweird.f32 %v1029_v39 }
 0x28b   :  { %707 = vrsqrt.f32 %v1033_v43 }
 0x28d   :  { %v418_v15 = vpop.xlane.xlu0 %417 }
 0x28e   :  { %v424_v41 = vmul.f32 %v418_v15, %v842_v34  ;;  %v1065_v15 = vadd.f32 1e-05, %v554_v60 }
 0x290   :  { %v1045_v54 = vadd.f32 1e-05, %v424_v41  ;;  %v1063_v21 = vpop.eup %705 }
 0x291   :  { %v321_v41 = vmul.f32 %v1063_v21, %v1029_v39  ;;  %vm327_vm3 = vweird.f32 %v1063_v21 }
 0x292   :  { %vm1201_vm9 = vmor %vm326_vm7, %vm327_vm3 }
 0x293   :  { %v322_v8 = vmul.f32 %v1063_v21, %v321_v41 }
 0x295   :  { %v323_v7 = vmul.f32 0.5, %v322_v8 }
 0x29f   :  { %v291_v11 = vpop.xlane.xlu1 %290 }
 0x2a0   :  { %v295_v31 = vmul.f32 %v291_v11, %v842_v34 }
 0x2a2   :  { %v1038_v48 = vadd.f32 1e-05, %v295_v31  ;;  %v1076_v31 = vpop.eup %707 }
 0x2a3   :  { %v301_v60 = vmul.f32 %v1076_v31, %v1033_v43  ;;  %vm307_vm6 = vweird.f32 %v1076_v31 }
 0x2a4   :  { %709 = vrsqrt.f32 %v1038_v48  ;;  %vm1215_vm13 = vmor %vm306_vm2, %vm307_vm6  ;;  %vm456_vm6 = vweird.f32 %v1045_v54 }
 0x2a5   :  { %711 = vrsqrt.f32 %v1041_v51  ;;  %v302_v37 = vmul.f32 %v1076_v31, %v301_v60 }
 0x2a6   :  { %713 = vrsqrt.f32 %v1045_v54 }
 0x2a7   :  { %v415_v32 = vpop.xlane.xlu1 %414  ;;  %v421_v35 = vpop.xlane.xlu2 %420 }
 0x2a8   :  { %v425_v45 = vmul.f32 %v421_v35, %v842_v34  ;;  %v423_v19 = vmul.f32 %v415_v32, %v842_v34  ;;  %v173_v32 = vsel %vm1072_vm5, %v1002_v28, %v169_v6  ;;  %v198_v35 = vsub.f32 1.5, %v197_v55 }
 0x2a9   :  { %v204_v9 = vmul.f32 %v173_v32, %v847_v38  ;;  %v183_v55 = vsel %vm1110_vm10, %v1009_v12, %v179_v46  ;;  %v193_v32 = vsel %vm1123_vm12, %v1013_v17, %v189_v49  ;;  %v324_v12 = vsub.f32 1.5, %v323_v7 }
 0x2aa   :  { %v1049_v61 = vadd.f32 1e-05, %v425_v45  ;;  %v1082_v36 = vpop.eup %709  ;;  %v1088_v42 = vadd.f32 1e-05, %v423_v19  ;;  %v199_v58 = vmul.f32 %v1016_v20, %v198_v35  ;;  %v205_v46 = vmul.f32 %v183_v55, %v861_v57 }
 0x2ab   :  { %v1091_v45 = vpop.eup %711  ;;  %v331_v6 = vmul.f32 %v1082_v36, %v1038_v48  ;;  %v212_v26 = vmul.f32 %v778_v3, %v204_v9  ;;  %v433_v9 = vmul.f32 0.5, %v432_v63  ;;  %v303_v63 = vmul.f32 0.5, %v302_v37 }
 0x2ac   :  { %715 = vrsqrt.f32 %v1049_v61  ;;  %v1096_v28 = vpop.eup %713  ;;  %v561_v1 = vmul.f32 %v1091_v45, %v1041_v51  ;;  %v203_v35 = vsel %vm1137_vm14, %v1016_v20, %v199_v58  ;;  %v206_v20 = vmul.f32 %v193_v32, %v868_v62 }
 0x2ad   :  { %717 = vrsqrt.f32 %v1055_v13  ;;  %v451_v19 = vmul.f32 %v1096_v28, %v1045_v54  ;;  %v332_v41 = vmul.f32 %v1082_v36, %v331_v6  ;;  %v207_v58 = vmul.f32 %v203_v35, %v875_v5 }
 0x2ae   :  { %v562_v50 = vmul.f32 %v1091_v45, %v561_v1  ;;  %v1168_v6 = vadd.f32 %v773_v2, %v212_v26  ;;  %v1171_v55 = vmul.f32 %v778_v3, %v205_v46  ;;  %v434_v1 = vsub.f32 1.5, %v433_v9 }
 0x2af   :  { %v551_v11 = vpop.xlane.xlu1 %550  ;;  %v333_v8 = vmul.f32 0.5, %v332_v41  ;;  %v1180_v26 = vmul.f32 %v778_v3, %v206_v20  ;;  %v1183_v35 = vmul.f32 %v778_v3, %v207_v58  ;;  %v304_v7 = vsub.f32 1.5, %v303_v63 }
 0x2b0   :  { %v555_v16 = vmul.f32 %v551_v11, %v842_v34  ;;  %v1174_v62 = vmul.f32 0.5, %v562_v50  ;;  %v1189_v46 = vmul.f32 %v1058_v56, %v434_v1  ;;  %vm567_vm5 = vweird.f32 %v1091_v45 }
 0x2b1   :  { %v334_v50 = vsub.f32 1.5, %v333_v8  ;;  %v305_v63 = vmul.f32 %v1076_v31, %v304_v7  ;;  %vm337_vm10 = vweird.f32 %v1082_v36  ;;  %vm457_vm12 = vweird.f32 %v1096_v28 }
 0x2b2   :  { %v1068_v25 = vadd.f32 1e-05, %v555_v16  ;;  %v1102_v10 = vpop.eup %715  ;;  %v452_v16 = vmul.f32 %v1096_v28, %v451_v19  ;;  %v564_v3 = vsub.f32 1.5, %v1174_v62  ;;  %vm336_vm14 = vweird.f32 %v1038_v48 }
 0x2b3   :  { %v1118_v11 = vpop.eup %717  ;;  %v461_v52 = vmul.f32 %v1102_v10, %v1049_v61  ;;  %v335_v1 = vmul.f32 %v1082_v36, %v334_v50  ;;  %vm1221_vm3 = vmor %vm336_vm14, %vm337_vm10  ;;  %vm467_vm7 = vweird.f32 %v1102_v10  ;;  %v309_v43 = vsel %vm1215_vm13, %v1076_v31, %v305_v63 }
 0x2b4   :  { %719 = vrsqrt.f32 %v1068_v25  ;;  %v311_v38 = vmul.f32 %v1118_v11, %v1055_v13  ;;  %v453_v5 = vmul.f32 0.5, %v452_v16  ;;  %vm317_vm2 = vweird.f32 %v1118_v11 }
 0x2b5   :  { %721 = vrsqrt.f32 %v1065_v15  ;;  %v462_v60 = vmul.f32 %v1102_v10, %v461_v52  ;;  %v339_v48 = vsel %vm1221_vm3, %v1082_v36, %v335_v1  ;;  %vm466_vm10 = vweird.f32 %v1049_v61 }
 0x2b6   :  { %723 = vrsqrt.f32 %v1088_v42  ;;  %v312_v19 = vmul.f32 %v1118_v11, %v311_v38  ;;  %v325_v38 = vmul.f32 %v1063_v21, %v324_v12  ;;  %v454_v16 = vsub.f32 1.5, %v453_v5  ;;  %vm1247_vm13 = vmor %vm466_vm10, %vm467_vm7 }
 0x2b7   :  { %v463_v41 = vmul.f32 0.5, %v462_v60  ;;  %vm316_vm3 = vweird.f32 %v1055_v13  ;;  %vm586_vm7 = vweird.f32 %v1065_v15  ;;  %v223_v63 = vadd.f32 %v773_v2, %v1183_v35 }
 0x2b8   :  { %v313_v9 = vmul.f32 0.5, %v312_v19  ;;  %v329_v39 = vsel %vm1201_vm9, %v1063_v21, %v325_v38  ;;  %v455_v5 = vmul.f32 %v1096_v28, %v454_v16  ;;  %vm1241_vm9 = vmor %vm456_vm6, %vm457_vm12  ;;  %v565_v38 = vmul.f32 %v1091_v45, %v564_v3 }
 0x2b9   :  { %v342_v50 = vmul.f32 %v329_v39, %v892_v22  ;;  %vm1260_vm12 = vmor %vm436_vm4, %vm437_vm15  ;;  %v343_v16 = vmul.f32 %v339_v48, %v952_v59  ;;  %vm596_vm4 = vweird.f32 %v1068_v25  ;;  %v1420_v48 = vld [vmem:[#allocation3_spill] sm:$0xff] }
 0x2ba   :  { %v1132_v23 = vpop.eup %719  ;;  %v314_v19 = vsub.f32 1.5, %v313_v9  ;;  %v459_v22 = vsel %vm1241_vm9, %v1096_v28, %v455_v5  ;;  %vm1274_vm15 = vmor %vm316_vm3, %vm317_vm2  ;;  %v439_v59 = vsel %vm1260_vm12, %v1058_v56, %v1189_v46 }
 0x2bb   :  { %v1143_v4 = vpop.eup %721  ;;  %v591_v17 = vmul.f32 %v1132_v23, %v1068_v25  ;;  %vm597_vm14 = vweird.f32 %v1132_v23  ;;  %v472_v25 = vmul.f32 %v459_v22, %v908_v33  ;;  %vm1299_vm6 = vmor %vm566_vm11, %vm567_vm5  ;;  %v222_v33 = vadd.f32 %v773_v2, %v1180_v26 }
 0x2bc   :  { %v1160_v49 = vpop.eup %723  ;;  %v581_v57 = vmul.f32 %v1143_v4, %v1065_v15  ;;  %vm587_vm8 = vweird.f32 %v1143_v4  ;;  %v315_v7 = vmul.f32 %v1118_v11, %v314_v19  ;;  %vm1290_vm2 = vmor %vm596_vm4, %vm597_vm14  ;;  %vm446_vm11 = vweird.f32 %v1088_v42  ;;  %v605_v19 = vpop.permute.xlu2 %604 }
 0x2bd   :  { %v441_v32 = vmul.f32 %v1160_v49, %v1088_v42  ;;  %v592_v52 = vmul.f32 %v1132_v23, %v591_v17  ;;  %vm447_vm9 = vweird.f32 %v1160_v49  ;;  %vm1313_vm5 = vmor %vm586_vm7, %vm587_vm8  ;;  %v479_v35 = vmul.f32 %v840_v29, %v472_v25 }
 0x2be   :  { %v582_v37 = vmul.f32 %v1143_v4, %v581_v57  ;;  %v464_v57 = vsub.f32 1.5, %v463_v41  ;;  %v319_v13 = vsel %vm1274_vm15, %v1118_v11, %v315_v7  ;;  %vm1334_vm8 = vmor %vm446_vm11, %vm447_vm9  ;;  %vm631_vm14 = vcmask 523264  }
 0x2bf   :  { %v442_v17 = vmul.f32 %v1160_v49, %v441_v32  ;;  %v593_v20 = vmul.f32 0.5, %v592_v52  ;;  %v341_v8 = vmul.f32 %v319_v13, %v922_v44 }
 0x2c0   :  { %v583_v58 = vmul.f32 0.5, %v582_v37  ;;  %v465_v21 = vmul.f32 %v1102_v10, %v464_v57  ;;  %v569_v57 = vsel %vm1299_vm6, %v1091_v45, %v565_v38 }
 0x2c1   :  { %v443_v32 = vmul.f32 0.5, %v442_v17  ;;  %v594_v52 = vsub.f32 1.5, %v593_v20  ;;  %v340_v20 = vmul.f32 %v309_v43, %v883_v14  ;;  %v349_v14 = vmul.f32 %v833_v18, %v342_v50 }
 0x2c2   :  { %v584_v37 = vsub.f32 1.5, %v583_v58  ;;  %v469_v17 = vsel %vm1247_vm13, %v1102_v10, %v465_v21  ;;  %v350_v58 = vmul.f32 %v833_v18, %v343_v16  ;;  %v600_v62 = vmul.f32 %v569_v57, %v915_v40 }
 0x2c3   :  { %v444_v31 = vsub.f32 1.5, %v443_v32  ;;  %v595_v36 = vmul.f32 %v1132_v23, %v594_v52  ;;  %v473_v46 = vmul.f32 %v469_v17, %v959_v0  ;;  %v347_v0 = vmul.f32 %v833_v18, %v340_v20 }
 0x2c4   :  { %v585_v28 = vmul.f32 %v1143_v4, %v584_v37  ;;  %v356_v1 = vadd.f32 %v838_v24, %v349_v14  ;;  %vm626_vm13 = vcmask 392192   ;;  %v607_v61 = vmul.f32 %v605_v19, %v600_v62  ;;  %v1421_v14 = vld [vmem:[#allocation4_spill] sm:$0xff] }
 0x2c5   :  { %v445_v15 = vmul.f32 %v1160_v49, %v444_v31  ;;  %v599_v11 = vsel %vm1290_vm2, %v1132_v23, %v595_v36  ;;  %v470_v23 = vmul.f32 %v439_v59, %v899_v27  ;;  %v480_v44 = vmul.f32 %v840_v29, %v473_v46 }
 0x2c6   :  { %v589_v26 = vsel %vm1313_vm5, %v1143_v4, %v585_v28  ;;  %v603_v42 = vmul.f32 %v599_v11, %v943_v53  ;;  %v354_v53 = vadd.f32 %v838_v24, %v347_v0  ;;  %v620_v50 = vsel %vm112_vm1, %v222_v33, %v356_v1 }
 0x2c7   :  { %v545_v60 = vpop.xlane.xlu0 %544  ;;  %v482_v45 = vpop.permute.xlu1 %481  ;;  %v449_v4 = vsel %vm1334_vm8, %v1160_v49, %v445_v15  ;;  %v602_v5 = vmul.f32 %v589_v26, %v926_v47  ;;  %v477_v32 = vmul.f32 %v840_v29, %v470_v23  ;;  %v348_v49 = vmul.f32 %v833_v18, %v341_v8 }
 0x2c8   :  { %v553_v12 = vmul.f32 %v545_v60, %v842_v34  ;;  %v486_v52 = vadd.f32 %v482_v45, %v479_v35  ;;  %v487_v37 = vadd.f32 %v482_v45, %v480_v44  ;;  %v610_v43 = vmul.f32 %v605_v19, %v603_v42 }
 0x2c9   :  { %v609_v21 = vmul.f32 %v605_v19, %v602_v5  ;;  %v471_v7 = vmul.f32 %v449_v4, %v1420_v48  ;;  %v484_v28 = vadd.f32 %v482_v45, %v477_v32  ;;  %v355_v13 = vadd.f32 %v838_v24, %v348_v49 }
 0x2ca   :  { %v1227_v34 = vadd.f32 1e-05, %v553_v12  ;;  %v357_v12 = vadd.f32 %v838_v24, %v350_v58  ;;  %v624_v36 = vsel %vm63_vm0, %v620_v50, %v486_v52  ;;  %v618_v15 = vsel %vm112_vm1, %v1168_v6, %v354_v53 }
 0x2cb   :  { %v478_v38 = vmul.f32 %v840_v29, %v471_v7  ;;  %v221_v29 = vadd.f32 %v773_v2, %v1171_v55  ;;  %v622_v46 = vsel %vm63_vm0, %v618_v15, %v484_v28 }
 0x2cc   :  { %725 = vrsqrt.f32 %v1227_v34  ;;  %v621_v47 = vsel %vm112_vm1, %v223_v63, %v357_v12  ;;  %vm576_vm12 = vweird.f32 %v1227_v34 }
 0x2cd   :  { %v625_v22 = vsel %vm63_vm0, %v621_v47, %v487_v37  ;;  %v485_v56 = vadd.f32 %v482_v45, %v478_v38  ;;  %v619_v24 = vsel %vm112_vm1, %v221_v29, %v355_v13 }
 0x2cf   :  { %v623_v51 = vsel %vm63_vm0, %v619_v24, %v485_v56 }
 0x2d2   :  { %v726_v3 = vpop.eup %725 }
 0x2d3   :  { %v571_v60 = vmul.f32 %v726_v3, %v1227_v34  ;;  %vm577_vm10 = vweird.f32 %v726_v3 }
 0x2d4   :  { %vm578_vm3 = vmor %vm576_vm12, %vm577_vm10 }
 0x2d5   :  { %v572_v39 = vmul.f32 %v726_v3, %v571_v60 }
 0x2d7   :  { %v573_v41 = vmul.f32 0.5, %v572_v39 }
 0x2d9   :  { %v574_v9 = vsub.f32 1.5, %v573_v41 }
 0x2da   :  { %v612_v40 = vpop.permute.xlu0 %611 }
 0x2db   :  { %v616_v31 = vadd.f32 %v612_v40, %v609_v21  ;;  %v617_v54 = vadd.f32 %v612_v40, %v610_v43  ;;  %v575_v18 = vmul.f32 %v726_v3, %v574_v9  ;;  %v614_v25 = vadd.f32 %v612_v40, %v607_v61 }
 0x2dd   :  { %v629_v16 = vsel %vm626_vm13, %v624_v36, %v616_v31  ;;  %v630_v17 = vsel %vm626_vm13, %v625_v22, %v617_v54  ;;  %v579_v20 = vsel %vm578_vm3, %v726_v3, %v575_v18  ;;  %v627_v33 = vsel %vm626_vm13, %v622_v46, %v614_v25 }
 0x2de   :  { %v634_v30 = vsel %vm631_vm14, %v629_v16, 0.0  ;;  %v635_v59 = vsel %vm631_vm14, %v630_v17, 0.0  ;;  %v601_v10 = vmul.f32 %v579_v20, %v1421_v14  ;;  %v632_v2 = vsel %vm631_vm14, %v627_v33, 0.0 }
 0x2df   :  { %v678_v34 = vpack.c.bf16 %v635_v59, %v634_v30 }
 0x2e0   :  { %v608_v11 = vmul.f32 %v605_v19, %v601_v10 }
 0x2e1   :  { %680 = vst [vmem:[%s1385_s5 + $0x8] sm:$0xff] %v678_v34  }
 0x2e2   :  { %v615_v3 = vadd.f32 %v612_v40, %v608_v11 }
 0x2e4   :  { %v628_v58 = vsel %vm626_vm13, %v623_v51, %v615_v3 }
 0x2e5   :  { %v633_v6 = vsel %vm631_vm14, %v628_v58, 0.0 }
 0x2e6   :  { %v673_v55 = vpack.c.bf16 %v633_v6, %v632_v2 }
 0x2e8   :  { %674 = vst [vmem:[%s1385_s5] sm:$0xff] %v673_v55  }

</bundles_post_ra>
